<compile_context>
chip_gen: v7x
topology: tpu7x:2x2x1
jax: 0.10.0
libtpu: 0.0.40
codegen_flags: <defaults>
</compile_context>

<pallas_src>
import functools
import math

import jax
import jax.numpy as jnp
from jax.experimental import pallas as pl
from jax.experimental.pallas import tpu as pltpu


# ---------------------------------------------------------------------------
# In-kernel helpers
# ---------------------------------------------------------------------------
def _dot(x, w):
    # MXU matmul: bf16 operands, f32 accumulation.
    return jnp.dot(x.astype(w.dtype), w, preferred_element_type=jnp.float32)


def _bn_relu(y, gamma, beta, eps):
    # Train-mode BatchNorm1d (biased batch variance) + ReLU, all in f32.
    mean = jnp.mean(y, axis=0, keepdims=True)
    var = jnp.mean((y - mean) * (y - mean), axis=0, keepdims=True)
    yn = (y - mean) * jax.lax.rsqrt(var + eps)
    return jnp.maximum(yn * gamma + beta, 0.0)


def _softplus(y):
    # torch.nn.Softplus default: beta=1, threshold=20
    return jnp.where(y > 20.0, y, jnp.log1p(jnp.exp(jnp.minimum(y, 20.0))))


def _sigmoid(y):
    return jax.nn.sigmoid(y)  # exp/recip land on the EUP slot


# ---------------------------------------------------------------------------
# Fully fused VAE kernel (encoder + adversarial net + decoder, one launch)
# ---------------------------------------------------------------------------
def _vae_kernel(
    # data
    rna_ref, atac_ref, snv_ref, cov_ref,
    # encoder weights
    w_sh1_rna, w_sh1_atac, b_sh1, g_sh, be_sh,
    w_sh2, b_sh2,
    w_snv1, b_snv1, g_snv, be_snv,
    w_snv2, b_snv2,
    w_var_ra, w_var_snv, w_var_cov, b_var,
    w_inv_ra, w_inv_snv, b_inv,
    w_adv1, b_adv1, w_adv2, b_adv2,
    # decoder weights
    w_r1, b_r1, w_r2, b_r2, w_r3, b_r3,
    w_a1, b_a1, w_a2, b_a2, w_a3, b_a3,
    w_s1, b_s1, w_s2, b_s2, w_s3, b_s3,
    # outputs
    variant_out, invariant_out, covpred_out,
    rna_recon_out, atac_recon_out, snv_recon_out,
    *, eps,
):
    # ---------------- Encoder ----------------
    # shared_encoder: Linear(cat(scRNA, ATAC)) -> BN -> ReLU -> Linear -> ReLU
    # (concat replaced by split-weight accumulation)
    h = (_dot(rna_ref[...], w_sh1_rna[...])
         + _dot(atac_ref[...], w_sh1_atac[...]) + b_sh1[...])
    h = _bn_relu(h, g_sh[...], be_sh[...], eps)
    ra_enc = jnp.maximum(_dot(h, w_sh2[...]) + b_sh2[...], 0.0)

    # SNV_shared_encoder: Linear -> BN -> ReLU -> Linear -> ReLU
    h = _dot(snv_ref[...], w_snv1[...]) + b_snv1[...]
    h = _bn_relu(h, g_snv[...], be_snv[...], eps)
    snv_enc = jnp.maximum(_dot(h, w_snv2[...]) + b_snv2[...], 0.0)

    # variant_encoder: Linear(cat(ra_enc, snv_enc, covariate)) -> ReLU
    variant = jnp.maximum(
        _dot(ra_enc, w_var_ra[...]) + _dot(snv_enc, w_var_snv[...])
        + _dot(cov_ref[...], w_var_cov[...]) + b_var[...], 0.0)

    # invariant_encoder: Linear(cat(ra_enc, snv_enc)) -> ReLU
    invariant = jnp.maximum(
        _dot(ra_enc, w_inv_ra[...]) + _dot(snv_enc, w_inv_snv[...])
        + b_inv[...], 0.0)

    # adversarial_network: Linear -> ReLU -> Linear -> Sigmoid
    h = jnp.maximum(_dot(invariant, w_adv1[...]) + b_adv1[...], 0.0)
    covpred = _sigmoid(_dot(h, w_adv2[...]) + b_adv2[...])

    variant_out[...] = variant
    invariant_out[...] = invariant
    covpred_out[...] = covpred

    # ---------------- Decoder (on the VMEM-resident variant latent) -------
    def branch(w1, b1, w2, b2, w3, b3):
        t = jnp.maximum(_dot(variant, w1[...]) + b1[...], 0.0)
        t = jnp.maximum(_dot(t, w2[...]) + b2[...], 0.0)
        return _dot(t, w3[...]) + b3[...]

    rna_recon_out[...] = _softplus(branch(w_r1, b_r1, w_r2, b_r2, w_r3, b_r3))
    atac_recon_out[...] = _softplus(branch(w_a1, b_a1, w_a2, b_a2, w_a3, b_a3))
    snv_recon_out[...] = _sigmoid(branch(w_s1, b_s1, w_s2, b_s2, w_s3, b_s3))


# ---------------------------------------------------------------------------
# Parameter construction (PyTorch-default-like uniform init)
# ---------------------------------------------------------------------------
_WDTYPE = jnp.bfloat16  # weight storage dtype (MXU operands)


def _make_linear(key, din, dout, wdtype=_WDTYPE):
    k1, k2 = jax.random.split(key)
    bound = 1.0 / math.sqrt(din)
    w = jax.random.uniform(k1, (din, dout), jnp.float32, -bound, bound).astype(wdtype)
    b = jax.random.uniform(k2, (1, dout), jnp.float32, -bound, bound)
    return w, b


def _make_bn(dout):
    return jnp.ones((1, dout), jnp.float32), jnp.zeros((1, dout), jnp.float32)


def make_vae_params(key, scRNA_dim, ATAC_dim, SNV_dim, latent_dim, covariate_dim):
    keys = jax.random.split(key, 17)
    ki = iter(keys)
    p = {}
    # ----- Encoder -----
    w, b = _make_linear(next(ki), scRNA_dim + ATAC_dim, 512)
    p["enc_sh1_w_rna"], p["enc_sh1_w_atac"], p["enc_sh1_b"] = w[:scRNA_dim], w[scRNA_dim:], b
    p["enc_sh_bn_g"], p["enc_sh_bn_b"] = _make_bn(512)
    p["enc_sh2_w"], p["enc_sh2_b"] = _make_linear(next(ki), 512, 256)

    p["enc_snv1_w"], p["enc_snv1_b"] = _make_linear(next(ki), SNV_dim, 256)
    p["enc_snv_bn_g"], p["enc_snv_bn_b"] = _make_bn(256)
    p["enc_snv2_w"], p["enc_snv2_b"] = _make_linear(next(ki), 256, 128)

    w, b = _make_linear(next(ki), 256 + 128 + covariate_dim, latent_dim)
    p["enc_var_w_ra"], p["enc_var_w_snv"], p["enc_var_w_cov"], p["enc_var_b"] = (
        w[:256], w[256:384], w[384:], b)
    w, b = _make_linear(next(ki), 256 + 128, latent_dim)
    p["enc_inv_w_ra"], p["enc_inv_w_snv"], p["enc_inv_b"] = w[:256], w[256:], b

    p["adv1_w"], p["adv1_b"] = _make_linear(next(ki), latent_dim, 128)
    p["adv2_w"], p["adv2_b"] = _make_linear(next(ki), 128, covariate_dim)

    # ----- Decoder -----
    p["dec_rna1_w"], p["dec_rna1_b"] = _make_linear(next(ki), latent_dim, 256)
    p["dec_rna2_w"], p["dec_rna2_b"] = _make_linear(next(ki), 256, 512)
    p["dec_rna3_w"], p["dec_rna3_b"] = _make_linear(next(ki), 512, scRNA_dim)

    p["dec_atac1_w"], p["dec_atac1_b"] = _make_linear(next(ki), latent_dim, 256)
    p["dec_atac2_w"], p["dec_atac2_b"] = _make_linear(next(ki), 256, 512)
    p["dec_atac3_w"], p["dec_atac3_b"] = _make_linear(next(ki), 512, ATAC_dim)

    p["dec_snv1_w"], p["dec_snv1_b"] = _make_linear(next(ki), latent_dim, 128)
    p["dec_snv2_w"], p["dec_snv2_b"] = _make_linear(next(ki), 128, 256)
    p["dec_snv3_w"], p["dec_snv3_b"] = _make_linear(next(ki), 256, SNV_dim)
    return p


# ---------------------------------------------------------------------------
# pallas_call wrapper (single fused launch)
# ---------------------------------------------------------------------------
_VMEM_SPEC = pl.BlockSpec(memory_space=pltpu.MemorySpace.VMEM)
_COMPILER_PARAMS = pltpu.CompilerParams(vmem_limit_bytes=32 * 1024 * 1024)


def _cost(args, out_shapes, flops, transcendentals):
    bytes_accessed = sum(int(a.size) * a.dtype.itemsize for a in args)
    bytes_accessed += sum(math.prod(s.shape) * s.dtype.itemsize for s in out_shapes)
    return pl.CostEstimate(flops=int(flops), transcendentals=int(transcendentals),
                           bytes_accessed=int(bytes_accessed))


def vae_forward(p, scRNA, ATAC, SNV, covariate, *, eps=1e-5):
    B = scRNA.shape[0]
    scRNA_dim = scRNA.shape[1]
    ATAC_dim = ATAC.shape[1]
    SNV_dim = SNV.shape[1]
    latent_dim = p["enc_var_b"].shape[1]
    cov_dim = p["adv2_b"].shape[1]

    args = (
        scRNA, ATAC, SNV, covariate,
        # encoder
        p["enc_sh1_w_rna"], p["enc_sh1_w_atac"], p["enc_sh1_b"],
        p["enc_sh_bn_g"], p["enc_sh_bn_b"],
        p["enc_sh2_w"], p["enc_sh2_b"],
        p["enc_snv1_w"], p["enc_snv1_b"],
        p["enc_snv_bn_g"], p["enc_snv_bn_b"],
        p["enc_snv2_w"], p["enc_snv2_b"],
        p["enc_var_w_ra"], p["enc_var_w_snv"], p["enc_var_w_cov"], p["enc_var_b"],
        p["enc_inv_w_ra"], p["enc_inv_w_snv"], p["enc_inv_b"],
        p["adv1_w"], p["adv1_b"],
        p["adv2_w"], p["adv2_b"],
        # decoder
        p["dec_rna1_w"], p["dec_rna1_b"], p["dec_rna2_w"], p["dec_rna2_b"],
        p["dec_rna3_w"], p["dec_rna3_b"],
        p["dec_atac1_w"], p["dec_atac1_b"], p["dec_atac2_w"], p["dec_atac2_b"],
        p["dec_atac3_w"], p["dec_atac3_b"],
        p["dec_snv1_w"], p["dec_snv1_b"], p["dec_snv2_w"], p["dec_snv2_b"],
        p["dec_snv3_w"], p["dec_snv3_b"],
    )
    out_shape = (
        jax.ShapeDtypeStruct((B, latent_dim), jnp.float32),   # variant_latent
        jax.ShapeDtypeStruct((B, latent_dim), jnp.float32),   # invariant_latent
        jax.ShapeDtypeStruct((B, cov_dim), jnp.float32),      # covariate_pred
        jax.ShapeDtypeStruct((B, scRNA_dim), jnp.float32),    # scRNA_recon
        jax.ShapeDtypeStruct((B, ATAC_dim), jnp.float32),     # ATAC_recon
        jax.ShapeDtypeStruct((B, SNV_dim), jnp.float32),      # SNV_recon
    )
    flops = 2 * B * (
        # encoder
        (scRNA_dim + ATAC_dim) * 512 + 512 * 256
        + SNV_dim * 256 + 256 * 128
        + (256 + 128 + cov_dim) * latent_dim + (256 + 128) * latent_dim
        + latent_dim * 128 + 128 * cov_dim
        # decoder
        + latent_dim * 256 + 256 * 512 + 512 * scRNA_dim
        + latent_dim * 256 + 256 * 512 + 512 * ATAC_dim
        + latent_dim * 128 + 128 * 256 + 256 * SNV_dim)
    transcendentals = (512 + 256                      # BN rsqrt
                       + B * cov_dim                  # adversarial sigmoid
                       + B * (scRNA_dim + ATAC_dim + SNV_dim))  # softplus/sigmoid

    return pl.pallas_call(
        functools.partial(_vae_kernel, eps=eps),
        out_shape=out_shape,
        in_specs=[_VMEM_SPEC] * len(args),
        out_specs=tuple(_VMEM_SPEC for _ in out_shape),
        cost_estimate=_cost(args, out_shape, flops, transcendentals),
        compiler_params=_COMPILER_PARAMS,
    )(*args)


# ---------------------------------------------------------------------------
if __name__ == "__main__":
    # Small, module-consistent shapes.
    B = 8
    scRNA_dim, ATAC_dim, SNV_dim = 32, 32, 16
    latent_dim, covariate_dim = 16, 8

    key = jax.random.PRNGKey(0)
    kp, k1, k2, k3, k4 = jax.random.split(key, 5)

    params = make_vae_params(kp, scRNA_dim, ATAC_dim, SNV_dim,
                             latent_dim, covariate_dim)

    scRNA = jax.random.normal(k1, (B, scRNA_dim), jnp.float32)
    ATAC = jax.random.normal(k2, (B, ATAC_dim), jnp.float32)
    SNV = (jax.random.uniform(k3, (B, SNV_dim), jnp.float32) > 0.5).astype(jnp.float32)
    covariate = jax.random.normal(k4, (B, covariate_dim), jnp.float32)

    fwd = jax.jit(vae_forward)
    outs = fwd(params, scRNA, ATAC, SNV, covariate)
    outs = jax.block_until_ready(outs)

    # light sanity checks on shapes / values
    assert outs[0].shape == (B, latent_dim)
    assert outs[1].shape == (B, latent_dim)
    assert outs[2].shape == (B, covariate_dim)
    assert outs[3].shape == (B, scRNA_dim)
    assert outs[4].shape == (B, ATAC_dim)
    assert outs[5].shape == (B, SNV_dim)
    for o in outs:
        assert bool(jnp.all(jnp.isfinite(o)))
    # ReLU / Softplus / Sigmoid ranges
    assert bool(jnp.all(outs[0] >= 0)) and bool(jnp.all(outs[1] >= 0))
    assert bool(jnp.all((outs[2] >= 0) & (outs[2] <= 1)))
    assert bool(jnp.all(outs[3] >= 0)) and bool(jnp.all(outs[4] >= 0))
    assert bool(jnp.all((outs[5] >= 0) & (outs[5] <= 1)))

    print("KERNEL_OK")
</pallas_src>

<mosaic_0001>
module attributes {stable_mosaic.version = 11 : i64} {
  func.func @_vae_kernel(%arg0: memref<8x32xf32, #tpu.memory_space<vmem>>, %arg1: memref<8x32xf32, #tpu.memory_space<vmem>>, %arg2: memref<8x16xf32, #tpu.memory_space<vmem>>, %arg3: memref<8x8xf32, #tpu.memory_space<vmem>>, %arg4: memref<32x512xbf16, #tpu.memory_space<vmem>>, %arg5: memref<32x512xbf16, #tpu.memory_space<vmem>>, %arg6: memref<1x512xf32, #tpu.memory_space<vmem>>, %arg7: memref<1x512xf32, #tpu.memory_space<vmem>>, %arg8: memref<1x512xf32, #tpu.memory_space<vmem>>, %arg9: memref<512x256xbf16, #tpu.memory_space<vmem>>, %arg10: memref<1x256xf32, #tpu.memory_space<vmem>>, %arg11: memref<16x256xbf16, #tpu.memory_space<vmem>>, %arg12: memref<1x256xf32, #tpu.memory_space<vmem>>, %arg13: memref<1x256xf32, #tpu.memory_space<vmem>>, %arg14: memref<1x256xf32, #tpu.memory_space<vmem>>, %arg15: memref<256x128xbf16, #tpu.memory_space<vmem>>, %arg16: memref<1x128xf32, #tpu.memory_space<vmem>>, %arg17: memref<256x16xbf16, #tpu.memory_space<vmem>>, %arg18: memref<128x16xbf16, #tpu.memory_space<vmem>>, %arg19: memref<8x16xbf16, #tpu.memory_space<vmem>>, %arg20: memref<1x16xf32, #tpu.memory_space<vmem>>, %arg21: memref<256x16xbf16, #tpu.memory_space<vmem>>, %arg22: memref<128x16xbf16, #tpu.memory_space<vmem>>, %arg23: memref<1x16xf32, #tpu.memory_space<vmem>>, %arg24: memref<16x128xbf16, #tpu.memory_space<vmem>>, %arg25: memref<1x128xf32, #tpu.memory_space<vmem>>, %arg26: memref<128x8xbf16, #tpu.memory_space<vmem>>, %arg27: memref<1x8xf32, #tpu.memory_space<vmem>>, %arg28: memref<16x256xbf16, #tpu.memory_space<vmem>>, %arg29: memref<1x256xf32, #tpu.memory_space<vmem>>, %arg30: memref<256x512xbf16, #tpu.memory_space<vmem>>, %arg31: memref<1x512xf32, #tpu.memory_space<vmem>>, %arg32: memref<512x32xbf16, #tpu.memory_space<vmem>>, %arg33: memref<1x32xf32, #tpu.memory_space<vmem>>, %arg34: memref<16x256xbf16, #tpu.memory_space<vmem>>, %arg35: memref<1x256xf32, #tpu.memory_space<vmem>>, %arg36: memref<256x512xbf16, #tpu.memory_space<vmem>>, %arg37: memref<1x512xf32, #tpu.memory_space<vmem>>, %arg38: memref<512x32xbf16, #tpu.memory_space<vmem>>, %arg39: memref<1x32xf32, #tpu.memory_space<vmem>>, %arg40: memref<16x128xbf16, #tpu.memory_space<vmem>>, %arg41: memref<1x128xf32, #tpu.memory_space<vmem>>, %arg42: memref<128x256xbf16, #tpu.memory_space<vmem>>, %arg43: memref<1x256xf32, #tpu.memory_space<vmem>>, %arg44: memref<256x16xbf16, #tpu.memory_space<vmem>>, %arg45: memref<1x16xf32, #tpu.memory_space<vmem>>, %arg46: memref<8x16xf32, #tpu.memory_space<vmem>>, %arg47: memref<8x16xf32, #tpu.memory_space<vmem>>, %arg48: memref<8x8xf32, #tpu.memory_space<vmem>>, %arg49: memref<8x32xf32, #tpu.memory_space<vmem>>, %arg50: memref<8x32xf32, #tpu.memory_space<vmem>>, %arg51: memref<8x16xf32, #tpu.memory_space<vmem>>) attributes {dimension_semantics = [], scalar_prefetch = 0 : i64, scratch_operands = 0 : i64, tpu.core_type = #tpu.core_type<tc>} {
    %c0 = arith.constant 0 : index
    %c0_0 = arith.constant 0 : index
    %0 = vector.load %arg0[%c0, %c0_0] : memref<8x32xf32, #tpu.memory_space<vmem>>, vector<8x32xf32>
    %c0_1 = arith.constant 0 : index
    %c0_2 = arith.constant 0 : index
    %1 = vector.load %arg4[%c0_1, %c0_2] : memref<32x512xbf16, #tpu.memory_space<vmem>>, vector<32x512xbf16>
    %2 = arith.truncf %0 : vector<8x32xf32> to vector<8x32xbf16>
    %cst = arith.constant dense<0.000000e+00> : vector<8x512xf32>
    %3 = tpu.matmul %2, %1, %cst {dimension_numbers = #tpu.dot_dimension_numbers<[1], [0], [0], [1], [0, 0, 1, 1], [], []>} : vector<8x32xbf16>, vector<32x512xbf16>, vector<8x512xf32> -> vector<8x512xf32>
    %c0_3 = arith.constant 0 : index
    %c0_4 = arith.constant 0 : index
    %4 = vector.load %arg1[%c0_3, %c0_4] : memref<8x32xf32, #tpu.memory_space<vmem>>, vector<8x32xf32>
    %c0_5 = arith.constant 0 : index
    %c0_6 = arith.constant 0 : index
    %5 = vector.load %arg5[%c0_5, %c0_6] : memref<32x512xbf16, #tpu.memory_space<vmem>>, vector<32x512xbf16>
    %6 = arith.truncf %4 : vector<8x32xf32> to vector<8x32xbf16>
    %cst_7 = arith.constant dense<0.000000e+00> : vector<8x512xf32>
    %7 = tpu.matmul %6, %5, %cst_7 {dimension_numbers = #tpu.dot_dimension_numbers<[1], [0], [0], [1], [0, 0, 1, 1], [], []>} : vector<8x32xbf16>, vector<32x512xbf16>, vector<8x512xf32> -> vector<8x512xf32>
    %8 = arith.addf %3, %7 : vector<8x512xf32>
    %c0_8 = arith.constant 0 : index
    %c0_9 = arith.constant 0 : index
    %9 = vector.load %arg6[%c0_8, %c0_9] : memref<1x512xf32, #tpu.memory_space<vmem>>, vector<1x512xf32>
    %10 = vector.broadcast %9 : vector<1x512xf32> to vector<8x512xf32>
    %11 = arith.addf %8, %10 : vector<8x512xf32>
    %c0_10 = arith.constant 0 : index
    %c0_11 = arith.constant 0 : index
    %12 = vector.load %arg7[%c0_10, %c0_11] : memref<1x512xf32, #tpu.memory_space<vmem>>, vector<1x512xf32>
    %c0_12 = arith.constant 0 : index
    %c0_13 = arith.constant 0 : index
    %13 = vector.load %arg8[%c0_12, %c0_13] : memref<1x512xf32, #tpu.memory_space<vmem>>, vector<1x512xf32>
    %cst_14 = arith.constant dense<0.000000e+00> : vector<512xf32>
    %14 = vector.multi_reduction <add>, %11, %cst_14 [0] : vector<8x512xf32> to vector<512xf32>
    %15 = vector.shape_cast %14 : vector<512xf32> to vector<1x512xf32>
    %cst_15 = arith.constant 8.000000e+00 : f32
    %16 = vector.broadcast %cst_15 : f32 to vector<1x512xf32>
    %17 = arith.divf %15, %16 : vector<1x512xf32>
    %18 = vector.broadcast %17 : vector<1x512xf32> to vector<8x512xf32>
    %19 = arith.subf %11, %18 : vector<8x512xf32>
    %20 = vector.broadcast %17 : vector<1x512xf32> to vector<8x512xf32>
    %21 = arith.subf %11, %20 : vector<8x512xf32>
    %22 = arith.mulf %19, %21 : vector<8x512xf32>
    %cst_16 = arith.constant dense<0.000000e+00> : vector<512xf32>
    %23 = vector.multi_reduction <add>, %22, %cst_16 [0] : vector<8x512xf32> to vector<512xf32>
    %24 = vector.shape_cast %23 : vector<512xf32> to vector<1x512xf32>
    %cst_17 = arith.constant 8.000000e+00 : f32
    %25 = vector.broadcast %cst_17 : f32 to vector<1x512xf32>
    %26 = arith.divf %24, %25 : vector<1x512xf32>
    %27 = vector.broadcast %17 : vector<1x512xf32> to vector<8x512xf32>
    %28 = arith.subf %11, %27 : vector<8x512xf32>
    %cst_18 = arith.constant 9.99999974E-6 : f32
    %29 = vector.broadcast %cst_18 : f32 to vector<1x512xf32>
    %30 = arith.addf %26, %29 : vector<1x512xf32>
    %31 = math.rsqrt %30 : vector<1x512xf32>
    %32 = vector.broadcast %31 : vector<1x512xf32> to vector<8x512xf32>
    %33 = arith.mulf %28, %32 : vector<8x512xf32>
    %34 = vector.broadcast %12 : vector<1x512xf32> to vector<8x512xf32>
    %35 = arith.mulf %33, %34 : vector<8x512xf32>
    %36 = vector.broadcast %13 : vector<1x512xf32> to vector<8x512xf32>
    %37 = arith.addf %35, %36 : vector<8x512xf32>
    %cst_19 = arith.constant 0.000000e+00 : f32
    %38 = vector.broadcast %cst_19 : f32 to vector<8x512xf32>
    %39 = arith.maximumf %37, %38 : vector<8x512xf32>
    %c0_20 = arith.constant 0 : index
    %c0_21 = arith.constant 0 : index
    %40 = vector.load %arg9[%c0_20, %c0_21] : memref<512x256xbf16, #tpu.memory_space<vmem>>, vector<512x256xbf16>
    %41 = arith.truncf %39 : vector<8x512xf32> to vector<8x512xbf16>
    %cst_22 = arith.constant dense<0.000000e+00> : vector<8x256xf32>
    %42 = tpu.matmul %41, %40, %cst_22 {dimension_numbers = #tpu.dot_dimension_numbers<[1], [0], [0], [1], [0, 0, 1, 1], [], []>} : vector<8x512xbf16>, vector<512x256xbf16>, vector<8x256xf32> -> vector<8x256xf32>
    %c0_23 = arith.constant 0 : index
    %c0_24 = arith.constant 0 : index
    %43 = vector.load %arg10[%c0_23, %c0_24] : memref<1x256xf32, #tpu.memory_space<vmem>>, vector<1x256xf32>
    %44 = vector.broadcast %43 : vector<1x256xf32> to vector<8x256xf32>
    %45 = arith.addf %42, %44 : vector<8x256xf32>
    %cst_25 = arith.constant 0.000000e+00 : f32
    %46 = vector.broadcast %cst_25 : f32 to vector<8x256xf32>
    %47 = arith.maximumf %45, %46 : vector<8x256xf32>
    %c0_26 = arith.constant 0 : index
    %c0_27 = arith.constant 0 : index
    %48 = vector.load %arg2[%c0_26, %c0_27] : memref<8x16xf32, #tpu.memory_space<vmem>>, vector<8x16xf32>
    %c0_28 = arith.constant 0 : index
    %c0_29 = arith.constant 0 : index
    %49 = vector.load %arg11[%c0_28, %c0_29] : memref<16x256xbf16, #tpu.memory_space<vmem>>, vector<16x256xbf16>
    %50 = arith.truncf %48 : vector<8x16xf32> to vector<8x16xbf16>
    %cst_30 = arith.constant dense<0.000000e+00> : vector<8x256xf32>
    %51 = tpu.matmul %50, %49, %cst_30 {dimension_numbers = #tpu.dot_dimension_numbers<[1], [0], [0], [1], [0, 0, 1, 1], [], []>} : vector<8x16xbf16>, vector<16x256xbf16>, vector<8x256xf32> -> vector<8x256xf32>
    %c0_31 = arith.constant 0 : index
    %c0_32 = arith.constant 0 : index
    %52 = vector.load %arg12[%c0_31, %c0_32] : memref<1x256xf32, #tpu.memory_space<vmem>>, vector<1x256xf32>
    %53 = vector.broadcast %52 : vector<1x256xf32> to vector<8x256xf32>
    %54 = arith.addf %51, %53 : vector<8x256xf32>
    %c0_33 = arith.constant 0 : index
    %c0_34 = arith.constant 0 : index
    %55 = vector.load %arg13[%c0_33, %c0_34] : memref<1x256xf32, #tpu.memory_space<vmem>>, vector<1x256xf32>
    %c0_35 = arith.constant 0 : index
    %c0_36 = arith.constant 0 : index
    %56 = vector.load %arg14[%c0_35, %c0_36] : memref<1x256xf32, #tpu.memory_space<vmem>>, vector<1x256xf32>
    %cst_37 = arith.constant dense<0.000000e+00> : vector<256xf32>
    %57 = vector.multi_reduction <add>, %54, %cst_37 [0] : vector<8x256xf32> to vector<256xf32>
    %58 = vector.shape_cast %57 : vector<256xf32> to vector<1x256xf32>
    %cst_38 = arith.constant 8.000000e+00 : f32
    %59 = vector.broadcast %cst_38 : f32 to vector<1x256xf32>
    %60 = arith.divf %58, %59 : vector<1x256xf32>
    %61 = vector.broadcast %60 : vector<1x256xf32> to vector<8x256xf32>
    %62 = arith.subf %54, %61 : vector<8x256xf32>
    %63 = vector.broadcast %60 : vector<1x256xf32> to vector<8x256xf32>
    %64 = arith.subf %54, %63 : vector<8x256xf32>
    %65 = arith.mulf %62, %64 : vector<8x256xf32>
    %cst_39 = arith.constant dense<0.000000e+00> : vector<256xf32>
    %66 = vector.multi_reduction <add>, %65, %cst_39 [0] : vector<8x256xf32> to vector<256xf32>
    %67 = vector.shape_cast %66 : vector<256xf32> to vector<1x256xf32>
    %cst_40 = arith.constant 8.000000e+00 : f32
    %68 = vector.broadcast %cst_40 : f32 to vector<1x256xf32>
    %69 = arith.divf %67, %68 : vector<1x256xf32>
    %70 = vector.broadcast %60 : vector<1x256xf32> to vector<8x256xf32>
    %71 = arith.subf %54, %70 : vector<8x256xf32>
    %cst_41 = arith.constant 9.99999974E-6 : f32
    %72 = vector.broadcast %cst_41 : f32 to vector<1x256xf32>
    %73 = arith.addf %69, %72 : vector<1x256xf32>
    %74 = math.rsqrt %73 : vector<1x256xf32>
    %75 = vector.broadcast %74 : vector<1x256xf32> to vector<8x256xf32>
    %76 = arith.mulf %71, %75 : vector<8x256xf32>
    %77 = vector.broadcast %55 : vector<1x256xf32> to vector<8x256xf32>
    %78 = arith.mulf %76, %77 : vector<8x256xf32>
    %79 = vector.broadcast %56 : vector<1x256xf32> to vector<8x256xf32>
    %80 = arith.addf %78, %79 : vector<8x256xf32>
    %cst_42 = arith.constant 0.000000e+00 : f32
    %81 = vector.broadcast %cst_42 : f32 to vector<8x256xf32>
    %82 = arith.maximumf %80, %81 : vector<8x256xf32>
    %c0_43 = arith.constant 0 : index
    %c0_44 = arith.constant 0 : index
    %83 = vector.load %arg15[%c0_43, %c0_44] : memref<256x128xbf16, #tpu.memory_space<vmem>>, vector<256x128xbf16>
    %84 = arith.truncf %82 : vector<8x256xf32> to vector<8x256xbf16>
    %cst_45 = arith.constant dense<0.000000e+00> : vector<8x128xf32>
    %85 = tpu.matmul %84, %83, %cst_45 {dimension_numbers = #tpu.dot_dimension_numbers<[1], [0], [0], [1], [0, 0, 1, 1], [], []>} : vector<8x256xbf16>, vector<256x128xbf16>, vector<8x128xf32> -> vector<8x128xf32>
    %c0_46 = arith.constant 0 : index
    %c0_47 = arith.constant 0 : index
    %86 = vector.load %arg16[%c0_46, %c0_47] : memref<1x128xf32, #tpu.memory_space<vmem>>, vector<1x128xf32>
    %87 = vector.broadcast %86 : vector<1x128xf32> to vector<8x128xf32>
    %88 = arith.addf %85, %87 : vector<8x128xf32>
    %cst_48 = arith.constant 0.000000e+00 : f32
    %89 = vector.broadcast %cst_48 : f32 to vector<8x128xf32>
    %90 = arith.maximumf %88, %89 : vector<8x128xf32>
    %c0_49 = arith.constant 0 : index
    %c0_50 = arith.constant 0 : index
    %91 = vector.load %arg17[%c0_49, %c0_50] : memref<256x16xbf16, #tpu.memory_space<vmem>>, vector<256x16xbf16>
    %92 = arith.truncf %47 : vector<8x256xf32> to vector<8x256xbf16>
    %cst_51 = arith.constant dense<0.000000e+00> : vector<8x16xf32>
    %93 = tpu.matmul %92, %91, %cst_51 {dimension_numbers = #tpu.dot_dimension_numbers<[1], [0], [0], [1], [0, 0, 1, 1], [], []>} : vector<8x256xbf16>, vector<256x16xbf16>, vector<8x16xf32> -> vector<8x16xf32>
    %c0_52 = arith.constant 0 : index
    %c0_53 = arith.constant 0 : index
    %94 = vector.load %arg18[%c0_52, %c0_53] : memref<128x16xbf16, #tpu.memory_space<vmem>>, vector<128x16xbf16>
    %95 = arith.truncf %90 : vector<8x128xf32> to vector<8x128xbf16>
    %cst_54 = arith.constant dense<0.000000e+00> : vector<8x16xf32>
    %96 = tpu.matmul %95, %94, %cst_54 {dimension_numbers = #tpu.dot_dimension_numbers<[1], [0], [0], [1], [0, 0, 1, 1], [], []>} : vector<8x128xbf16>, vector<128x16xbf16>, vector<8x16xf32> -> vector<8x16xf32>
    %97 = arith.addf %93, %96 : vector<8x16xf32>
    %c0_55 = arith.constant 0 : index
    %c0_56 = arith.constant 0 : index
    %98 = vector.load %arg3[%c0_55, %c0_56] : memref<8x8xf32, #tpu.memory_space<vmem>>, vector<8x8xf32>
    %c0_57 = arith.constant 0 : index
    %c0_58 = arith.constant 0 : index
    %99 = vector.load %arg19[%c0_57, %c0_58] : memref<8x16xbf16, #tpu.memory_space<vmem>>, vector<8x16xbf16>
    %100 = arith.truncf %98 : vector<8x8xf32> to vector<8x8xbf16>
    %cst_59 = arith.constant dense<0.000000e+00> : vector<8x16xf32>
    %101 = tpu.matmul %100, %99, %cst_59 {dimension_numbers = #tpu.dot_dimension_numbers<[1], [0], [0], [1], [0, 0, 1, 1], [], []>} : vector<8x8xbf16>, vector<8x16xbf16>, vector<8x16xf32> -> vector<8x16xf32>
    %102 = arith.addf %97, %101 : vector<8x16xf32>
    %c0_60 = arith.constant 0 : index
    %c0_61 = arith.constant 0 : index
    %103 = vector.load %arg20[%c0_60, %c0_61] : memref<1x16xf32, #tpu.memory_space<vmem>>, vector<1x16xf32>
    %104 = vector.broadcast %103 : vector<1x16xf32> to vector<8x16xf32>
    %105 = arith.addf %102, %104 : vector<8x16xf32>
    %cst_62 = arith.constant 0.000000e+00 : f32
    %106 = vector.broadcast %cst_62 : f32 to vector<8x16xf32>
    %107 = arith.maximumf %105, %106 : vector<8x16xf32>
    %c0_63 = arith.constant 0 : index
    %c0_64 = arith.constant 0 : index
    %108 = vector.load %arg21[%c0_63, %c0_64] : memref<256x16xbf16, #tpu.memory_space<vmem>>, vector<256x16xbf16>
    %109 = arith.truncf %47 : vector<8x256xf32> to vector<8x256xbf16>
    %cst_65 = arith.constant dense<0.000000e+00> : vector<8x16xf32>
    %110 = tpu.matmul %109, %108, %cst_65 {dimension_numbers = #tpu.dot_dimension_numbers<[1], [0], [0], [1], [0, 0, 1, 1], [], []>} : vector<8x256xbf16>, vector<256x16xbf16>, vector<8x16xf32> -> vector<8x16xf32>
    %c0_66 = arith.constant 0 : index
    %c0_67 = arith.constant 0 : index
    %111 = vector.load %arg22[%c0_66, %c0_67] : memref<128x16xbf16, #tpu.memory_space<vmem>>, vector<128x16xbf16>
    %112 = arith.truncf %90 : vector<8x128xf32> to vector<8x128xbf16>
    %cst_68 = arith.constant dense<0.000000e+00> : vector<8x16xf32>
    %113 = tpu.matmul %112, %111, %cst_68 {dimension_numbers = #tpu.dot_dimension_numbers<[1], [0], [0], [1], [0, 0, 1, 1], [], []>} : vector<8x128xbf16>, vector<128x16xbf16>, vector<8x16xf32> -> vector<8x16xf32>
    %114 = arith.addf %110, %113 : vector<8x16xf32>
    %c0_69 = arith.constant 0 : index
    %c0_70 = arith.constant 0 : index
    %115 = vector.load %arg23[%c0_69, %c0_70] : memref<1x16xf32, #tpu.memory_space<vmem>>, vector<1x16xf32>
    %116 = vector.broadcast %115 : vector<1x16xf32> to vector<8x16xf32>
    %117 = arith.addf %114, %116 : vector<8x16xf32>
    %cst_71 = arith.constant 0.000000e+00 : f32
    %118 = vector.broadcast %cst_71 : f32 to vector<8x16xf32>
    %119 = arith.maximumf %117, %118 : vector<8x16xf32>
    %c0_72 = arith.constant 0 : index
    %c0_73 = arith.constant 0 : index
    %120 = vector.load %arg24[%c0_72, %c0_73] : memref<16x128xbf16, #tpu.memory_space<vmem>>, vector<16x128xbf16>
    %121 = arith.truncf %119 : vector<8x16xf32> to vector<8x16xbf16>
    %cst_74 = arith.constant dense<0.000000e+00> : vector<8x128xf32>
    %122 = tpu.matmul %121, %120, %cst_74 {dimension_numbers = #tpu.dot_dimension_numbers<[1], [0], [0], [1], [0, 0, 1, 1], [], []>} : vector<8x16xbf16>, vector<16x128xbf16>, vector<8x128xf32> -> vector<8x128xf32>
    %c0_75 = arith.constant 0 : index
    %c0_76 = arith.constant 0 : index
    %123 = vector.load %arg25[%c0_75, %c0_76] : memref<1x128xf32, #tpu.memory_space<vmem>>, vector<1x128xf32>
    %124 = vector.broadcast %123 : vector<1x128xf32> to vector<8x128xf32>
    %125 = arith.addf %122, %124 : vector<8x128xf32>
    %cst_77 = arith.constant 0.000000e+00 : f32
    %126 = vector.broadcast %cst_77 : f32 to vector<8x128xf32>
    %127 = arith.maximumf %125, %126 : vector<8x128xf32>
    %c0_78 = arith.constant 0 : index
    %c0_79 = arith.constant 0 : index
    %128 = vector.load %arg26[%c0_78, %c0_79] : memref<128x8xbf16, #tpu.memory_space<vmem>>, vector<128x8xbf16>
    %129 = arith.truncf %127 : vector<8x128xf32> to vector<8x128xbf16>
    %cst_80 = arith.constant dense<0.000000e+00> : vector<8x8xf32>
    %130 = tpu.matmul %129, %128, %cst_80 {dimension_numbers = #tpu.dot_dimension_numbers<[1], [0], [0], [1], [0, 0, 1, 1], [], []>} : vector<8x128xbf16>, vector<128x8xbf16>, vector<8x8xf32> -> vector<8x8xf32>
    %c0_81 = arith.constant 0 : index
    %c0_82 = arith.constant 0 : index
    %131 = vector.load %arg27[%c0_81, %c0_82] : memref<1x8xf32, #tpu.memory_space<vmem>>, vector<1x8xf32>
    %132 = vector.broadcast %131 : vector<1x8xf32> to vector<8x8xf32>
    %133 = arith.addf %130, %132 : vector<8x8xf32>
    %134 = arith.negf %133 : vector<8x8xf32>
    %135 = math.exp %134 : vector<8x8xf32>
    %cst_83 = arith.constant 1.000000e+00 : f32
    %136 = vector.broadcast %cst_83 : f32 to vector<8x8xf32>
    %137 = arith.addf %136, %135 : vector<8x8xf32>
    %138 = arith.divf %136, %137 : vector<8x8xf32>
    %c0_84 = arith.constant 0 : index
    %c0_85 = arith.constant 0 : index
    %139 = vector.load %arg46[%c0_84, %c0_85] : memref<8x16xf32, #tpu.memory_space<vmem>>, vector<8x16xf32>
    tpu.vector_store %arg46[%c0_84, %c0_85], %107 {strides = array<i32>} : memref<8x16xf32, #tpu.memory_space<vmem>>, vector<8x16xf32>,
    %c0_86 = arith.constant 0 : index
    %c0_87 = arith.constant 0 : index
    %140 = vector.load %arg47[%c0_86, %c0_87] : memref<8x16xf32, #tpu.memory_space<vmem>>, vector<8x16xf32>
    tpu.vector_store %arg47[%c0_86, %c0_87], %119 {strides = array<i32>} : memref<8x16xf32, #tpu.memory_space<vmem>>, vector<8x16xf32>,
    %c0_88 = arith.constant 0 : index
    %c0_89 = arith.constant 0 : index
    %141 = vector.load %arg48[%c0_88, %c0_89] : memref<8x8xf32, #tpu.memory_space<vmem>>, vector<8x8xf32>
    tpu.vector_store %arg48[%c0_88, %c0_89], %138 {strides = array<i32>} : memref<8x8xf32, #tpu.memory_space<vmem>>, vector<8x8xf32>,
    %c0_90 = arith.constant 0 : index
    %c0_91 = arith.constant 0 : index
    %142 = vector.load %arg28[%c0_90, %c0_91] : memref<16x256xbf16, #tpu.memory_space<vmem>>, vector<16x256xbf16>
    %143 = arith.truncf %107 : vector<8x16xf32> to vector<8x16xbf16>
    %cst_92 = arith.constant dense<0.000000e+00> : vector<8x256xf32>
    %144 = tpu.matmul %143, %142, %cst_92 {dimension_numbers = #tpu.dot_dimension_numbers<[1], [0], [0], [1], [0, 0, 1, 1], [], []>} : vector<8x16xbf16>, vector<16x256xbf16>, vector<8x256xf32> -> vector<8x256xf32>
    %c0_93 = arith.constant 0 : index
    %c0_94 = arith.constant 0 : index
    %145 = vector.load %arg29[%c0_93, %c0_94] : memref<1x256xf32, #tpu.memory_space<vmem>>, vector<1x256xf32>
    %146 = vector.broadcast %145 : vector<1x256xf32> to vector<8x256xf32>
    %147 = arith.addf %144, %146 : vector<8x256xf32>
    %cst_95 = arith.constant 0.000000e+00 : f32
    %148 = vector.broadcast %cst_95 : f32 to vector<8x256xf32>
    %149 = arith.maximumf %147, %148 : vector<8x256xf32>
    %c0_96 = arith.constant 0 : index
    %c0_97 = arith.constant 0 : index
    %150 = vector.load %arg30[%c0_96, %c0_97] : memref<256x512xbf16, #tpu.memory_space<vmem>>, vector<256x512xbf16>
    %151 = arith.truncf %149 : vector<8x256xf32> to vector<8x256xbf16>
    %cst_98 = arith.constant dense<0.000000e+00> : vector<8x512xf32>
    %152 = tpu.matmul %151, %150, %cst_98 {dimension_numbers = #tpu.dot_dimension_numbers<[1], [0], [0], [1], [0, 0, 1, 1], [], []>} : vector<8x256xbf16>, vector<256x512xbf16>, vector<8x512xf32> -> vector<8x512xf32>
    %c0_99 = arith.constant 0 : index
    %c0_100 = arith.constant 0 : index
    %153 = vector.load %arg31[%c0_99, %c0_100] : memref<1x512xf32, #tpu.memory_space<vmem>>, vector<1x512xf32>
    %154 = vector.broadcast %153 : vector<1x512xf32> to vector<8x512xf32>
    %155 = arith.addf %152, %154 : vector<8x512xf32>
    %cst_101 = arith.constant 0.000000e+00 : f32
    %156 = vector.broadcast %cst_101 : f32 to vector<8x512xf32>
    %157 = arith.maximumf %155, %156 : vector<8x512xf32>
    %c0_102 = arith.constant 0 : index
    %c0_103 = arith.constant 0 : index
    %158 = vector.load %arg32[%c0_102, %c0_103] : memref<512x32xbf16, #tpu.memory_space<vmem>>, vector<512x32xbf16>
    %159 = arith.truncf %157 : vector<8x512xf32> to vector<8x512xbf16>
    %cst_104 = arith.constant dense<0.000000e+00> : vector<8x32xf32>
    %160 = tpu.matmul %159, %158, %cst_104 {dimension_numbers = #tpu.dot_dimension_numbers<[1], [0], [0], [1], [0, 0, 1, 1], [], []>} : vector<8x512xbf16>, vector<512x32xbf16>, vector<8x32xf32> -> vector<8x32xf32>
    %c0_105 = arith.constant 0 : index
    %c0_106 = arith.constant 0 : index
    %161 = vector.load %arg33[%c0_105, %c0_106] : memref<1x32xf32, #tpu.memory_space<vmem>>, vector<1x32xf32>
    %162 = vector.broadcast %161 : vector<1x32xf32> to vector<8x32xf32>
    %163 = arith.addf %160, %162 : vector<8x32xf32>
    %cst_107 = arith.constant 2.000000e+01 : f32
    %164 = vector.broadcast %cst_107 : f32 to vector<8x32xf32>
    %165 = arith.cmpf ogt, %163, %164 : vector<8x32xf32>
    %cst_108 = arith.constant 2.000000e+01 : f32
    %166 = vector.broadcast %cst_108 : f32 to vector<8x32xf32>
    %167 = arith.minimumf %163, %166 : vector<8x32xf32>
    %168 = math.exp %167 : vector<8x32xf32>
    %169 = math.log1p %168 : vector<8x32xf32>
    %170 = arith.select %165, %163, %169 : vector<8x32xi1>, vector<8x32xf32>
    %c0_109 = arith.constant 0 : index
    %c0_110 = arith.constant 0 : index
    %171 = vector.load %arg49[%c0_109, %c0_110] : memref<8x32xf32, #tpu.memory_space<vmem>>, vector<8x32xf32>
    tpu.vector_store %arg49[%c0_109, %c0_110], %170 {strides = array<i32>} : memref<8x32xf32, #tpu.memory_space<vmem>>, vector<8x32xf32>,
    %c0_111 = arith.constant 0 : index
    %c0_112 = arith.constant 0 : index
    %172 = vector.load %arg34[%c0_111, %c0_112] : memref<16x256xbf16, #tpu.memory_space<vmem>>, vector<16x256xbf16>
    %173 = arith.truncf %107 : vector<8x16xf32> to vector<8x16xbf16>
    %cst_113 = arith.constant dense<0.000000e+00> : vector<8x256xf32>
    %174 = tpu.matmul %173, %172, %cst_113 {dimension_numbers = #tpu.dot_dimension_numbers<[1], [0], [0], [1], [0, 0, 1, 1], [], []>} : vector<8x16xbf16>, vector<16x256xbf16>, vector<8x256xf32> -> vector<8x256xf32>
    %c0_114 = arith.constant 0 : index
    %c0_115 = arith.constant 0 : index
    %175 = vector.load %arg35[%c0_114, %c0_115] : memref<1x256xf32, #tpu.memory_space<vmem>>, vector<1x256xf32>
    %176 = vector.broadcast %175 : vector<1x256xf32> to vector<8x256xf32>
    %177 = arith.addf %174, %176 : vector<8x256xf32>
    %cst_116 = arith.constant 0.000000e+00 : f32
    %178 = vector.broadcast %cst_116 : f32 to vector<8x256xf32>
    %179 = arith.maximumf %177, %178 : vector<8x256xf32>
    %c0_117 = arith.constant 0 : index
    %c0_118 = arith.constant 0 : index
    %180 = vector.load %arg36[%c0_117, %c0_118] : memref<256x512xbf16, #tpu.memory_space<vmem>>, vector<256x512xbf16>
    %181 = arith.truncf %179 : vector<8x256xf32> to vector<8x256xbf16>
    %cst_119 = arith.constant dense<0.000000e+00> : vector<8x512xf32>
    %182 = tpu.matmul %181, %180, %cst_119 {dimension_numbers = #tpu.dot_dimension_numbers<[1], [0], [0], [1], [0, 0, 1, 1], [], []>} : vector<8x256xbf16>, vector<256x512xbf16>, vector<8x512xf32> -> vector<8x512xf32>
    %c0_120 = arith.constant 0 : index
    %c0_121 = arith.constant 0 : index
    %183 = vector.load %arg37[%c0_120, %c0_121] : memref<1x512xf32, #tpu.memory_space<vmem>>, vector<1x512xf32>
    %184 = vector.broadcast %183 : vector<1x512xf32> to vector<8x512xf32>
    %185 = arith.addf %182, %184 : vector<8x512xf32>
    %cst_122 = arith.constant 0.000000e+00 : f32
    %186 = vector.broadcast %cst_122 : f32 to vector<8x512xf32>
    %187 = arith.maximumf %185, %186 : vector<8x512xf32>
    %c0_123 = arith.constant 0 : index
    %c0_124 = arith.constant 0 : index
    %188 = vector.load %arg38[%c0_123, %c0_124] : memref<512x32xbf16, #tpu.memory_space<vmem>>, vector<512x32xbf16>
    %189 = arith.truncf %187 : vector<8x512xf32> to vector<8x512xbf16>
    %cst_125 = arith.constant dense<0.000000e+00> : vector<8x32xf32>
    %190 = tpu.matmul %189, %188, %cst_125 {dimension_numbers = #tpu.dot_dimension_numbers<[1], [0], [0], [1], [0, 0, 1, 1], [], []>} : vector<8x512xbf16>, vector<512x32xbf16>, vector<8x32xf32> -> vector<8x32xf32>
    %c0_126 = arith.constant 0 : index
    %c0_127 = arith.constant 0 : index
    %191 = vector.load %arg39[%c0_126, %c0_127] : memref<1x32xf32, #tpu.memory_space<vmem>>, vector<1x32xf32>
    %192 = vector.broadcast %191 : vector<1x32xf32> to vector<8x32xf32>
    %193 = arith.addf %190, %192 : vector<8x32xf32>
    %cst_128 = arith.constant 2.000000e+01 : f32
    %194 = vector.broadcast %cst_128 : f32 to vector<8x32xf32>
    %195 = arith.cmpf ogt, %193, %194 : vector<8x32xf32>
    %cst_129 = arith.constant 2.000000e+01 : f32
    %196 = vector.broadcast %cst_129 : f32 to vector<8x32xf32>
    %197 = arith.minimumf %193, %196 : vector<8x32xf32>
    %198 = math.exp %197 : vector<8x32xf32>
    %199 = math.log1p %198 : vector<8x32xf32>
    %200 = arith.select %195, %193, %199 : vector<8x32xi1>, vector<8x32xf32>
    %c0_130 = arith.constant 0 : index
    %c0_131 = arith.constant 0 : index
    %201 = vector.load %arg50[%c0_130, %c0_131] : memref<8x32xf32, #tpu.memory_space<vmem>>, vector<8x32xf32>
    tpu.vector_store %arg50[%c0_130, %c0_131], %200 {strides = array<i32>} : memref<8x32xf32, #tpu.memory_space<vmem>>, vector<8x32xf32>,
    %c0_132 = arith.constant 0 : index
    %c0_133 = arith.constant 0 : index
    %202 = vector.load %arg40[%c0_132, %c0_133] : memref<16x128xbf16, #tpu.memory_space<vmem>>, vector<16x128xbf16>
    %203 = arith.truncf %107 : vector<8x16xf32> to vector<8x16xbf16>
    %cst_134 = arith.constant dense<0.000000e+00> : vector<8x128xf32>
    %204 = tpu.matmul %203, %202, %cst_134 {dimension_numbers = #tpu.dot_dimension_numbers<[1], [0], [0], [1], [0, 0, 1, 1], [], []>} : vector<8x16xbf16>, vector<16x128xbf16>, vector<8x128xf32> -> vector<8x128xf32>
    %c0_135 = arith.constant 0 : index
    %c0_136 = arith.constant 0 : index
    %205 = vector.load %arg41[%c0_135, %c0_136] : memref<1x128xf32, #tpu.memory_space<vmem>>, vector<1x128xf32>
    %206 = vector.broadcast %205 : vector<1x128xf32> to vector<8x128xf32>
    %207 = arith.addf %204, %206 : vector<8x128xf32>
    %cst_137 = arith.constant 0.000000e+00 : f32
    %208 = vector.broadcast %cst_137 : f32 to vector<8x128xf32>
    %209 = arith.maximumf %207, %208 : vector<8x128xf32>
    %c0_138 = arith.constant 0 : index
    %c0_139 = arith.constant 0 : index
    %210 = vector.load %arg42[%c0_138, %c0_139] : memref<128x256xbf16, #tpu.memory_space<vmem>>, vector<128x256xbf16>
    %211 = arith.truncf %209 : vector<8x128xf32> to vector<8x128xbf16>
    %cst_140 = arith.constant dense<0.000000e+00> : vector<8x256xf32>
    %212 = tpu.matmul %211, %210, %cst_140 {dimension_numbers = #tpu.dot_dimension_numbers<[1], [0], [0], [1], [0, 0, 1, 1], [], []>} : vector<8x128xbf16>, vector<128x256xbf16>, vector<8x256xf32> -> vector<8x256xf32>
    %c0_141 = arith.constant 0 : index
    %c0_142 = arith.constant 0 : index
    %213 = vector.load %arg43[%c0_141, %c0_142] : memref<1x256xf32, #tpu.memory_space<vmem>>, vector<1x256xf32>
    %214 = vector.broadcast %213 : vector<1x256xf32> to vector<8x256xf32>
    %215 = arith.addf %212, %214 : vector<8x256xf32>
    %cst_143 = arith.constant 0.000000e+00 : f32
    %216 = vector.broadcast %cst_143 : f32 to vector<8x256xf32>
    %217 = arith.maximumf %215, %216 : vector<8x256xf32>
    %c0_144 = arith.constant 0 : index
    %c0_145 = arith.constant 0 : index
    %218 = vector.load %arg44[%c0_144, %c0_145] : memref<256x16xbf16, #tpu.memory_space<vmem>>, vector<256x16xbf16>
    %219 = arith.truncf %217 : vector<8x256xf32> to vector<8x256xbf16>
    %cst_146 = arith.constant dense<0.000000e+00> : vector<8x16xf32>
    %220 = tpu.matmul %219, %218, %cst_146 {dimension_numbers = #tpu.dot_dimension_numbers<[1], [0], [0], [1], [0, 0, 1, 1], [], []>} : vector<8x256xbf16>, vector<256x16xbf16>, vector<8x16xf32> -> vector<8x16xf32>
    %c0_147 = arith.constant 0 : index
    %c0_148 = arith.constant 0 : index
    %221 = vector.load %arg45[%c0_147, %c0_148] : memref<1x16xf32, #tpu.memory_space<vmem>>, vector<1x16xf32>
    %222 = vector.broadcast %221 : vector<1x16xf32> to vector<8x16xf32>
    %223 = arith.addf %220, %222 : vector<8x16xf32>
    %224 = arith.negf %223 : vector<8x16xf32>
    %225 = math.exp %224 : vector<8x16xf32>
    %cst_149 = arith.constant 1.000000e+00 : f32
    %226 = vector.broadcast %cst_149 : f32 to vector<8x16xf32>
    %227 = arith.addf %226, %225 : vector<8x16xf32>
    %228 = arith.divf %226, %227 : vector<8x16xf32>
    %c0_150 = arith.constant 0 : index
    %c0_151 = arith.constant 0 : index
    %229 = vector.load %arg51[%c0_150, %c0_151] : memref<8x16xf32, #tpu.memory_space<vmem>>, vector<8x16xf32>
    tpu.vector_store %arg51[%c0_150, %c0_151], %228 {strides = array<i32>} : memref<8x16xf32, #tpu.memory_space<vmem>>, vector<8x16xf32>,
    return
  }
}

</mosaic_0001>

<bundles_post_ra>
// kernel: vae_forward.1
= control target key start
LH: loop header
LB: loop body
LE: loop exit
PB: predicated region body
PF: predicated region fallthrough
CT: control target
= control target key end

     0   :  { %s7065_s6 = smov 1   ;;  %s7066_s10 = smov 2   ;;  %s8091_s0 = inlined_call_operand.smem [shape: u32[52], index: -1, kind: input, shape index: {}] }
   0x1   :  { %s7167_s5 = sld [smem:[%s8091_s0]]   ;;  %s7067_s14 = smov 3  }
   0x2   :  { %s7172_s9 = sld [smem:[%s8091_s0 + %s7065_s6]]   ;;  %s7068_s18 = smov 4  }
   0x3   :  { %s7177_s13 = sld [smem:[%s8091_s0 + %s7066_s10]]   ;;  %s7069_s22 = smov 5  }
   0x4   :  { %s7182_s17 = sld [smem:[%s8091_s0 + %s7067_s14]]   ;;  %s7070_s26 = smov 6  }
   0x5   :  { %s7187_s21 = sld [smem:[%s8091_s0 + %s7068_s18]]   ;;  %s7071_s30 = smov 7  }
   0x6   :  { %s7192_s25 = sld [smem:[%s8091_s0 + %s7069_s22]]   ;;  %s7072_s4 = smov 8  }
   0x7   :  { %8122 = sst [smem:[#allocation74_spill]] %s7167_s5  ;;  %s7073_s10 = smov 9  }
   0x8   :  { %8123 = sst [smem:[#allocation75_spill]] %s7172_s9  ;;  %s7074_s15 = smov 10  }
   0x9   :  { %8124 = sst [smem:[#allocation76_spill]] %s7177_s13  ;;  %s7075_s20 = smov 11  }
   0xa   :  { %8125 = sst [smem:[#allocation77_spill]] %s7182_s17  ;;  %s7077_s1 = smov 13  }
   0xb   :  { %8126 = sst [smem:[#allocation78_spill]] %s7187_s21  ;;  %s7078_s7 = smov 14  }
   0xc   :  { %s7197_s29 = sld [smem:[%s8091_s0 + %s7070_s26]]   ;;  %s7076_s26 = smov 12  }
   0xd   :  { %s7202_s3 = sld [smem:[%s8091_s0 + %s7071_s30]]   ;;  %s7080_s22 = smov 16  }
   0xe   :  { %s7207_s8 = sld [smem:[%s8091_s0 + %s7072_s4]]   ;;  %s7081_s28 = smov 17  }
   0xf   :  { %s7212_s14 = sld [smem:[%s8091_s0 + %s7073_s10]]  }
  0x10   :  { %s7217_s19 = sld [smem:[%s8091_s0 + %s7074_s15]]   ;;  %s7079_s15 = smov 15  }
  0x11   :  { %s7222_s24 = sld [smem:[%s8091_s0 + %s7075_s20]]  }
  0x12   :  { %s7227_s30 = sld [smem:[%s8091_s0 + %s7076_s26]]  }
  0x13   :  { %8127 = sst [smem:[#allocation79_spill]] %s7202_s3 }
  0x14   :  { %s7232_s6 = sld [smem:[%s8091_s0 + %s7077_s1]]  }
  0x15   :  { %8128 = sst [smem:[#allocation80_spill]] %s7212_s14 }
  0x16   :  { %8129 = sst [smem:[#allocation81_spill]] %s7217_s19 }
  0x17   :  { %8130 = sst [smem:[#allocation82_spill]] %s7222_s24 }
  0x18   :  { %s7237_s12 = sld [smem:[%s8091_s0 + %s7078_s7]]   ;;  %s7082_s7 = smov 18  }
  0x19   :  { %s7242_s20 = sld [smem:[%s8091_s0 + %s7079_s15]]   ;;  %s7083_s15 = smov 19  }
  0x1a   :  { %8131 = sst [smem:[#allocation83_spill]] %s7232_s6 }
  0x1b   :  { %s7247_s27 = sld [smem:[%s8091_s0 + %s7080_s22]]   ;;  %s7084_s22 = smov 20  }
  0x1c   :  { %s7252_s4 = sld [smem:[%s8091_s0 + %s7081_s28]]   ;;  %s7085_s28 = smov 21  }
  0x1d   :  { %s7257_s17 = sld [smem:[%s8091_s0 + %s7082_s7]]   ;;  %s7086_s7 = smov 22  }
  0x1e   :  { %s7267_s14 = sld [smem:[%s8091_s0 + %s7084_s22]]   ;;  %s7088_s22 = smov 24  }
  0x1f   :  { %8132 = sst [smem:[#allocation84_spill]] %s7242_s20 }
  0x20   :  { %s7262_s20 = sld [smem:[%s8091_s0 + %s7083_s15]]   ;;  %s7087_s15 = smov 23  }
  0x21   :  { %8133 = sst [smem:[#allocation85_spill]] %s7247_s27 }
  0x22   :  { %8134 = sst [smem:[#allocation86_spill]] %s7252_s4 }
  0x23   :  { %8135 = sst [smem:[#allocation87_spill]] %s7257_s17 }
  0x24   :  { %8136 = sst [smem:[#allocation88_spill]] %s7267_s14 }
  0x25   :  { %s7272_s4 = sld [smem:[%s8091_s0 + %s7085_s28]]   ;;  %s7089_s28 = smov 25  }
  0x26   :  { %s7277_s17 = sld [smem:[%s8091_s0 + %s7086_s7]]   ;;  %s7090_s7 = smov 26  }
  0x27   :  { %s7282_s13 = sld [smem:[%s8091_s0 + %s7087_s15]]   ;;  %s7091_s15 = smov 27  }
  0x28   :  { %s7287_s24 = sld [smem:[%s8091_s0 + %s7088_s22]]   ;;  %s7092_s22 = smov 28  }
  0x29   :  { %s7302_s5 = sld [smem:[%s8091_s0 + %s7091_s15]]   ;;  %s7095_s15 = smov 31  }
  0x2a   :  { %s7307_s21 = sld [smem:[%s8091_s0 + %s7092_s22]]   ;;  %s7096_s22 = smov 32  }
  0x2b   :  { %8137 = sst [smem:[#allocation89_spill]] %s7272_s4 }
  0x2c   :  { %8138 = sst [smem:[#allocation90_spill]] %s7277_s17 }
  0x2d   :  { %s7292_s4 = sld [smem:[%s8091_s0 + %s7089_s28]]   ;;  %s7093_s28 = smov 29  }
  0x2e   :  { %8139 = sst [smem:[#allocation91_spill]] %s7287_s24 }
  0x2f   :  { %s7297_s17 = sld [smem:[%s8091_s0 + %s7090_s7]]   ;;  %s7094_s7 = smov 30  }
  0x30   :  { %8141 = sst [smem:[#allocation93_spill]] %s7302_s5 }
  0x31   :  { %s7312_s9 = sld [smem:[%s8091_s0 + %s7093_s28]]   ;;  %s7097_s28 = smov 33  }
  0x32   :  { %s7322_s5 = sld [smem:[%s8091_s0 + %s7095_s15]]   ;;  %s7099_s15 = smov 35  }
  0x33   :  { %s7327_s24 = sld [smem:[%s8091_s0 + %s7096_s22]]   ;;  %s7100_s22 = smov 36  }
  0x34   :  { %s7342_s14 = sld [smem:[%s8091_s0 + %s7099_s15]]   ;;  %s7103_s15 = smov 39  }
  0x35   :  { %8140 = sst [smem:[#allocation92_spill]] %s7297_s17 }
  0x36   :  { %s7317_s17 = sld [smem:[%s8091_s0 + %s7094_s7]]   ;;  %s7098_s7 = smov 34  }
  0x37   :  { %8142 = sst [smem:[#allocation94_spill]] %s7312_s9 }
  0x38   :  { %s7332_s9 = sld [smem:[%s8091_s0 + %s7097_s28]]   ;;  %s7101_s28 = smov 37  }
  0x39   :  { %8144 = sst [smem:[#allocation96_spill]] %s7327_s24 }
  0x3a   :  { %8146 = sst [smem:[#allocation98_spill]] %s7342_s14 }
  0x3b   :  { %s7347_s24 = sld [smem:[%s8091_s0 + %s7100_s22]]   ;;  %s7104_s22 = smov 40  }
  0x3c   :  { %8143 = sst [smem:[#allocation95_spill]] %s7317_s17 }
  0x3d   :  { %s7337_s17 = sld [smem:[%s8091_s0 + %s7098_s7]]   ;;  %s7102_s7 = smov 38  }
  0x3e   :  { %8145 = sst [smem:[#allocation97_spill]] %s7332_s9 }
  0x3f   :  { %s7352_s9 = sld [smem:[%s8091_s0 + %s7101_s28]]   ;;  %s7105_s28 = smov 41  }
  0x40   :  { %s7357_s27 = sld [smem:[%s8091_s0 + %s7102_s7]]   ;;  %s7106_s7 = smov 42  }
  0x41   :  { %s7362_s14 = sld [smem:[%s8091_s0 + %s7103_s15]]   ;;  %s7107_s15 = smov 43  }
  0x42   :  { %s7367_s6 = sld [smem:[%s8091_s0 + %s7104_s22]]   ;;  %s7108_s22 = smov 44  }
  0x43   :  { %s7382_s19 = sld [smem:[%s8091_s0 + %s7107_s15]]   ;;  %s7111_s15 = smov 47  }
  0x45   :  { %8147 = sst [smem:[#allocation99_spill]] %s7352_s9 }
  0x46   :  { %8148 = sst [smem:[#allocation100_spill]] %s7357_s27 }
  0x47   :  { %s7372_s9 = sld [smem:[%s8091_s0 + %s7105_s28]]   ;;  %s7109_s28 = smov 45  }
  0x48   :  { %8149 = sst [smem:[#allocation101_spill]] %s7367_s6 }
  0x49   :  { %s7377_s27 = sld [smem:[%s8091_s0 + %s7106_s7]]   ;;  %s7110_s7 = smov 46  }
  0x4a   :  { %8151 = sst [smem:[#allocation103_spill]] %s7382_s19 }
  0x4b   :  { %s7387_s6 = sld [smem:[%s8091_s0 + %s7108_s22]]   ;;  %s7112_s22 = smov 48  }
  0x4c   :  { %s7392_s3 = sld [smem:[%s8091_s0 + %s7109_s28]]   ;;  %s7113_s28 = smov 49  }
  0x4d   :  { %s7402_s19 = sld [smem:[%s8091_s0 + %s7111_s15]]   ;;  %s7115_s15 = smov 51  }
  0x4f   :  { %8150 = sst [smem:[#allocation102_spill]] %s7377_s27 }
  0x50   :  { %s7397_s27 = sld [smem:[%s8091_s0 + %s7110_s7]]   ;;  %s7114_s7 = smov 50  }
  0x51   :  { %8152 = sst [smem:[#allocation104_spill]] %s7387_s6 }
  0x52   :  { %8153 = sst [smem:[#allocation105_spill]] %s7392_s3 }
  0x53   :  { %8155 = sst [smem:[#allocation107_spill]] %s7402_s19 }
  0x54   :  { %s7407_s6 = sld [smem:[%s8091_s0 + %s7112_s22]]  }
  0x55   :  { %s7412_s3 = sld [smem:[%s8091_s0 + %s7113_s28]]  }
  0x56   :  { %8154 = sst [smem:[#allocation106_spill]] %s7397_s27 }
  0x57   :  { %s7417_s27 = sld [smem:[%s8091_s0 + %s7114_s7]]  }
  0x58   :  { %s7422_s19 = sld [smem:[%s8091_s0 + %s7115_s15]]  }
  0x59   :  { %109 = vsyncpa [#allocation3], 0 }
  0x5a   :  { %110 = vsyncpa [#allocation6], 0 }
  0x5b   :  { %111 = vsyncpa [#allocation9], 0 }
  0x5c   :  { %112 = vsyncpa [#allocation12], 0 }
  0x5d   :  { %113 = vsyncpa [#allocation15], 0 }
  0x5e   :  { %114 = vsyncpa [#allocation18], 0 }
  0x5f   :  { %115 = vsyncpa [#allocation21], 0 }
  0x60   :  { %116 = vsyncpa [#allocation24], 0 }
  0x61   :  { %117 = vsyncpa [#allocation27], 0 }
  0x62   :  { %118 = vsyncpa [#allocation30], 0 }
  0x63   :  { %119 = vsyncpa [#allocation33], 0 }
  0x64   :  { %120 = vsyncpa [#allocation36], 0 }
  0x65   :  { %121 = vsyncpa [#allocation39], 0 }
  0x66   :  { %122 = vsyncpa [#allocation42], 0 }
  0x67   :  { %123 = vsyncpa [#allocation45], 0 }
  0x68   :  { %124 = vsyncpa [#allocation4], 0 }
  0x69   :  { %125 = vsyncpa [#allocation48], 0 }
  0x6a   :  { %126 = vsyncpa [#allocation51], 0 }
  0x6b   :  { %127 = vsyncpa [#allocation54], 0  ;;  %s7116_s0 = smov [#allocation5]   ;;  %s7117_s23 = smov [#allocation8]  }
  0x6c   :  { %s156_s22 = sshll.u32 %s7116_s0, 4  ;;  %s176_s26 = sshll.u32 %s7117_s23, 4  ;;  %s157_s22 = int_to_ptr.vmem [resolvable:$true] %s156_s22  ;;  %s177_s26 = int_to_ptr.vmem [resolvable:$true] %s176_s26 }
  0x6d   :  { %s6279_s28 = scalar_lea.hbm %s7197_s29, 64 }
  0x6e   :  { %p6280_p0 = scmp.ne.s32.totalorder %s7197_s29, %s6279_s28  ;;  %p6283_p1 = scmp.lt.u32.totalorder %s6279_s28, %s7197_s29 }
  0x70   :  { %p6285_p2 = pnand %p6283_p1, %p6280_p0 }
  0x72   :  { %6288 = shalt.err (!%p6285_p2)
}
  0x73   :  { %s6289_s1 = scalar_lea.vmem %s157_s22, 64  ;;  %p6294_p4 = scmp.lt.s32.totalorder %s157_s22, %s157_s22 }
  0x74   :  { %p6290_p3 = scmp.ne.s32.totalorder %s157_s22, %s6289_s1  ;;  %p6295_p5 = scmp.lt.s32.totalorder %s6289_s1, %s6289_s1 }
  0x76   :  { %p6296_p6 = por %p6295_p5, %p6294_p4 }
  0x78   :  { %p6297_p7 = pnand %p6296_p6, %p6290_p3 }
  0x7a   :  { %6300 = shalt.err (!%p6297_p7)
}
  0x7b   :  { %159 = dma.hbm_to_vmem [thread:$0]  %s7197_s29, 64, %s157_s22, [#allocation6]  }
  0x7c   :  { %s6301_s2 = scalar_lea.hbm %s7207_s8, 64 }
  0x7d   :  { %p6302_p8 = scmp.ne.s32.totalorder %s7207_s8, %s6301_s2  ;;  %p6305_p9 = scmp.lt.u32.totalorder %s6301_s2, %s7207_s8 }
  0x7f   :  { %p6307_p10 = pnand %p6305_p9, %p6302_p8 }
  0x81   :  { %6310 = shalt.err (!%p6307_p10)
}
  0x82   :  { %s6311_s7 = scalar_lea.vmem %s177_s26, 64  ;;  %p6316_p12 = scmp.lt.s32.totalorder %s177_s26, %s177_s26 }
  0x83   :  { %p6312_p11 = scmp.ne.s32.totalorder %s177_s26, %s6311_s7  ;;  %p6317_p13 = scmp.lt.s32.totalorder %s6311_s7, %s6311_s7 }
  0x85   :  { %p6318_p0 = por %p6317_p13, %p6316_p12 }
  0x87   :  { %p6319_p1 = pnand %p6318_p0, %p6312_p11 }
  0x89   :  { %6322 = shalt.err (!%p6319_p1)
}
  0x8a   :  { %179 = dma.hbm_to_vmem [thread:$0]  %s7207_s8, 64, %s177_s26, [#allocation9]  }
  0x8b   :  { %s7118_s10 = smov [#allocation11]   ;;  %s7119_s29 = smov [#allocation14]  }
  0x8c   :  { %s200_s11 = sshll.u32 %s7118_s10, 4  ;;  %s220_s15 = sshll.u32 %s7119_s29, 4  ;;  %s201_s11 = int_to_ptr.vmem [resolvable:$true] %s200_s11  ;;  %s221_s15 = int_to_ptr.vmem [resolvable:$true] %s220_s15 }
  0x8d   :  { %s6323_s16 = scalar_lea.hbm %s7227_s30, 32 }
  0x8e   :  { %p6324_p2 = scmp.ne.s32.totalorder %s7227_s30, %s6323_s16  ;;  %p6327_p3 = scmp.lt.u32.totalorder %s6323_s16, %s7227_s30 }
  0x90   :  { %p6329_p4 = pnand %p6327_p3, %p6324_p2 }
  0x92   :  { %6332 = shalt.err (!%p6329_p4)
}
  0x93   :  { %s6333_s18 = scalar_lea.vmem %s201_s11, 32  ;;  %p6338_p6 = scmp.lt.s32.totalorder %s201_s11, %s201_s11 }
  0x94   :  { %p6334_p5 = scmp.ne.s32.totalorder %s201_s11, %s6333_s18  ;;  %p6339_p7 = scmp.lt.s32.totalorder %s6333_s18, %s6333_s18 }
  0x96   :  { %p6340_p8 = por %p6339_p7, %p6338_p6 }
  0x98   :  { %p6341_p9 = pnand %p6340_p8, %p6334_p5 }
  0x9a   :  { %6344 = shalt.err (!%p6341_p9)
}
  0x9b   :  { %203 = dma.hbm_to_vmem [thread:$0]  %s7227_s30, 32, %s201_s11, [#allocation12]  }
  0x9c   :  { %s6345_s8 = scalar_lea.hbm %s7237_s12, 32 }
  0x9d   :  { %p6346_p10 = scmp.ne.s32.totalorder %s7237_s12, %s6345_s8  ;;  %p6349_p11 = scmp.lt.u32.totalorder %s6345_s8, %s7237_s12 }
  0x9f   :  { %p6351_p12 = pnand %p6349_p11, %p6346_p10 }
  0xa1   :  { %6354 = shalt.err (!%p6351_p12)
}
  0xa2   :  { %s6355_s0 = scalar_lea.vmem %s221_s15, 32  ;;  %p6360_p0 = scmp.lt.s32.totalorder %s221_s15, %s221_s15 }
  0xa3   :  { %p6356_p13 = scmp.ne.s32.totalorder %s221_s15, %s6355_s0  ;;  %p6361_p1 = scmp.lt.s32.totalorder %s6355_s0, %s6355_s0 }
  0xa5   :  { %p6362_p2 = por %p6361_p1, %p6360_p0 }
  0xa7   :  { %p6363_p3 = pnand %p6362_p2, %p6356_p13 }
  0xa9   :  { %6366 = shalt.err (!%p6363_p3)
}
  0xaa   :  { %223 = dma.hbm_to_vmem [thread:$0]  %s7237_s12, 32, %s221_s15, [#allocation15]  }
  0xab   :  { %s7120_s22 = smov [#allocation17]   ;;  %s7121_s30 = smov [#allocation20]  }
  0xac   :  { %s246_s23 = sshll.u32 %s7120_s22, 4  ;;  %s270_s26 = sshll.u32 %s7121_s30, 4  ;;  %s247_s23 = int_to_ptr.vmem [resolvable:$true] %s246_s23  ;;  %s271_s26 = int_to_ptr.vmem [resolvable:$true] %s270_s26 }
  0xad   :  { %s6367_s28 = scalar_lea.hbm %s7262_s20, 64 }
  0xae   :  { %p6368_p4 = scmp.ne.s32.totalorder %s7262_s20, %s6367_s28  ;;  %p6371_p5 = scmp.lt.u32.totalorder %s6367_s28, %s7262_s20 }
  0xb0   :  { %p6373_p6 = pnand %p6371_p5, %p6368_p4 }
  0xb2   :  { %6376 = shalt.err (!%p6373_p6)
}
  0xb3   :  { %s6377_s1 = scalar_lea.vmem %s247_s23, 64  ;;  %p6382_p8 = scmp.lt.s32.totalorder %s247_s23, %s247_s23 }
  0xb4   :  { %p6378_p7 = scmp.ne.s32.totalorder %s247_s23, %s6377_s1  ;;  %p6383_p9 = scmp.lt.s32.totalorder %s6377_s1, %s6377_s1 }
  0xb6   :  { %p6384_p10 = por %p6383_p9, %p6382_p8 }
  0xb8   :  { %p6385_p11 = pnand %p6384_p10, %p6378_p7 }
  0xba   :  { %6388 = shalt.err (!%p6385_p11)
}
  0xbb   :  { %249 = dma.hbm_to_vmem [thread:$0]  %s7262_s20, 64, %s247_s23, [#allocation18]  }
  0xbc   :  { %s6389_s12 = scalar_lea.hbm %s7282_s13, 16 }
  0xbd   :  { %p6390_p12 = scmp.ne.s32.totalorder %s7282_s13, %s6389_s12  ;;  %p6393_p13 = scmp.lt.u32.totalorder %s6389_s12, %s7282_s13 }
  0xbf   :  { %p6395_p0 = pnand %p6393_p13, %p6390_p12 }
  0xc1   :  { %6398 = shalt.err (!%p6395_p0)
}
  0xc2   :  { %s6399_s2 = scalar_lea.vmem %s271_s26, 16  ;;  %s6403_s7 = scalar_lea.vmem %s271_s26, 32 }
  0xc3   :  { %p6400_p1 = scmp.ne.s32.totalorder %s271_s26, %s6399_s2  ;;  %p6404_p2 = scmp.lt.s32.totalorder %s271_s26, %s271_s26 }
  0xc4   :  { %p6405_p3 = scmp.lt.s32.totalorder %s6403_s7, %s6399_s2 }
  0xc6   :  { %p6406_p4 = por %p6405_p3, %p6404_p2 }
  0xc8   :  { %p6407_p5 = pnand %p6406_p4, %p6400_p1 }
  0xca   :  { %6410 = shalt.err (!%p6407_p5)
}
  0xcb   :  { %273 = dma.hbm_to_vmem [thread:$0]  %s7282_s13, 16, %s271_s26, [#allocation21]  }
  0xcc   :  { %s7122_s10 = smov [#allocation23]   ;;  %s7123_s11 = smov [#allocation26]  }
  0xcd   :  { %s292_s20 = sshll.u32 %s7122_s10, 4  ;;  %s313_s29 = sshll.u32 %s7123_s11, 4  ;;  %s293_s20 = int_to_ptr.vmem [resolvable:$true] %s292_s20  ;;  %s7448_s29 = int_to_ptr.vmem [resolvable:$true] %s313_s29 }
  0xce   :  { %s6411_s15 = scalar_lea.hbm %s7292_s4, 16 }
  0xcf   :  { %p6412_p6 = scmp.ne.s32.totalorder %s7292_s4, %s6411_s15  ;;  %p6415_p7 = scmp.lt.u32.totalorder %s6411_s15, %s7292_s4 }
  0xd1   :  { %p6417_p8 = pnand %p6415_p7, %p6412_p6 }
  0xd3   :  { %6420 = shalt.err (!%p6417_p8)
}
  0xd4   :  { %s6421_s16 = scalar_lea.vmem %s293_s20, 16  ;;  %s6425_s18 = scalar_lea.vmem %s293_s20, 32 }
  0xd5   :  { %p6422_p9 = scmp.ne.s32.totalorder %s293_s20, %s6421_s16  ;;  %p6426_p10 = scmp.lt.s32.totalorder %s293_s20, %s293_s20 }
  0xd6   :  { %p6427_p11 = scmp.lt.s32.totalorder %s6425_s18, %s6421_s16 }
  0xd8   :  { %p6428_p12 = por %p6427_p11, %p6426_p10 }
  0xda   :  { %p6429_p13 = pnand %p6428_p12, %p6422_p9 }
  0xdc   :  { %6432 = shalt.err (!%p6429_p13)
}
  0xdd   :  { %295 = dma.hbm_to_vmem [thread:$0]  %s7292_s4, 16, %s293_s20, [#allocation24]  }
  0xde   :  { %s6433_s13 = scalar_lea.hbm %s7307_s21, 256 }
  0xdf   :  { %p6434_p0 = scmp.ne.s32.totalorder %s7307_s21, %s6433_s13  ;;  %p6437_p1 = scmp.lt.u32.totalorder %s6433_s13, %s7307_s21 }
  0xe1   :  { %p6439_p2 = pnand %p6437_p1, %p6434_p0 }
  0xe3   :  { %6442 = shalt.err (!%p6439_p2)
}
  0xe4   :  { %s6443_s8 = scalar_lea.vmem %s7448_s29, 256  ;;  %p6448_p4 = scmp.lt.s32.totalorder %s7448_s29, %s7448_s29 }
  0xe5   :  { %p6444_p3 = scmp.ne.s32.totalorder %s7448_s29, %s6443_s8  ;;  %p6449_p5 = scmp.lt.s32.totalorder %s6443_s8, %s6443_s8 }
  0xe7   :  { %p6450_p6 = por %p6449_p5, %p6448_p4 }
  0xe9   :  { %p6451_p7 = pnand %p6450_p6, %p6444_p3 }
  0xeb   :  { %6454 = shalt.err (!%p6451_p7)
}
  0xec   :  { %s7124_s0 = smov 128   ;;  %s7125_s4 = smov 8  }
  0xed   :  { %319 = dma.hbm_to_vmem [thread:$0]  %s7307_s21, 256, %s7448_s29, [#allocation27], %s7124_s0, %s7124_s0, %s7125_s4  }
  0xee   :  { %s7126_s22 = smov [#allocation29]   ;;  %s7127_s30 = smov [#allocation32]  }
  0xef   :  { %s338_s23 = sshll.u32 %s7126_s22, 4  ;;  %s359_s26 = sshll.u32 %s7127_s30, 4  ;;  %s339_s23 = int_to_ptr.vmem [resolvable:$true] %s338_s23  ;;  %s7466_s26 = int_to_ptr.vmem [resolvable:$true] %s359_s26 }
  0xf0   :  { %s6455_s28 = scalar_lea.hbm %s7322_s5, 64 }
  0xf1   :  { %p6456_p8 = scmp.ne.s32.totalorder %s7322_s5, %s6455_s28  ;;  %p6459_p9 = scmp.lt.u32.totalorder %s6455_s28, %s7322_s5 }
  0xf3   :  { %p6461_p10 = pnand %p6459_p9, %p6456_p8 }
  0xf5   :  { %6464 = shalt.err (!%p6461_p10)
}
  0xf6   :  { %s6465_s1 = scalar_lea.vmem %s339_s23, 64  ;;  %p6470_p12 = scmp.lt.s32.totalorder %s339_s23, %s339_s23 }
  0xf7   :  { %p6466_p11 = scmp.ne.s32.totalorder %s339_s23, %s6465_s1  ;;  %p6471_p13 = scmp.lt.s32.totalorder %s6465_s1, %s6465_s1 }
  0xf9   :  { %p6472_p0 = por %p6471_p13, %p6470_p12 }
  0xfb   :  { %p6473_p1 = pnand %p6472_p0, %p6466_p11 }
  0xfd   :  { %6476 = shalt.err (!%p6473_p1)
}
  0xfe   :  { %341 = dma.hbm_to_vmem [thread:$0]  %s7322_s5, 64, %s339_s23, [#allocation30]  }
  0xff   :  { %s6477_s21 = scalar_lea.hbm %s7337_s17, 256 }
 0x100   :  { %p6478_p2 = scmp.ne.s32.totalorder %s7337_s17, %s6477_s21  ;;  %p6481_p3 = scmp.lt.u32.totalorder %s6477_s21, %s7337_s17 }
 0x102   :  { %p6483_p4 = pnand %p6481_p3, %p6478_p2 }
 0x104   :  { %6486 = shalt.err (!%p6483_p4)
}
 0x105   :  { %s6487_s12 = scalar_lea.vmem %s7466_s26, 256  ;;  %p6492_p6 = scmp.lt.s32.totalorder %s7466_s26, %s7466_s26 }
 0x106   :  { %p6488_p5 = scmp.ne.s32.totalorder %s7466_s26, %s6487_s12  ;;  %p6493_p7 = scmp.lt.s32.totalorder %s6487_s12, %s6487_s12 }
 0x108   :  { %p6494_p8 = por %p6493_p7, %p6492_p6 }
 0x10a   :  { %p6495_p9 = pnand %p6494_p8, %p6488_p5 }
 0x10c   :  { %6498 = shalt.err (!%p6495_p9)
}
 0x10d   :  { %365 = dma.hbm_to_vmem [thread:$0]  %s7337_s17, 256, %s7466_s26, [#allocation33], %s7124_s0, %s7124_s0, %s7125_s4  }
 0x10e   :  { %s7128_s5 = smov [#allocation35]   ;;  %s7129_s7 = smov [#allocation38]  }
 0x10f   :  { %s381_s2 = sshll.u32 %s7128_s5, 4  ;;  %s406_s10 = sshll.u32 %s7129_s7, 4  ;;  %s382_s2 = int_to_ptr.vmem [resolvable:$true] %s381_s2  ;;  %s7484_s10 = int_to_ptr.vmem [resolvable:$true] %s406_s10 }
 0x110   :  { %s6499_s20 = scalar_lea.hbm %s7347_s24, 8192 }
 0x111   :  { %p6500_p10 = scmp.ne.s32.totalorder %s7347_s24, %s6499_s20  ;;  %p6503_p11 = scmp.lt.u32.totalorder %s6499_s20, %s7347_s24 }
 0x113   :  { %p6505_p12 = pnand %p6503_p11, %p6500_p10 }
 0x115   :  { %6508 = shalt.err (!%p6505_p12)
}
 0x116   :  { %s6509_s11 = scalar_lea.vmem %s382_s2, 8192  ;;  %p6514_p0 = scmp.lt.s32.totalorder %s382_s2, %s382_s2 }
 0x117   :  { %p6510_p13 = scmp.ne.s32.totalorder %s382_s2, %s6509_s11  ;;  %p6515_p1 = scmp.lt.s32.totalorder %s6509_s11, %s6509_s11 }
 0x119   :  { %p6516_p2 = por %p6515_p1, %p6514_p0 }
 0x11b   :  { %p6517_p3 = pnand %p6516_p2, %p6510_p13 }
 0x11d   :  { %6520 = shalt.err (!%p6517_p3)
}
 0x11e   :  { %s7130_s17 = smov 256   ;;  %s7131_s29 = smov 16  }
 0x11f   :  { %387 = dma.hbm_to_vmem [thread:$0]  %s7347_s24, 8192, %s382_s2, [#allocation36], %s7130_s17, %s7130_s17, %s7131_s29  }
 0x120   :  { %s6521_s15 = scalar_lea.hbm %s7362_s14, 16 }
 0x121   :  { %p6522_p4 = scmp.ne.s32.totalorder %s7362_s14, %s6521_s15  ;;  %p6525_p5 = scmp.lt.u32.totalorder %s6521_s15, %s7362_s14 }
 0x123   :  { %p6527_p6 = pnand %p6525_p5, %p6522_p4 }
 0x125   :  { %6530 = shalt.err (!%p6527_p6)
}
 0x126   :  { %s6531_s16 = scalar_lea.vmem %s7484_s10, 16  ;;  %s6535_s18 = scalar_lea.vmem %s7484_s10, 32 }
 0x127   :  { %p6532_p7 = scmp.ne.s32.totalorder %s7484_s10, %s6531_s16  ;;  %p6536_p8 = scmp.lt.s32.totalorder %s7484_s10, %s7484_s10 }
 0x128   :  { %p6537_p9 = scmp.lt.s32.totalorder %s6535_s18, %s6531_s16 }
 0x12a   :  { %p6538_p10 = por %p6537_p9, %p6536_p8 }
 0x12c   :  { %p6539_p11 = pnand %p6538_p10, %p6532_p7 }
 0x12e   :  { %6542 = shalt.err (!%p6539_p11)
}
 0x12f   :  { %409 = dma.hbm_to_vmem [thread:$0]  %s7362_s14, 16, %s7484_s10, [#allocation39]  }
 0x130   :  { %s7132_s24 = smov [#allocation41]   ;;  %s7133_s8 = smov [#allocation2]  }
 0x131   :  { %s428_s13 = sshll.u32 %s7132_s24, 4  ;;  %s143_s0 = sshll.u32 %s7133_s8, 4  ;;  %s429_s13 = int_to_ptr.vmem [resolvable:$true] %s428_s13  ;;  %s7503_s0 = int_to_ptr.vmem [resolvable:$true] %s143_s0 }
 0x132   :  { %s6543_s4 = scalar_lea.hbm %s7372_s9, 16 }
 0x133   :  { %p6544_p12 = scmp.ne.s32.totalorder %s7372_s9, %s6543_s4  ;;  %p6547_p13 = scmp.lt.u32.totalorder %s6543_s4, %s7372_s9 }
 0x135   :  { %p6549_p0 = pnand %p6547_p13, %p6544_p12 }
 0x137   :  { %6552 = shalt.err (!%p6549_p0)
}
 0x138   :  { %s6553_s22 = scalar_lea.vmem %s429_s13, 16  ;;  %s6557_s23 = scalar_lea.vmem %s429_s13, 32 }
 0x139   :  { %p6554_p1 = scmp.ne.s32.totalorder %s429_s13, %s6553_s22  ;;  %p6558_p2 = scmp.lt.s32.totalorder %s429_s13, %s429_s13 }
 0x13a   :  { %p6559_p3 = scmp.lt.s32.totalorder %s6557_s23, %s6553_s22 }
 0x13c   :  { %p6560_p4 = por %p6559_p3, %p6558_p2 }
 0x13e   :  { %p6561_p5 = pnand %p6560_p4, %p6554_p1 }
 0x140   :  { %6564 = shalt.err (!%p6561_p5)
}
 0x141   :  { %431 = dma.hbm_to_vmem [thread:$0]  %s7372_s9, 16, %s429_s13, [#allocation42]  }
 0x142   :  { %s6565_s14 = scalar_lea.hbm %s7192_s25, 1024 }
 0x143   :  { %p6566_p6 = scmp.ne.s32.totalorder %s7192_s25, %s6565_s14  ;;  %p6569_p7 = scmp.lt.u32.totalorder %s6565_s14, %s7192_s25 }
 0x145   :  { %p6571_p8 = pnand %p6569_p7, %p6566_p6 }
 0x147   :  { %6574 = shalt.err (!%p6571_p8)
}
 0x148   :  { %s6575_s30 = scalar_lea.vmem %s7503_s0, 1024  ;;  %p6580_p10 = scmp.lt.s32.totalorder %s7503_s0, %s7503_s0 }
 0x149   :  { %p6576_p9 = scmp.ne.s32.totalorder %s7503_s0, %s6575_s30  ;;  %p6581_p11 = scmp.lt.s32.totalorder %s6575_s30, %s6575_s30 }
 0x14b   :  { %p6582_p12 = por %p6581_p11, %p6580_p10 }
 0x14d   :  { %p6583_p13 = pnand %p6582_p12, %p6576_p9 }
 0x14f   :  { %6586 = shalt.err (!%p6583_p13)
}
 0x150   :  { %s8156_s9 = sld [smem:[#allocation79_spill]]  ;;  %s7134_s26 = smov [#allocation7]  }
 0x151   :  { %149 = dma.hbm_to_vmem [thread:$0]  %s7192_s25, 1024, %s7503_s0, [#allocation3], %s7130_s17, %s7130_s17, %s7131_s29  }
 0x152   :  { %s166_s28 = sshll.u32 %s7134_s26, 4  ;;  %s7135_s1 = smov [#allocation10]   ;;  %s167_s28 = int_to_ptr.vmem [resolvable:$true] %s166_s28 }
 0x153   :  { %s188_s21 = sshll.u32 %s7135_s1, 4  ;;  %s189_s21 = int_to_ptr.vmem [resolvable:$true] %s188_s21 }
 0x156   :  { %s6587_s12 = scalar_lea.hbm %s8156_s9, 64 }
 0x157   :  { %p6588_p0 = scmp.ne.s32.totalorder %s8156_s9, %s6587_s12  ;;  %p6591_p1 = scmp.lt.u32.totalorder %s6587_s12, %s8156_s9 }
 0x159   :  { %p6593_p2 = pnand %p6591_p1, %p6588_p0 }
 0x15b   :  { %6596 = shalt.err (!%p6593_p2)
}
 0x15c   :  { %s6597_s5 = scalar_lea.vmem %s167_s28, 64  ;;  %p6602_p4 = scmp.lt.s32.totalorder %s167_s28, %s167_s28 }
 0x15d   :  { %p6598_p3 = scmp.ne.s32.totalorder %s167_s28, %s6597_s5  ;;  %p6603_p5 = scmp.lt.s32.totalorder %s6597_s5, %s6597_s5 }
 0x15f   :  { %p6604_p6 = por %p6603_p5, %p6602_p4 }
 0x161   :  { %p6605_p7 = pnand %p6604_p6, %p6598_p3 }
 0x163   :  { %6608 = shalt.err (!%p6605_p7)
}
 0x164   :  { %s8157_s25 = sld [smem:[#allocation81_spill]] }
 0x165   :  { %169 = dma.hbm_to_vmem [thread:$0]  %s8156_s9, 64, %s167_s28, [#allocation6]  }
 0x16a   :  { %s6609_s2 = scalar_lea.hbm %s8157_s25, 32 }
 0x16b   :  { %p6610_p8 = scmp.ne.s32.totalorder %s8157_s25, %s6609_s2  ;;  %p6613_p9 = scmp.lt.u32.totalorder %s6609_s2, %s8157_s25 }
 0x16d   :  { %p6615_p10 = pnand %p6613_p9, %p6610_p8 }
 0x16f   :  { %6618 = shalt.err (!%p6615_p10)
}
 0x170   :  { %s6619_s7 = scalar_lea.vmem %s189_s21, 32  ;;  %p6624_p12 = scmp.lt.s32.totalorder %s189_s21, %s189_s21 }
 0x171   :  { %p6620_p11 = scmp.ne.s32.totalorder %s189_s21, %s6619_s7  ;;  %p6625_p13 = scmp.lt.s32.totalorder %s6619_s7, %s6619_s7 }
 0x173   :  { %p6626_p0 = por %p6625_p13, %p6624_p12 }
 0x175   :  { %p6627_p1 = pnand %p6626_p0, %p6620_p11 }
 0x177   :  { %6630 = shalt.err (!%p6627_p1)
}
 0x178   :  { %s8158_s10 = sld [smem:[#allocation83_spill]]  ;;  %s7136_s20 = smov [#allocation13]  }
 0x179   :  { %191 = dma.hbm_to_vmem [thread:$0]  %s8157_s25, 32, %s189_s21, [#allocation9]  }
 0x17a   :  { %s210_s11 = sshll.u32 %s7136_s20, 4  ;;  %s7137_s17 = smov [#allocation16]   ;;  %s211_s11 = int_to_ptr.vmem [resolvable:$true] %s210_s11 }
 0x17b   :  { %s232_s29 = sshll.u32 %s7137_s17, 4  ;;  %s233_s29 = int_to_ptr.vmem [resolvable:$true] %s232_s29 }
 0x17e   :  { %s6631_s15 = scalar_lea.hbm %s8158_s10, 32 }
 0x17f   :  { %p6632_p2 = scmp.ne.s32.totalorder %s8158_s10, %s6631_s15  ;;  %p6635_p3 = scmp.lt.u32.totalorder %s6631_s15, %s8158_s10 }
 0x181   :  { %p6637_p4 = pnand %p6635_p3, %p6632_p2 }
 0x183   :  { %6640 = shalt.err (!%p6637_p4)
}
 0x184   :  { %s6641_s16 = scalar_lea.vmem %s211_s11, 32  ;;  %p6646_p6 = scmp.lt.s32.totalorder %s211_s11, %s211_s11 }
 0x185   :  { %p6642_p5 = scmp.ne.s32.totalorder %s211_s11, %s6641_s16  ;;  %p6647_p7 = scmp.lt.s32.totalorder %s6641_s16, %s6641_s16 }
 0x187   :  { %p6648_p8 = por %p6647_p7, %p6646_p6 }
 0x189   :  { %p6649_p9 = pnand %p6648_p8, %p6642_p5 }
 0x18b   :  { %6652 = shalt.err (!%p6649_p9)
}
 0x18c   :  { %s8159_s18 = sld [smem:[#allocation85_spill]] }
 0x18d   :  { %213 = dma.hbm_to_vmem [thread:$0]  %s8158_s10, 32, %s211_s11, [#allocation12]  }
 0x192   :  { %s6653_s24 = scalar_lea.hbm %s8159_s18, 16 }
 0x193   :  { %p6654_p10 = scmp.ne.s32.totalorder %s8159_s18, %s6653_s24  ;;  %p6657_p11 = scmp.lt.u32.totalorder %s6653_s24, %s8159_s18 }
 0x195   :  { %p6659_p12 = pnand %p6657_p11, %p6654_p10 }
 0x197   :  { %6662 = shalt.err (!%p6659_p12)
}
 0x198   :  { %s6663_s13 = scalar_lea.vmem %s233_s29, 16  ;;  %s6667_s8 = scalar_lea.vmem %s233_s29, 32 }
 0x199   :  { %p6664_p13 = scmp.ne.s32.totalorder %s233_s29, %s6663_s13  ;;  %p6668_p0 = scmp.lt.s32.totalorder %s233_s29, %s233_s29 }
 0x19a   :  { %p6669_p1 = scmp.lt.s32.totalorder %s6667_s8, %s6663_s13 }
 0x19c   :  { %p6670_p2 = por %p6669_p1, %p6668_p0 }
 0x19e   :  { %p6671_p3 = pnand %p6670_p2, %p6664_p13 }
 0x1a0   :  { %6674 = shalt.err (!%p6671_p3)
}
 0x1a1   :  { %s8160_s0 = sld [smem:[#allocation88_spill]]  ;;  %s7138_s4 = smov [#allocation19]  }
 0x1a2   :  { %235 = dma.hbm_to_vmem [thread:$0]  %s8159_s18, 16, %s233_s29, [#allocation15]  }
 0x1a3   :  { %s256_s22 = sshll.u32 %s7138_s4, 4  ;;  %s7139_s23 = smov [#allocation22]   ;;  %s257_s22 = int_to_ptr.vmem [resolvable:$true] %s256_s22 }
 0x1a4   :  { %s279_s14 = sshll.u32 %s7139_s23, 4  ;;  %s7537_s14 = int_to_ptr.vmem [resolvable:$true] %s279_s14 }
 0x1a7   :  { %s6675_s30 = scalar_lea.hbm %s8160_s0, 16 }
 0x1a8   :  { %p6676_p4 = scmp.ne.s32.totalorder %s8160_s0, %s6675_s30  ;;  %p6679_p5 = scmp.lt.u32.totalorder %s6675_s30, %s8160_s0 }
 0x1aa   :  { %p6681_p6 = pnand %p6679_p5, %p6676_p4 }
 0x1ac   :  { %6684 = shalt.err (!%p6681_p6)
}
 0x1ad   :  { %s6685_s9 = scalar_lea.vmem %s257_s22, 16  ;;  %s6689_s26 = scalar_lea.vmem %s257_s22, 32 }
 0x1ae   :  { %p6686_p7 = scmp.ne.s32.totalorder %s257_s22, %s6685_s9  ;;  %p6690_p8 = scmp.lt.s32.totalorder %s257_s22, %s257_s22 }
 0x1af   :  { %p6691_p9 = scmp.lt.s32.totalorder %s6689_s26, %s6685_s9 }
 0x1b1   :  { %p6692_p10 = por %p6691_p9, %p6690_p8 }
 0x1b3   :  { %p6693_p11 = pnand %p6692_p10, %p6686_p7 }
 0x1b5   :  { %6696 = shalt.err (!%p6693_p11)
}
 0x1b6   :  { %s8161_s28 = sld [smem:[#allocation91_spill]] }
 0x1b7   :  { %259 = dma.hbm_to_vmem [thread:$0]  %s8160_s0, 16, %s257_s22, [#allocation18]  }
 0x1bc   :  { %s6697_s1 = scalar_lea.hbm %s8161_s28, 128 }
 0x1bd   :  { %p6698_p12 = scmp.ne.s32.totalorder %s8161_s28, %s6697_s1  ;;  %p6701_p13 = scmp.lt.u32.totalorder %s6697_s1, %s8161_s28 }
 0x1bf   :  { %p6703_p0 = pnand %p6701_p13, %p6698_p12 }
 0x1c1   :  { %6706 = shalt.err (!%p6703_p0)
}
 0x1c2   :  { %s6707_s21 = scalar_lea.vmem %s7537_s14, 128  ;;  %p6712_p2 = scmp.lt.s32.totalorder %s7537_s14, %s7537_s14 }
 0x1c3   :  { %p6708_p1 = scmp.ne.s32.totalorder %s7537_s14, %s6707_s21  ;;  %p6713_p3 = scmp.lt.s32.totalorder %s6707_s21, %s6707_s21 }
 0x1c5   :  { %p6714_p4 = por %p6713_p3, %p6712_p2 }
 0x1c7   :  { %p6715_p5 = pnand %p6714_p4, %p6708_p1 }
 0x1c9   :  { %6718 = shalt.err (!%p6715_p5)
}
 0x1ca   :  { %s7140_s12 = smov 64   ;;  %s8162_s5 = sld [smem:[#allocation93_spill]] }
 0x1cb   :  { %s7141_s25 = smov 4   ;;  %s7142_s2 = smov [#allocation25]  }
 0x1cc   :  { %285 = dma.hbm_to_vmem [thread:$0]  %s8161_s28, 128, %s7537_s14, [#allocation21], %s7140_s12, %s7140_s12, %s7141_s25  }
 0x1cd   :  { %s304_s7 = sshll.u32 %s7142_s2, 4  ;;  %s7143_s10 = smov [#allocation28]   ;;  %s305_s7 = int_to_ptr.vmem [resolvable:$true] %s304_s7 }
 0x1ce   :  { %s326_s20 = sshll.u32 %s7143_s10, 4  ;;  %s327_s20 = int_to_ptr.vmem [resolvable:$true] %s326_s20 }
 0x1d0   :  { %s6719_s11 = scalar_lea.hbm %s8162_s5, 16 }
 0x1d1   :  { %p6720_p6 = scmp.ne.s32.totalorder %s8162_s5, %s6719_s11  ;;  %p6723_p7 = scmp.lt.u32.totalorder %s6719_s11, %s8162_s5 }
 0x1d3   :  { %p6725_p8 = pnand %p6723_p7, %p6720_p6 }
 0x1d5   :  { %6728 = shalt.err (!%p6725_p8)
}
 0x1d6   :  { %s6729_s17 = scalar_lea.vmem %s305_s7, 16  ;;  %s6733_s29 = scalar_lea.vmem %s305_s7, 32 }
 0x1d7   :  { %p6730_p9 = scmp.ne.s32.totalorder %s305_s7, %s6729_s17  ;;  %p6734_p10 = scmp.lt.s32.totalorder %s305_s7, %s305_s7 }
 0x1d8   :  { %p6735_p11 = scmp.lt.s32.totalorder %s6733_s29, %s6729_s17 }
 0x1da   :  { %p6736_p12 = por %p6735_p11, %p6734_p10 }
 0x1dc   :  { %p6737_p13 = pnand %p6736_p12, %p6730_p9 }
 0x1de   :  { %6740 = shalt.err (!%p6737_p13)
}
 0x1df   :  { %s8163_s15 = sld [smem:[#allocation94_spill]] }
 0x1e0   :  { %307 = dma.hbm_to_vmem [thread:$0]  %s8162_s5, 16, %s305_s7, [#allocation24]  }
 0x1e5   :  { %s6741_s16 = scalar_lea.hbm %s8163_s15, 32 }
 0x1e6   :  { %p6742_p0 = scmp.ne.s32.totalorder %s8163_s15, %s6741_s16  ;;  %p6745_p1 = scmp.lt.u32.totalorder %s6741_s16, %s8163_s15 }
 0x1e8   :  { %p6747_p2 = pnand %p6745_p1, %p6742_p0 }
 0x1ea   :  { %6750 = shalt.err (!%p6747_p2)
}
 0x1eb   :  { %s6751_s18 = scalar_lea.vmem %s327_s20, 32  ;;  %p6756_p4 = scmp.lt.s32.totalorder %s327_s20, %s327_s20 }
 0x1ec   :  { %p6752_p3 = scmp.ne.s32.totalorder %s327_s20, %s6751_s18  ;;  %p6757_p5 = scmp.lt.s32.totalorder %s6751_s18, %s6751_s18 }
 0x1ee   :  { %p6758_p6 = por %p6757_p5, %p6756_p4 }
 0x1f0   :  { %p6759_p7 = pnand %p6758_p6, %p6752_p3 }
 0x1f2   :  { %6762 = shalt.err (!%p6759_p7)
}
 0x1f3   :  { %s8164_s24 = sld [smem:[#allocation97_spill]]  ;;  %s7144_s13 = smov [#allocation31]  }
 0x1f4   :  { %329 = dma.hbm_to_vmem [thread:$0]  %s8163_s15, 32, %s327_s20, [#allocation27]  }
 0x1f5   :  { %s350_s8 = sshll.u32 %s7144_s13, 4  ;;  %s7145_s0 = smov [#allocation34]   ;;  %s351_s8 = int_to_ptr.vmem [resolvable:$true] %s350_s8 }
 0x1f6   :  { %s372_s4 = sshll.u32 %s7145_s0, 4  ;;  %s373_s4 = int_to_ptr.vmem [resolvable:$true] %s372_s4 }
 0x1f9   :  { %s6763_s22 = scalar_lea.hbm %s8164_s24, 16 }
 0x1fa   :  { %p6764_p8 = scmp.ne.s32.totalorder %s8164_s24, %s6763_s22  ;;  %p6767_p9 = scmp.lt.u32.totalorder %s6763_s22, %s8164_s24 }
 0x1fc   :  { %p6769_p10 = pnand %p6767_p9, %p6764_p8 }
 0x1fe   :  { %6772 = shalt.err (!%p6769_p10)
}
 0x1ff   :  { %s6773_s23 = scalar_lea.vmem %s351_s8, 16  ;;  %s6777_s14 = scalar_lea.vmem %s351_s8, 32 }
 0x200   :  { %p6774_p11 = scmp.ne.s32.totalorder %s351_s8, %s6773_s23  ;;  %p6778_p12 = scmp.lt.s32.totalorder %s351_s8, %s351_s8 }
 0x201   :  { %p6779_p13 = scmp.lt.s32.totalorder %s6777_s14, %s6773_s23 }
 0x203   :  { %p6780_p0 = por %p6779_p13, %p6778_p12 }
 0x205   :  { %p6781_p1 = pnand %p6780_p0, %p6774_p11 }
 0x207   :  { %6784 = shalt.err (!%p6781_p1)
}
 0x208   :  { %s8165_s30 = sld [smem:[#allocation98_spill]] }
 0x209   :  { %353 = dma.hbm_to_vmem [thread:$0]  %s8164_s24, 16, %s351_s8, [#allocation30]  }
 0x20e   :  { %s6785_s9 = scalar_lea.hbm %s8165_s30, 32 }
 0x20f   :  { %p6786_p2 = scmp.ne.s32.totalorder %s8165_s30, %s6785_s9  ;;  %p6789_p3 = scmp.lt.u32.totalorder %s6785_s9, %s8165_s30 }
 0x211   :  { %p6791_p4 = pnand %p6789_p3, %p6786_p2 }
 0x213   :  { %6794 = shalt.err (!%p6791_p4)
}
 0x214   :  { %s6795_s26 = scalar_lea.vmem %s373_s4, 32  ;;  %p6800_p6 = scmp.lt.s32.totalorder %s373_s4, %s373_s4 }
 0x215   :  { %p6796_p5 = scmp.ne.s32.totalorder %s373_s4, %s6795_s26  ;;  %p6801_p7 = scmp.lt.s32.totalorder %s6795_s26, %s6795_s26 }
 0x217   :  { %p6802_p8 = por %p6801_p7, %p6800_p6 }
 0x219   :  { %p6803_p9 = pnand %p6802_p8, %p6796_p5 }
 0x21b   :  { %6806 = shalt.err (!%p6803_p9)
}
 0x21c   :  { %s8166_s28 = sld [smem:[#allocation99_spill]]  ;;  %s7146_s1 = smov [#allocation37]  }
 0x21d   :  { %375 = dma.hbm_to_vmem [thread:$0]  %s8165_s30, 32, %s373_s4, [#allocation33]  }
 0x21e   :  { %s394_s21 = sshll.u32 %s7146_s1, 4  ;;  %s7147_s5 = smov [#allocation40]   ;;  %s395_s21 = int_to_ptr.vmem [resolvable:$true] %s394_s21 }
 0x21f   :  { %s415_s2 = sshll.u32 %s7147_s5, 4  ;;  %s7571_s2 = int_to_ptr.vmem [resolvable:$true] %s415_s2 }
 0x222   :  { %s6807_s7 = scalar_lea.hbm %s8166_s28, 64 }
 0x223   :  { %p6808_p10 = scmp.ne.s32.totalorder %s8166_s28, %s6807_s7  ;;  %p6811_p11 = scmp.lt.u32.totalorder %s6807_s7, %s8166_s28 }
 0x225   :  { %p6813_p12 = pnand %p6811_p11, %p6808_p10 }
 0x227   :  { %6816 = shalt.err (!%p6813_p12)
}
 0x228   :  { %s6817_s10 = scalar_lea.vmem %s395_s21, 64  ;;  %p6822_p0 = scmp.lt.s32.totalorder %s395_s21, %s395_s21 }
 0x229   :  { %p6818_p13 = scmp.ne.s32.totalorder %s395_s21, %s6817_s10  ;;  %p6823_p1 = scmp.lt.s32.totalorder %s6817_s10, %s6817_s10 }
 0x22b   :  { %p6824_p2 = por %p6823_p1, %p6822_p0 }
 0x22d   :  { %p6825_p3 = pnand %p6824_p2, %p6818_p13 }
 0x22f   :  { %6828 = shalt.err (!%p6825_p3)
}
 0x230   :  { %s8167_s20 = sld [smem:[#allocation101_spill]] }
 0x231   :  { %397 = dma.hbm_to_vmem [thread:$0]  %s8166_s28, 64, %s395_s21, [#allocation36]  }
 0x236   :  { %s6829_s11 = scalar_lea.hbm %s8167_s20, 128 }
 0x237   :  { %p6830_p4 = scmp.ne.s32.totalorder %s8167_s20, %s6829_s11  ;;  %p6833_p5 = scmp.lt.u32.totalorder %s6829_s11, %s8167_s20 }
 0x239   :  { %p6835_p6 = pnand %p6833_p5, %p6830_p4 }
 0x23b   :  { %6838 = shalt.err (!%p6835_p6)
}
 0x23c   :  { %s6839_s17 = scalar_lea.vmem %s7571_s2, 128  ;;  %p6844_p8 = scmp.lt.s32.totalorder %s7571_s2, %s7571_s2 }
 0x23d   :  { %p6840_p7 = scmp.ne.s32.totalorder %s7571_s2, %s6839_s17  ;;  %p6845_p9 = scmp.lt.s32.totalorder %s6839_s17, %s6839_s17 }
 0x23f   :  { %p6846_p10 = por %p6845_p9, %p6844_p8 }
 0x241   :  { %p6847_p11 = pnand %p6846_p10, %p6840_p7 }
 0x243   :  { %6850 = shalt.err (!%p6847_p11)
}
 0x244   :  { %s8168_s29 = sld [smem:[#allocation103_spill]]  ;;  %s7148_s15 = smov [#allocation43]  }
 0x245   :  { %421 = dma.hbm_to_vmem [thread:$0]  %s8167_s20, 128, %s7571_s2, [#allocation39], %s7140_s12, %s7140_s12, %s7141_s25  }
 0x246   :  { %s440_s16 = sshll.u32 %s7148_s15, 4  ;;  %s7149_s18 = smov [#allocation44]   ;;  %s441_s16 = int_to_ptr.vmem [resolvable:$true] %s440_s16 }
 0x247   :  { %s452_s24 = sshll.u32 %s7149_s18, 4  ;;  %s453_s24 = int_to_ptr.vmem [resolvable:$true] %s452_s24 }
 0x24a   :  { %s6851_s13 = scalar_lea.hbm %s8168_s29, 32 }
 0x24b   :  { %p6852_p12 = scmp.ne.s32.totalorder %s8168_s29, %s6851_s13  ;;  %p6855_p13 = scmp.lt.u32.totalorder %s6851_s13, %s8168_s29 }
 0x24d   :  { %p6857_p0 = pnand %p6855_p13, %p6852_p12 }
 0x24f   :  { %6860 = shalt.err (!%p6857_p0)
}
 0x250   :  { %s6861_s8 = scalar_lea.vmem %s441_s16, 32  ;;  %p6866_p2 = scmp.lt.s32.totalorder %s441_s16, %s441_s16 }
 0x251   :  { %p6862_p1 = scmp.ne.s32.totalorder %s441_s16, %s6861_s8  ;;  %p6867_p3 = scmp.lt.s32.totalorder %s6861_s8, %s6861_s8 }
 0x253   :  { %p6868_p4 = por %p6867_p3, %p6866_p2 }
 0x255   :  { %p6869_p5 = pnand %p6868_p4, %p6862_p1 }
 0x257   :  { %6872 = shalt.err (!%p6869_p5)
}
 0x258   :  { %s8169_s12 = sld [smem:[#allocation105_spill]] }
 0x259   :  { %443 = dma.hbm_to_vmem [thread:$0]  %s8168_s29, 32, %s441_s16, [#allocation42]  }
 0x25e   :  { %s6873_s25 = scalar_lea.hbm %s8169_s12, 16 }
 0x25f   :  { %p6874_p6 = scmp.ne.s32.totalorder %s8169_s12, %s6873_s25  ;;  %p6877_p7 = scmp.lt.u32.totalorder %s6873_s25, %s8169_s12 }
 0x261   :  { %p6879_p8 = pnand %p6877_p7, %p6874_p6 }
 0x263   :  { %6882 = shalt.err (!%p6879_p8)
}
 0x264   :  { %s6883_s0 = scalar_lea.vmem %s453_s24, 16  ;;  %s6887_s4 = scalar_lea.vmem %s453_s24, 32 }
 0x265   :  { %p6884_p9 = scmp.ne.s32.totalorder %s453_s24, %s6883_s0  ;;  %p6888_p10 = scmp.lt.s32.totalorder %s453_s24, %s453_s24 }
 0x266   :  { %p6889_p11 = scmp.lt.s32.totalorder %s6887_s4, %s6883_s0 }
 0x268   :  { %p6890_p12 = por %p6889_p11, %p6888_p10 }
 0x26a   :  { %p6891_p13 = pnand %p6890_p12, %p6884_p9 }
 0x26c   :  { %6894 = shalt.err (!%p6891_p13)
}
 0x26d   :  { %455 = dma.hbm_to_vmem [thread:$0]  %s8169_s12, 16, %s453_s24, [#allocation45]  }
 0x26e   :  { %7027 = dma.done.wait [#allocation3], 1024  }
 0x26f   :  { %7028 = vsyncadd [#allocation3], 4294966272 }
 0x270   :  { %7029 = dma.done.wait [#allocation6], 128  }
 0x271   :  { %7030 = vsyncadd [#allocation6], 4294967168 }
 0x272   :  { %7031 = dma.done.wait [#allocation9], 96  }
 0x273   :  { %7032 = vsyncadd [#allocation9], 4294967200 }
 0x274   :  { %7033 = dma.done.wait [#allocation12], 64  }
 0x275   :  { %7034 = vsyncadd [#allocation12], 4294967232 }
 0x276   :  { %7035 = dma.done.wait [#allocation15], 48  }
 0x277   :  { %7036 = vsyncadd [#allocation15], 4294967248 }
 0x278   :  { %7037 = dma.done.wait [#allocation18], 80  }
 0x279   :  { %7038 = vsyncadd [#allocation18], 4294967216 }
 0x27a   :  { %7039 = dma.done.wait [#allocation21], 144  }
 0x27b   :  { %7040 = vsyncadd [#allocation21], 4294967152 }
 0x27c   :  { %7041 = dma.done.wait [#allocation24], 32  }
 0x27d   :  { %7042 = vsyncadd [#allocation24], 4294967264 }
 0x27e   :  { %7043 = dma.done.wait [#allocation27], 288  }
 0x27f   :  { %7044 = vsyncadd [#allocation27], 4294967008 }
 0x280   :  { %7045 = dma.done.wait [#allocation30], 80  }
 0x281   :  { %7046 = vsyncadd [#allocation30], 4294967216 }
 0x282   :  { %7047 = dma.done.wait [#allocation33], 288  }
 0x283   :  { %7048 = vsyncadd [#allocation33], 4294967008 }
 0x284   :  { %7049 = dma.done.wait [#allocation36], 8256  }
 0x285   :  { %7050 = vsyncadd [#allocation36], 4294959040 }
 0x286   :  { %7051 = dma.done.wait [#allocation39], 144  }
 0x287   :  { %7052 = vsyncadd [#allocation39], 4294967152 }
 0x288   :  { %7053 = dma.done.wait [#allocation42], 48  }
 0x289   :  { %7054 = vsyncadd [#allocation42], 4294967248 }
 0x28a   :  { %7055 = dma.done.wait [#allocation45], 16  }
 0x28b   :  { %7056 = vsyncadd [#allocation45], 4294967280  ;;  %v7150_v0 = vmov 0   ;;  %s8170_s22 = sld [smem:[#allocation75_spill]]  ;;  %s8171_s23 = sld [smem:[#allocation78_spill]]  ;;  %vm601_vm0 = vcmask 261120  }
 0x28c   :  { %637 = vmatprep.mubr.bf16.mxu0 %v7150_v0  ;;  %678 = vmatprep.mubr.bf16.mxu1 %v7150_v0  ;;  %v5752_v1 = vld [vmem:[#allocation2 + $0x4] ss:$16 sps:$4 sm:$0xff]   ;;  %v5754_v2 = vld [vmem:[#allocation2 + $0xc] ss:$16 sps:$4 sm:$0xff]   ;;  %v5756_v3 = vld [vmem:[#allocation2] ss:$16 sps:$4 sm:$0xff]  }
 0x28d   :  { %605 = vmatprep.subr.bf16.mxu0 %v5752_v1  ;;  %v5757_v4 = vld [vmem:[#allocation2 + $0x8] ss:$16 sps:$4 sm:$0xff]   ;;  %646 = vmatprep.subr.bf16.mxu1 %v5754_v2  ;;  %v5758_v5 = vld [vmem:[#allocation2 + $0x24] ss:$16 sps:$4 sm:$0xff]   ;;  %v5760_v6 = vld [vmem:[#allocation2 + $0x2c] ss:$16 sps:$4 sm:$0xff]  }
 0x28e   :  { %606 = vmatpush1.bf16.msra.mxu0 %v5756_v3  ;;  %647 = vmatpush1.bf16.msra.mxu1 %v5757_v4  ;;  %v5762_v7 = vld [vmem:[#allocation2 + $0x20] ss:$16 sps:$4 sm:$0xff]   ;;  %v5763_v8 = vld [vmem:[#allocation2 + $0x28] ss:$16 sps:$4 sm:$0xff]   ;;  %s8172_s14 = sld [smem:[#allocation74_spill]]  ;;  %s8174_s9 = sld [smem:[#allocation76_spill]] }
 0x28f   :  { %607 = vmatprep.subr.bf16.mxu0 %v5758_v5  ;;  %648 = vmatprep.subr.bf16.mxu1 %v5760_v6  ;;  %s8173_s30 = sld [smem:[#allocation82_spill]]  ;;  %s8175_s26 = sld [smem:[#allocation80_spill]]  ;;  %vm1481_vm1 = vcmask 130048   ;;  %vm7152_vm2 = vmmov 0   ;;  %vm2054_vm3 = vcmask 1043456   ;;  %vm2050_vm4 = vcmask 64512  }
 0x290   :  { %s8176_s28 = sld [smem:[#allocation84_spill]]  ;;  %s8177_s1 = sld [smem:[#allocation87_spill]] }
 0x291   :  { %v551_v9 = vld [vmem:[%s8170_s22] sm:$0xff]  ;;  %v5767_v13 = vld [vmem:[%s8171_s23 + $0x8] ss:$16 sps:$4 sm:$0xff]   ;;  %v5769_v14 = vld [vmem:[%s8171_s23 + $0xc] ss:$16 sps:$4 sm:$0xff]   ;;  %s8178_s21 = sld [smem:[#allocation86_spill]] }
 0x292   :  { %v5764_v10 = vld [vmem:[%s8171_s23] ss:$16 sps:$4 sm:$0xff]   ;;  %v5766_v11 = vld [vmem:[%s8171_s23 + $0x4] ss:$16 sps:$4 sm:$0xff]   ;;  %v560_v12 = vpack.c.bf16 %v551_v9, %v551_v9  ;;  %608 = vmatpush1.bf16.msra.mxu0 %v5762_v7  ;;  %649 = vmatpush1.bf16.msra.mxu1 %v5763_v8  ;;  %v5775_v16 = vld [vmem:[%s8171_s23 + $0x2c] ss:$16 sps:$4 sm:$0xff]  }
 0x293   :  { %730 = vmatprep.subr.bf16.mxu0 %v5766_v11  ;;  %v5772_v15 = vld [vmem:[%s8171_s23 + $0x24] ss:$16 sps:$4 sm:$0xff]   ;;  %771 = vmatprep.subr.bf16.mxu1 %v5769_v14  ;;  %v5770_v17 = vld [vmem:[%s8171_s23 + $0x20] ss:$16 sps:$4 sm:$0xff]   ;;  %v5773_v18 = vld [vmem:[%s8171_s23 + $0x28] ss:$16 sps:$4 sm:$0xff]   ;;  %v814_v11 = vlaneseq }
 0x294   :  { %v541_v19 = vld [vmem:[%s8172_s14] sm:$0xff]  ;;  %s8179_s5 = sld [smem:[#allocation89_spill]]  ;;  %s8180_s2 = sld [smem:[#allocation77_spill]] }
 0x295   :  { %4968 = vmatmul.mubr.msk.bf16.vlgmr.msra.gmra.mrb[0].mxu0 %vm601_vm0, %v560_v12  ;;  %4969 = vmatmul.mubr.msk.bf16.vlgmr.msra.gmra.mrb[0].mxu1 %vm601_vm0, %v560_v12  ;;  %v5778_v20 = vld [vmem:[%s8173_s30 + $0x4] ss:$8 sps:$4 sm:$0xff]   ;;  %v5776_v21 = vld [vmem:[%s8173_s30] ss:$8 sps:$4 sm:$0xff]   ;;  %v550_v22 = vpack.c.bf16 %v541_v19, %v541_v19  ;;  %v5784_v27 = vld [vmem:[%s8175_s26 + $0x14] ss:$8 sps:$4 sm:$0xff]  }
 0x296   :  { %731 = vmatpush1.bf16.msra.mxu0 %v5764_v10  ;;  %772 = vmatpush1.bf16.msra.mxu1 %v5767_v13  ;;  %v1455_v23 = vld [vmem:[%s8174_s9] sm:$0xff]  ;;  %v5782_v28 = vld [vmem:[%s8175_s26 + $0x10] ss:$8 sps:$4 sm:$0xff]   ;;  %v5790_v31 = vld [vmem:[%s8175_s26 + $0x34] ss:$8 sps:$4 sm:$0xff]   ;;  %v815_v12 = vshrl.u32 %v814_v11, 7 }
 0x297   :  { %732 = vmatprep.subr.bf16.mxu0 %v5772_v15  ;;  %773 = vmatprep.subr.bf16.mxu1 %v5775_v16  ;;  %v1458_v24 = vpack.c.bf16 %v1455_v23, %v1455_v23  ;;  %v5779_v25 = vld [vmem:[%s8175_s26] ss:$8 sps:$4 sm:$0xff]   ;;  %v5781_v26 = vld [vmem:[%s8175_s26 + $0x4] ss:$8 sps:$4 sm:$0xff]   ;;  %v5788_v32 = vld [vmem:[%s8175_s26 + $0x30] ss:$8 sps:$4 sm:$0xff]  }
 0x298   :  { %762 = vmatprep.mubr.bf16.mxu0 %v7150_v0  ;;  %803 = vmatprep.mubr.bf16.mxu1 %v7150_v0  ;;  %v5787_v29 = vld [vmem:[%s8175_s26 + $0x24] ss:$8 sps:$4 sm:$0xff]   ;;  %v5785_v30 = vld [vmem:[%s8175_s26 + $0x20] ss:$8 sps:$4 sm:$0xff]   ;;  %v5796_v35 = vld [vmem:[%s8175_s26 + $0x54] ss:$8 sps:$4 sm:$0xff]  }
 0x299   :  { %v5793_v33 = vld [vmem:[%s8175_s26 + $0x44] ss:$8 sps:$4 sm:$0xff]   ;;  %v5791_v34 = vld [vmem:[%s8175_s26 + $0x40] ss:$8 sps:$4 sm:$0xff]   ;;  %v5794_v36 = vld [vmem:[%s8175_s26 + $0x50] ss:$8 sps:$4 sm:$0xff]  }
 0x29a   :  { %733 = vmatpush1.bf16.msra.mxu0 %v5770_v17  ;;  %774 = vmatpush1.bf16.msra.mxu1 %v5773_v18  ;;  %v5799_v37 = vld [vmem:[%s8175_s26 + $0x64] ss:$8 sps:$4 sm:$0xff]   ;;  %v5797_v38 = vld [vmem:[%s8175_s26 + $0x60] ss:$8 sps:$4 sm:$0xff]   ;;  %v5802_v39 = vld [vmem:[%s8175_s26 + $0x74] ss:$8 sps:$4 sm:$0xff]  }
 0x29b   :  { %1485 = vmatprep.subr.bf16.mxu1 %v5778_v20  ;;  %1371 = vmatprep.subr.bf16.mxu0 %v5781_v26  ;;  %v5800_v40 = vld [vmem:[%s8175_s26 + $0x70] ss:$8 sps:$4 sm:$0xff]   ;;  %v5805_v41 = vld [vmem:[%s8175_s26 + $0x84] ss:$8 sps:$4 sm:$0xff]   ;;  %v5803_v42 = vld [vmem:[%s8175_s26 + $0x80] ss:$8 sps:$4 sm:$0xff]  }
 0x29c   :  { %v5808_v43 = vld [vmem:[%s8175_s26 + $0x94] ss:$8 sps:$4 sm:$0xff]   ;;  %v5806_v44 = vld [vmem:[%s8175_s26 + $0x90] ss:$8 sps:$4 sm:$0xff]   ;;  %v5809_v45 = vld [vmem:[%s8176_s28 + $0x40] sm:$0xff]   ;;  %s8181_s7 = sld [smem:[#allocation90_spill]] }
 0x29d   :  { %4978 = vmatmul.mubr.msk.bf16.vlgmr.msra.gmra.mrb[4].mxu0 %vm601_vm0, %v550_v22  ;;  %4979 = vmatmul.mubr.msk.bf16.vlgmr.msra.gmra.mrb[4].mxu1 %vm601_vm0, %v550_v22  ;;  %v5812_v46 = vld [vmem:[%s8175_s26 + $0xa4] ss:$8 sps:$4 sm:$0xff]   ;;  %v5810_v48 = vld [vmem:[%s8175_s26 + $0xa0] ss:$8 sps:$4 sm:$0xff]   ;;  %v5817_v50 = vld [vmem:[%s8175_s26 + $0xb4] ss:$8 sps:$4 sm:$0xff]  }
 0x29e   :  { %1486 = vmatpush1.bf16.msra.mxu1 %v5776_v21  ;;  %1517 = vmatprep.mubr.bf16.mxu1 %v7150_v0  ;;  %v5813_v47 = vld [vmem:[%s8176_s28] sm:$0xff]   ;;  %v5814_v49 = vld [vmem:[%s8176_s28 + $0x48] sm:$0xff]   ;;  %v5815_v52 = vld [vmem:[%s8175_s26 + $0xb0] ss:$8 sps:$4 sm:$0xff]   ;;  %v7669_v21 = vsub.s32 0, %v815_v12  ;;  %v7671_v22 = vsub.s32 2, %v815_v12 }
 0x29f   :  { %1372 = vmatpush1.bf16.msra.mxu0 %v5779_v25  ;;  %5365 = vmatprep.subr.bf16.mxu1 %v5809_v45  ;;  %v5818_v51 = vld [vmem:[%s8176_s28 + $0x8] sm:$0xff]   ;;  %v5819_v53 = vld [vmem:[%s8176_s28 + $0x50] sm:$0xff]   ;;  %v5824_v57 = vld [vmem:[%s8176_s28 + $0x58] sm:$0xff]   ;;  %v7675_v25 = vsub.s32 3, %v815_v12  ;;  %s8182_s10 = sld [smem:[#allocation95_spill]]  ;;  %s8183_s20 = sld [smem:[#allocation92_spill]] }
 0x2a0   :  { %1373 = vmatprep.subr.bf16.mxu0 %v5784_v27  ;;  %v5822_v54 = vld [vmem:[%s8175_s26 + $0xc4] ss:$8 sps:$4 sm:$0xff]   ;;  %v5823_v55 = vld [vmem:[%s8176_s28 + $0x10] sm:$0xff]   ;;  %v5820_v56 = vld [vmem:[%s8175_s26 + $0xc0] ss:$8 sps:$4 sm:$0xff]   ;;  %s8184_s11 = sld [smem:[#allocation96_spill]] }
 0x2a1   :  { %v5827_v58 = vld [vmem:[%s8175_s26 + $0xd4] ss:$8 sps:$4 sm:$0xff]   ;;  %v5825_v60 = vld [vmem:[%s8175_s26 + $0xd0] ss:$8 sps:$4 sm:$0xff]   ;;  %v5829_v61 = vld [vmem:[%s8176_s28 + $0x60] sm:$0xff]   ;;  %s8185_s17 = sld [smem:[#allocation100_spill]] }
 0x2a2   :  { %v5828_v59 = vld [vmem:[%s8176_s28 + $0x18] sm:$0xff]   ;;  %v5832_v62 = vld [vmem:[%s8175_s26 + $0xe4] ss:$8 sps:$4 sm:$0xff]   ;;  %v5830_v1 = vld [vmem:[%s8175_s26 + $0xe0] ss:$8 sps:$4 sm:$0xff]   ;;  %s8186_s29 = sld [smem:[#allocation102_spill]] }
 0x2a3   :  { %1374 = vmatpush1.bf16.msra.mxu0 %v5782_v28  ;;  %v5833_v63 = vld [vmem:[%s8176_s28 + $0x20] sm:$0xff]   ;;  %v5834_v2 = vld [vmem:[%s8176_s28 + $0x68] sm:$0xff]   ;;  %v5837_v3 = vld [vmem:[%s8175_s26 + $0xf4] ss:$8 sps:$4 sm:$0xff]   ;;  %s8187_s15 = sld [smem:[#allocation104_spill]]  ;;  %s7153_s16 = smov [#allocation47]  }
 0x2a4   :  { %1375 = vmatprep.subr.bf16.mxu0 %v5787_v29  ;;  %v5838_v4 = vld [vmem:[%s8176_s28 + $0x28] sm:$0xff]   ;;  %v5835_v5 = vld [vmem:[%s8175_s26 + $0xf0] ss:$8 sps:$4 sm:$0xff]   ;;  %v812_v23 = vld [vmem:[#allocation5] sm:$0xf]  ;;  %s4828_s18 = sshll.u32 %s7153_s16, 4  ;;  %s4829_s18 = int_to_ptr.vmem [resolvable:$true] %s4828_s18 }
 0x2a5   :  { %5046 = vmatmul.mubr.msk.bf16.vlgmr.msra.gmra.mrb[8].mxu1 %vm1481_vm1, %v1458_v24  ;;  %v5839_v6 = vld [vmem:[%s8176_s28 + $0x70] sm:$0xff]   ;;  %v5842_v7 = vld [vmem:[%s8175_s26 + $0x104] ss:$8 sps:$4 sm:$0xff]   ;;  %v5844_v9 = vld [vmem:[%s8176_s28 + $0x78] sm:$0xff]   ;;  %v7673_v24 = vsub.s32 1, %v815_v12  ;;  %v817_v26 = vrot.slane %v812_v23, %v7669_v21  ;;  %v825_v27 = vrot.slane %v812_v23, %v7671_v22  ;;  %s7154_s24 = smov [#allocation50]   ;;  %p6900_p1 = scmp.lt.s32.totalorder %s4829_s18, %s4829_s18 }
 0x2a6   :  { %5366 = vmatpush3.bf16.msra.mxu1 %v5813_v47  ;;  %v5843_v8 = vld [vmem:[%s8176_s28 + $0x30] sm:$0xff]   ;;  %v5848_v10 = vld [vmem:[%s8176_s28 + $0x38] sm:$0xff]   ;;  %s4848_s13 = sshll.u32 %s7154_s24, 4  ;;  %s6895_s8 = scalar_lea.vmem %s4829_s18, 128  ;;  %s4849_s13 = int_to_ptr.vmem [resolvable:$true] %s4848_s13 }
 0x2a7   :  { %1376 = vmatpush1.bf16.msra.mxu0 %v5785_v30  ;;  %5367 = vmatprep.subr.bf16.mxu1 %v5814_v49  ;;  %v821_v30 = vrot.slane %v812_v23, %v7673_v24  ;;  %p6896_p0 = scmp.ne.s32.totalorder %s4829_s18, %s6895_s8  ;;  %p6901_p2 = scmp.lt.s32.totalorder %s6895_s8, %s6895_s8 }
 0x2a8   :  { %1377 = vmatprep.subr.bf16.mxu0 %v5790_v31  ;;  %v829_v31 = vrot.slane %v812_v23, %v7675_v25 }
 0x2a9   :  { %p6902_p3 = por %p6901_p2, %p6900_p1 }
 0x2aa   :  { %5368 = vmatpush3.bf16.msra.mxu1 %v5818_v51 }
 0x2ab   :  { %1378 = vmatpush1.bf16.msra.mxu0 %v5788_v32  ;;  %5369 = vmatprep.subr.bf16.mxu1 %v5819_v53  ;;  %v7151_v32 = vmov 0.0   ;;  %p6903_p4 = pnand %p6902_p3, %p6896_p0 }
 0x2ac   :  { %1379 = vmatprep.subr.bf16.mxu0 %v5793_v33 }
 0x2ae   :  { %5370 = vmatpush3.bf16.msra.mxu1 %v5823_v55 }
 0x2af   :  { %1380 = vmatpush1.bf16.msra.mxu0 %v5791_v34  ;;  %5371 = vmatprep.subr.bf16.mxu1 %v5824_v57 }
 0x2b0   :  { %1381 = vmatprep.subr.bf16.mxu0 %v5796_v35 }
 0x2b2   :  { %5372 = vmatpush3.bf16.msra.mxu1 %v5828_v59 }
 0x2b3   :  { %1382 = vmatpush1.bf16.msra.mxu0 %v5794_v36  ;;  %5373 = vmatprep.subr.bf16.mxu1 %v5829_v61 }
 0x2b4   :  { %1383 = vmatprep.subr.bf16.mxu0 %v5799_v37 }
 0x2b6   :  { %5374 = vmatpush3.bf16.msra.mxu1 %v5833_v63 }
 0x2b7   :  { %1384 = vmatpush1.bf16.msra.mxu0 %v5797_v38  ;;  %5375 = vmatprep.subr.bf16.mxu1 %v5834_v2 }
 0x2b8   :  { %1385 = vmatprep.subr.bf16.mxu0 %v5802_v39 }
 0x2ba   :  { %5376 = vmatpush3.bf16.msra.mxu1 %v5838_v4 }
 0x2bb   :  { %1386 = vmatpush1.bf16.msra.mxu0 %v5800_v40  ;;  %5377 = vmatprep.subr.bf16.mxu1 %v5839_v6 }
 0x2bc   :  { %1387 = vmatprep.subr.bf16.mxu0 %v5805_v41  ;;  %v1459_v41 = vld [vmem:[#allocation11] sm:$0x3] }
 0x2bd   :  { %v1468_v53 = vrot.slane %v1459_v41, %v7673_v24 }
 0x2be   :  { %5378 = vmatpush3.bf16.msra.mxu1 %v5843_v8 }
 0x2bf   :  { %1388 = vmatpush1.bf16.msra.mxu0 %v5803_v42  ;;  %5379 = vmatprep.subr.bf16.mxu1 %v5844_v9 }
 0x2c0   :  { %1389 = vmatprep.subr.bf16.mxu0 %v5808_v43 }
 0x2c2   :  { %5380 = vmatpush3.bf16.msra.mxu1 %v5848_v10 }
 0x2c3   :  { %1390 = vmatpush1.bf16.msra.mxu0 %v5806_v44  ;;  %5574 = vmatprep.subr.bf16.mxu1 %v7151_v32 }
 0x2c4   :  { %1391 = vmatprep.subr.bf16.mxu0 %v5812_v46 }
 0x2c7   :  { %1392 = vmatpush1.bf16.msra.mxu0 %v5810_v48 }
 0x2c8   :  { %1393 = vmatprep.subr.bf16.mxu0 %v5817_v50  ;;  %v1464_v50 = vrot.slane %v1459_v41, %v7669_v21 }
 0x2cb   :  { %1394 = vmatpush1.bf16.msra.mxu0 %v5815_v52 }
 0x2cc   :  { %1395 = vmatprep.subr.bf16.mxu0 %v5822_v54 }
 0x2cf   :  { %1396 = vmatpush1.bf16.msra.mxu0 %v5820_v56 }
 0x2d0   :  { %1397 = vmatprep.subr.bf16.mxu0 %v5827_v58 }
 0x2d3   :  { %1398 = vmatpush1.bf16.msra.mxu0 %v5825_v60 }
 0x2d4   :  { %1399 = vmatprep.subr.bf16.mxu0 %v5832_v62 }
 0x2d7   :  { %1400 = vmatpush1.bf16.msra.mxu0 %v5830_v1 }
 0x2d8   :  { %1401 = vmatprep.subr.bf16.mxu0 %v5837_v3 }
 0x2db   :  { %1402 = vmatpush1.bf16.msra.mxu0 %v5835_v5 }
 0x2dc   :  { %1412 = vmatprep.subr.bf16.mxu0 %v5842_v7 }
 0x368   :  { %v639_v13 = vpop.f32.mrb[0].mxu0  ;;  %v680_v14 = vpop.f32.mrb[0].mxu1 }
 0x369   :  { %v641_v15 = vpop.f32.mrb[1].mxu0  ;;  %v682_v16 = vpop.f32.mrb[1].mxu1 }
 0x36a   :  { %v643_v17 = vpop.f32.mrb[2].mxu0  ;;  %v684_v18 = vpop.f32.mrb[2].mxu1 }
 0x36b   :  { %v644_v19 = vpop.f32.mrb[3].mxu0  ;;  %v685_v20 = vpop.f32.mrb[3].mxu1 }
 0x370   :  { %v764_v28 = vpop.f32.mrb[4].mxu0  ;;  %v805_v29 = vpop.f32.mrb[4].mxu1 }
 0x371   :  { %v765_v33 = vadd.f32 %v764_v28, %v639_v13  ;;  %v806_v34 = vadd.f32 %v805_v29, %v680_v14  ;;  %v766_v35 = vpop.f32.mrb[5].mxu0  ;;  %v807_v36 = vpop.f32.mrb[5].mxu1 }
 0x372   :  { %v767_v37 = vadd.f32 %v766_v35, %v641_v15  ;;  %v808_v38 = vadd.f32 %v807_v36, %v682_v16  ;;  %v768_v39 = vpop.f32.mrb[6].mxu0  ;;  %v809_v40 = vpop.f32.mrb[6].mxu1 }
 0x373   :  { %v834_v42 = vadd.f32 %v817_v26, %v765_v33  ;;  %v836_v43 = vadd.f32 %v825_v27, %v806_v34  ;;  %v769_v44 = vpop.f32.mrb[7].mxu0  ;;  %v810_v45 = vpop.f32.mrb[7].mxu1 }
 0x374   :  { %v835_v46 = vadd.f32 %v821_v30, %v767_v37  ;;  %v837_v47 = vadd.f32 %v829_v31, %v808_v38 }
 0x375   :  { %v840_v48 = vrot.slane %v834_v42, 4  ;;  %v852_v49 = vrot.slane %v836_v43, 4 }
 0x376   :  { %v846_v51 = vrot.slane %v835_v46, 4  ;;  %v858_v52 = vrot.slane %v837_v47, 4 }
 0x377   :  { %v841_v54 = vadd.f32 %v840_v48, %v834_v42  ;;  %v853_v55 = vadd.f32 %v852_v49, %v836_v43 }
 0x378   :  { %v847_v56 = vadd.f32 %v846_v51, %v835_v46  ;;  %v859_v57 = vadd.f32 %v858_v52, %v837_v47  ;;  %v1519_v58 = vpop.f32.mrb[8].mxu1 }
 0x379   :  { %v842_v59 = vrot.slane %v841_v54, 2  ;;  %v854_v60 = vrot.slane %v853_v55, 2  ;;  %v1520_v61 = vadd.f32 %v1519_v58, %v1464_v50  ;;  %v1521_v62 = vpop.f32.mrb[9].mxu1 }
 0x37a   :  { %v848_v63 = vrot.slane %v847_v56, 2  ;;  %v860_v1 = vrot.slane %v859_v57, 2  ;;  %v1522_v2 = vadd.f32 %v1521_v62, %v1468_v53  ;;  %v1523_v3 = vpop.f32.mrb[10].mxu1 }
 0x37b   :  { %v843_v4 = vadd.f32 %v842_v59, %v841_v54  ;;  %v855_v5 = vadd.f32 %v854_v60, %v853_v55  ;;  %v1528_v6 = vrot.slane %v1520_v61, 4  ;;  %v1524_v7 = vpop.f32.mrb[11].mxu1 }
 0x37c   :  { %v849_v8 = vadd.f32 %v848_v63, %v847_v56  ;;  %v861_v9 = vadd.f32 %v860_v1, %v859_v57  ;;  %v1534_v10 = vrot.slane %v1522_v2, 4 }
 0x37d   :  { %v844_v11 = vrot.slane %v843_v4, 1  ;;  %v856_v12 = vrot.slane %v855_v5, 1  ;;  %v1529_v13 = vadd.f32 %v1528_v6, %v1520_v61 }
 0x37e   :  { %v850_v14 = vrot.slane %v849_v8, 1  ;;  %v862_v15 = vrot.slane %v861_v9, 1  ;;  %v1535_v16 = vadd.f32 %v1534_v10, %v1522_v2 }
 0x37f   :  { %v845_v17 = vadd.f32 %v844_v11, %v843_v4  ;;  %v857_v18 = vadd.f32 %v856_v12, %v855_v5  ;;  %v1530_v19 = vrot.slane %v1529_v13, 2 }
 0x380   :  { %v851_v20 = vadd.f32 %v850_v14, %v849_v8  ;;  %v863_v23 = vadd.f32 %v862_v15, %v861_v9  ;;  %v1536_v26 = vrot.slane %v1535_v16, 2 }
 0x381   :  { %v865_v27 = vmul.f32 0.125, %v845_v17  ;;  %v867_v28 = vmul.f32 0.125, %v857_v18  ;;  %v1531_v29 = vadd.f32 %v1530_v19, %v1529_v13 }
 0x382   :  { %v866_v30 = vmul.f32 0.125, %v851_v20  ;;  %v868_v31 = vmul.f32 0.125, %v863_v23  ;;  %v1537_v33 = vadd.f32 %v1536_v26, %v1535_v16 }
 0x383   :  { %v7684_v34 = vsub.f32 %v834_v42, %v865_v27  ;;  %v7686_v35 = vsub.f32 %v836_v43, %v867_v28  ;;  %v1532_v36 = vrot.slane %v1531_v29, 1 }
 0x384   :  { %v7688_v37 = vsub.f32 %v835_v46, %v866_v30  ;;  %v7690_v38 = vsub.f32 %v837_v47, %v868_v31  ;;  %v1538_v39 = vrot.slane %v1537_v33, 1 }
 0x385   :  { %v873_v40 = vmul.f32 %v7684_v34, %v7684_v34  ;;  %v875_v41 = vmul.f32 %v7686_v35, %v7686_v35  ;;  %v1533_v44 = vadd.f32 %v1532_v36, %v1531_v29 }
 0x386   :  { %v874_v45 = vmul.f32 %v7688_v37, %v7688_v37  ;;  %v876_v42 = vmul.f32 %v7690_v38, %v7690_v38  ;;  %v1539_v43 = vadd.f32 %v1538_v39, %v1537_v33 }
 0x387   :  { %v877_v48 = vrot.slane %v873_v40, 4  ;;  %v889_v46 = vrot.slane %v875_v41, 4  ;;  %v1540_v49 = vmul.f32 0.125, %v1533_v44 }
 0x388   :  { %v883_v47 = vrot.slane %v874_v45, 4  ;;  %v895_v50 = vrot.slane %v876_v42, 4  ;;  %v1541_v51 = vmul.f32 0.125, %v1539_v43 }
 0x389   :  { %v878_v52 = vadd.f32 %v877_v48, %v873_v40  ;;  %v890_v53 = vadd.f32 %v889_v46, %v875_v41  ;;  %v7700_v54 = vsub.f32 %v1520_v61, %v1540_v49  ;;  %v838_v48 = vld [vmem:[#allocation7] sm:$0xf]  ;;  %v839_v46 = vld [vmem:[#allocation8] sm:$0xf] }
 0x38a   :  { %v884_v55 = vadd.f32 %v883_v47, %v874_v45  ;;  %v896_v56 = vadd.f32 %v895_v50, %v876_v42  ;;  %v7702_v57 = vsub.f32 %v1522_v2, %v1541_v51  ;;  %v921_v49 = vrot.slane %v838_v48, %v7669_v21 }
 0x38b   :  { %v879_v58 = vrot.slane %v878_v52, 2  ;;  %v891_v59 = vrot.slane %v890_v53, 2  ;;  %v1544_v60 = vmul.f32 %v7700_v54, %v7700_v54  ;;  %v929_v50 = vrot.slane %v838_v48, %v7671_v22 }
 0x38c   :  { %v885_v62 = vrot.slane %v884_v55, 2  ;;  %v897_v63 = vrot.slane %v896_v56, 2  ;;  %v1545_v1 = vmul.f32 %v7702_v57, %v7702_v57 }
 0x38d   :  { %v880_v3 = vadd.f32 %v879_v58, %v878_v52  ;;  %v892_v4 = vadd.f32 %v891_v59, %v890_v53  ;;  %v1546_v5 = vrot.slane %v1544_v60, 4  ;;  %v925_v53 = vrot.slane %v838_v48, %v7673_v24  ;;  %v1526_v59 = vld [vmem:[#allocation13] sm:$0x3] }
 0x38e   :  { %v886_v6 = vadd.f32 %v885_v62, %v884_v55  ;;  %v898_v61 = vadd.f32 %v897_v63, %v896_v56  ;;  %v1552_v7 = vrot.slane %v1545_v1, 4  ;;  %v946_v55 = vrot.slane %v839_v46, %v7669_v21 }
 0x38f   :  { %v881_v8 = vrot.slane %v880_v3, 1  ;;  %v893_v9 = vrot.slane %v892_v4, 1  ;;  %v1547_v2 = vadd.f32 %v1546_v5, %v1544_v60  ;;  %v933_v60 = vrot.slane %v838_v48, %v7675_v25  ;;  %v5852_v48 = vld [vmem:[%s8175_s26 + $0x130] ss:$8 sps:$4 sm:$0xff]  }
 0x390   :  { %v887_v10 = vrot.slane %v886_v6, 1  ;;  %v899_v11 = vrot.slane %v898_v61, 1  ;;  %v1553_v12 = vadd.f32 %v1552_v7, %v1545_v1  ;;  %v954_v62 = vrot.slane %v839_v46, %v7671_v22 }
 0x391   :  { %v882_v13 = vadd.f32 %v881_v8, %v880_v3  ;;  %v894_v14 = vadd.f32 %v893_v9, %v892_v4  ;;  %v1548_v15 = vrot.slane %v1547_v2, 2  ;;  %v950_v3 = vrot.slane %v839_v46, %v7673_v24 }
 0x392   :  { %v888_v16 = vadd.f32 %v887_v10, %v886_v6  ;;  %v900_v17 = vadd.f32 %v899_v11, %v898_v61  ;;  %v1554_v18 = vrot.slane %v1553_v12, 2  ;;  %v958_v5 = vrot.slane %v839_v46, %v7675_v25  ;;  %v1527_v6 = vld [vmem:[#allocation14] sm:$0x3]  ;;  %v5857_v46 = vld [vmem:[%s8175_s26 + $0x144] ss:$8 sps:$4 sm:$0xff]  }
 0x393   :  { %v901_v19 = vmul.f32 0.125, %v882_v13  ;;  %v903_v20 = vmul.f32 0.125, %v894_v14  ;;  %v1549_v23 = vadd.f32 %v1548_v15, %v1547_v2  ;;  %v1570_v7 = vrot.slane %v1526_v59, %v7669_v21 }
 0x394   :  { %v902_v26 = vmul.f32 0.125, %v888_v16  ;;  %v904_v27 = vmul.f32 0.125, %v900_v17  ;;  %v1555_v28 = vadd.f32 %v1554_v18, %v1553_v12  ;;  %v1574_v10 = vrot.slane %v1526_v59, %v7673_v24  ;;  %v5896_v59 = vld [vmem:[%s8177_s1 + $0x28] sm:$0xff]  }
 0x395   :  { %v905_v29 = vadd.f32 1e-05, %v901_v19  ;;  %v907_v30 = vadd.f32 1e-05, %v903_v20  ;;  %v1550_v31 = vrot.slane %v1549_v23, 1  ;;  %v1583_v13 = vrot.slane %v1527_v6, %v7669_v21 }
 0x396   :  { %v906_v33 = vadd.f32 1e-05, %v902_v26  ;;  %v908_v36 = vadd.f32 1e-05, %v904_v27  ;;  %v1556_v39 = vrot.slane %v1555_v28, 1  ;;  %v1587_v17 = vrot.slane %v1527_v6, %v7673_v24 }
 0x397   :  { %6251 = vrsqrt.f32 %v905_v29  ;;  %v1551_v40 = vadd.f32 %v1550_v31, %v1549_v23  ;;  %v5840_v27 = vld [vmem:[%s8175_s26 + $0x100] ss:$8 sps:$4 sm:$0xff]   ;;  %v5847_v29 = vld [vmem:[%s8175_s26 + $0x114] ss:$8 sps:$4 sm:$0xff]   ;;  %v5876_v6 = vld [vmem:[%s8175_s26 + $0x1b0] ss:$8 sps:$4 sm:$0xff]  }
 0x398   :  { %6253 = vrsqrt.f32 %v907_v30  ;;  %v1557_v41 = vadd.f32 %v1556_v39, %v1555_v28 }
 0x399   :  { %6255 = vrsqrt.f32 %v906_v33  ;;  %v1558_v44 = vmul.f32 0.125, %v1551_v40  ;;  %v5851_v40 = vld [vmem:[%s8175_s26 + $0x124] ss:$8 sps:$4 sm:$0xff]  }
 0x39a   :  { %6257 = vrsqrt.f32 %v908_v36  ;;  %v1559_v45 = vmul.f32 0.125, %v1557_v41  ;;  %v5845_v36 = vld [vmem:[%s8175_s26 + $0x110] ss:$8 sps:$4 sm:$0xff]   ;;  %v5891_v41 = vld [vmem:[%s8177_s1] sm:$0xff]  }
 0x39b   :  { %v1560_v42 = vadd.f32 1e-05, %v1558_v44 }
 0x39c   :  { %v1561_v43 = vadd.f32 1e-05, %v1559_v45  ;;  %v5849_v45 = vld [vmem:[%s8175_s26 + $0x120] ss:$8 sps:$4 sm:$0xff]  }
 0x39d   :  { %6259 = vrsqrt.f32 %v1560_v42  ;;  %v5854_v42 = vld [vmem:[%s8175_s26 + $0x134] ss:$8 sps:$4 sm:$0xff]  }
 0x39e   :  { %6261 = vrsqrt.f32 %v1561_v43  ;;  %v5892_v43 = vld [vmem:[%s8177_s1 + $0x8] sm:$0xff]  }
 0x3a1   :  { %v6252_v47 = vpop.eup %6251 }
 0x3a2   :  { %v6254_v51 = vpop.eup %6253  ;;  %v913_v52 = vmul.f32 %v6252_v47, %v7684_v34  ;;  %v5855_v47 = vld [vmem:[%s8175_s26 + $0x140] ss:$8 sps:$4 sm:$0xff]  }
 0x3a3   :  { %v6256_v56 = vpop.eup %6255  ;;  %v915_v58 = vmul.f32 %v6254_v51, %v7686_v35  ;;  %v5894_v51 = vld [vmem:[%s8177_s1 + $0x18] sm:$0xff]  }
 0x3a4   :  { %v6258_v63 = vpop.eup %6257  ;;  %v914_v1 = vmul.f32 %v6256_v56, %v7688_v37  ;;  %v938_v4 = vmul.f32 %v921_v49, %v913_v52  ;;  %v5893_v49 = vld [vmem:[%s8177_s1 + $0x10] sm:$0xff]   ;;  %v5861_v56 = vld [vmem:[%s8175_s26 + $0x160] ss:$8 sps:$4 sm:$0xff]  }
 0x3a5   :  { %v916_v34 = vmul.f32 %v6258_v63, %v7690_v38  ;;  %v940_v61 = vmul.f32 %v929_v50, %v915_v58  ;;  %v5860_v50 = vld [vmem:[%s8175_s26 + $0x154] ss:$8 sps:$4 sm:$0xff]   ;;  %v5858_v52 = vld [vmem:[%s8175_s26 + $0x150] ss:$8 sps:$4 sm:$0xff]   ;;  %v5867_v63 = vld [vmem:[%s8175_s26 + $0x180] ss:$8 sps:$4 sm:$0xff]  }
 0x3a6   :  { %v939_v35 = vmul.f32 %v925_v53, %v914_v1  ;;  %v963_v8 = vadd.f32 %v946_v55, %v938_v4  ;;  %v5863_v53 = vld [vmem:[%s8175_s26 + $0x164] ss:$8 sps:$4 sm:$0xff]   ;;  %v5866_v58 = vld [vmem:[%s8175_s26 + $0x174] ss:$8 sps:$4 sm:$0xff]  }
 0x3a7   :  { %v6260_v9 = vpop.eup %6259  ;;  %v941_v2 = vmul.f32 %v933_v60, %v916_v34  ;;  %v7722_v11 = vadd.f32 %v954_v62, %v940_v61  ;;  %v5895_v55 = vld [vmem:[%s8177_s1 + $0x20] sm:$0xff]   ;;  %v5864_v60 = vld [vmem:[%s8175_s26 + $0x170] ss:$8 sps:$4 sm:$0xff]   ;;  %v5872_v1 = vld [vmem:[%s8175_s26 + $0x194] ss:$8 sps:$4 sm:$0xff]  }
 0x3a8   :  { %v6262_v37 = vpop.eup %6261  ;;  %v1564_v12 = vmul.f32 %v6260_v9, %v7700_v54  ;;  %v964_v38 = vadd.f32 %v950_v3, %v939_v35  ;;  %v967_v15 = vmax.f32 %v963_v8, 0.0  ;;  %v5869_v62 = vld [vmem:[%s8175_s26 + $0x184] ss:$8 sps:$4 sm:$0xff]   ;;  %v5870_v3 = vld [vmem:[%s8175_s26 + $0x190] ss:$8 sps:$4 sm:$0xff]  }
 0x3a9   :  { %v1565_v14 = vmul.f32 %v6262_v37, %v7702_v57  ;;  %v966_v16 = vadd.f32 %v958_v5, %v941_v2  ;;  %v5875_v4 = vld [vmem:[%s8175_s26 + $0x1a4] ss:$8 sps:$4 sm:$0xff]   ;;  %v5873_v34 = vld [vmem:[%s8175_s26 + $0x1a0] ss:$8 sps:$4 sm:$0xff]   ;;  %v5878_v5 = vld [vmem:[%s8175_s26 + $0x1b4] ss:$8 sps:$4 sm:$0xff]  }
 0x3aa   :  { %v1577_v18 = vmul.f32 %v1570_v7, %v1564_v12  ;;  %v968_v19 = vmax.f32 %v964_v38, 0.0  ;;  %v1035_v54 = vpack.c.bf16 %v967_v15, %v967_v15  ;;  %v5881_v61 = vld [vmem:[%s8175_s26 + $0x1c4] ss:$8 sps:$4 sm:$0xff]   ;;  %v5879_v7 = vld [vmem:[%s8175_s26 + $0x1c0] ss:$8 sps:$4 sm:$0xff]   ;;  %v969_v12 = vmax.f32 %v7722_v11, 0.0 }
 0x3ab   :  { %v970_v20 = vmax.f32 %v966_v16, 0.0  ;;  %v1578_v23 = vmul.f32 %v1574_v10, %v1565_v14  ;;  %v5884_v35 = vld [vmem:[%s8175_s26 + $0x1d4] ss:$8 sps:$4 sm:$0xff]   ;;  %v5882_v8 = vld [vmem:[%s8175_s26 + $0x1d0] ss:$8 sps:$4 sm:$0xff]   ;;  %v5899_v15 = vld [vmem:[%s8178_s21 + $0x40] sm:$0xff]  }
 0x3ac   :  { %v1036_v26 = vpack.c.bf16 %v968_v19, %v968_v19  ;;  %v1590_v28 = vadd.f32 %v1583_v13, %v1577_v18  ;;  %v5887_v9 = vld [vmem:[%s8175_s26 + $0x1e4] ss:$8 sps:$4 sm:$0xff]   ;;  %v5885_v2 = vld [vmem:[%s8175_s26 + $0x1e0] ss:$8 sps:$4 sm:$0xff]   ;;  %v5890_v10 = vld [vmem:[%s8175_s26 + $0x1f4] ss:$8 sps:$4 sm:$0xff]   ;;  %v1037_v38 = vpack.c.bf16 %v969_v12, %v969_v12 }
 0x3ad   :  { %v1591_v30 = vadd.f32 %v1587_v17, %v1578_v23  ;;  %v1038_v57 = vpack.c.bf16 %v970_v20, %v970_v20  ;;  %v5888_v37 = vld [vmem:[%s8175_s26 + $0x1f0] ss:$8 sps:$4 sm:$0xff]   ;;  %v5900_v11 = vld [vmem:[%s8179_s5 + $0x40] sm:$0xff]   ;;  %v5904_v17 = vld [vmem:[%s8179_s5 + $0x48] sm:$0xff]  }
 0x3ae   :  { %1403 = vmatprep.mubr.bf16.mxu0 %v1036_v26  ;;  %v1592_v31 = vmax.f32 %v1590_v28, 0.0  ;;  %v5897_v13 = vld [vmem:[%s8177_s1 + $0x30] sm:$0xff]   ;;  %v5898_v14 = vld [vmem:[%s8177_s1 + $0x38] sm:$0xff]   ;;  %v5902_v16 = vld [vmem:[%s8179_s5] sm:$0xff]  }
 0x3af   :  { %1404 = vmatmul.mubr.bf16.vlgmr.msra.gmra.mrb[8].mxu0 %v1035_v54  ;;  %v1593_v33 = vmax.f32 %v1591_v30, 0.0  ;;  %v5906_v18 = vld [vmem:[%s8179_s5 + $0x8] sm:$0xff]   ;;  %v5908_v19 = vld [vmem:[%s8179_s5 + $0x50] sm:$0xff]   ;;  %v5912_v23 = vld [vmem:[%s8179_s5 + $0x58] sm:$0xff]  }
 0x3b0   :  { %1413 = vmatpush1.bf16.msra.mxu0 %v5840_v27  ;;  %1444 = vmatprep.mubr.bf16.mxu0 %v1038_v57  ;;  %v1626_v44 = vpack.c.bf16 %v1592_v31, %v1592_v31  ;;  %v5910_v20 = vld [vmem:[%s8179_s5 + $0x10] sm:$0xff]   ;;  %v5914_v26 = vld [vmem:[%s8179_s5 + $0x18] sm:$0xff]   ;;  %v5916_v27 = vld [vmem:[%s8179_s5 + $0x60] sm:$0xff]  }
 0x3b1   :  { %1414 = vmatprep.subr.bf16.mxu0 %v5847_v29  ;;  %v1627_v39 = vpack.c.bf16 %v1593_v33, %v1593_v33  ;;  %v5918_v28 = vld [vmem:[%s8179_s5 + $0x20] sm:$0xff]   ;;  %v5920_v54 = vld [vmem:[%s8179_s5 + $0x68] sm:$0xff]   ;;  %v5924_v30 = vld [vmem:[%s8179_s5 + $0x70] sm:$0xff]  }
 0x3b2   :  { %v5922_v29 = vld [vmem:[%s8179_s5 + $0x28] sm:$0xff]   ;;  %v5926_v57 = vld [vmem:[%s8179_s5 + $0x30] sm:$0xff]   ;;  %v5928_v31 = vld [vmem:[%s8179_s5 + $0x78] sm:$0xff]  }
 0x3b3   :  { %1763 = vmatprep.mubr.bf16.mxu1 %v1627_v39  ;;  %v5930_v33 = vld [vmem:[%s8179_s5 + $0x38] sm:$0xff]   ;;  %v5047_v39 = vld [vmem:[#allocation16] ss:$0 sm:$0xff] }
 0x3b4   :  { %1415 = vmatpush1.bf16.msra.mxu0 %v5845_v36  ;;  %1764 = vmatmul.mubr.bf16.vlgmr.msra.gmra.mrb[12].mxu1 %v1626_v44 }
 0x3b5   :  { %1416 = vmatprep.subr.bf16.mxu0 %v5851_v40  ;;  %5575 = vmatpush3.bf16.msra.mxu1 %v5891_v41 }
 0x3b6   :  { %5576 = vmatprep.subr.bf16.mxu1 %v7151_v32  ;;  %5590 = vmatprep.mubr.msk.bf16.mxu1 %vm7152_vm2, %v7151_v32 }
 0x3b8   :  { %1417 = vmatpush1.bf16.msra.mxu0 %v5849_v45 }
 0x3b9   :  { %1418 = vmatprep.subr.bf16.mxu0 %v5854_v42  ;;  %5577 = vmatpush3.bf16.msra.mxu1 %v5892_v43 }
 0x3ba   :  { %5578 = vmatprep.subr.bf16.mxu1 %v7151_v32 }
 0x3bc   :  { %1419 = vmatpush1.bf16.msra.mxu0 %v5852_v48  ;;  %v5901_v48 = vld [vmem:[%s8178_s21] sm:$0xff]  }
 0x3bd   :  { %1420 = vmatprep.subr.bf16.mxu0 %v5857_v46  ;;  %5579 = vmatpush3.bf16.msra.mxu1 %v5893_v49  ;;  %v5903_v49 = vld [vmem:[%s8178_s21 + $0x48] sm:$0xff]  }
 0x3be   :  { %5580 = vmatprep.subr.bf16.mxu1 %v7151_v32 }
 0x3c0   :  { %1421 = vmatpush1.bf16.msra.mxu0 %v5855_v47  ;;  %v5905_v47 = vld [vmem:[%s8178_s21 + $0x8] sm:$0xff]  }
 0x3c1   :  { %1422 = vmatprep.subr.bf16.mxu0 %v5860_v50  ;;  %5581 = vmatpush3.bf16.msra.mxu1 %v5894_v51  ;;  %v5907_v50 = vld [vmem:[%s8178_s21 + $0x50] sm:$0xff]  }
 0x3c2   :  { %5582 = vmatprep.subr.bf16.mxu1 %v7151_v32  ;;  %v5909_v51 = vld [vmem:[%s8178_s21 + $0x10] sm:$0xff]  }
 0x3c4   :  { %1423 = vmatpush1.bf16.msra.mxu0 %v5858_v52  ;;  %v5911_v52 = vld [vmem:[%s8178_s21 + $0x58] sm:$0xff]  }
 0x3c5   :  { %1424 = vmatprep.subr.bf16.mxu0 %v5863_v53  ;;  %5583 = vmatpush3.bf16.msra.mxu1 %v5895_v55  ;;  %v5913_v53 = vld [vmem:[%s8178_s21 + $0x18] sm:$0xff]   ;;  %v5915_v55 = vld [vmem:[%s8178_s21 + $0x60] sm:$0xff]  }
 0x3c6   :  { %5584 = vmatprep.subr.bf16.mxu1 %v7151_v32 }
 0x3c8   :  { %1425 = vmatpush1.bf16.msra.mxu0 %v5861_v56  ;;  %v5917_v56 = vld [vmem:[%s8178_s21 + $0x20] sm:$0xff]  }
 0x3c9   :  { %1426 = vmatprep.subr.bf16.mxu0 %v5866_v58  ;;  %5585 = vmatpush3.bf16.msra.mxu1 %v5896_v59  ;;  %v5919_v58 = vld [vmem:[%s8178_s21 + $0x68] sm:$0xff]  }
 0x3ca   :  { %5586 = vmatprep.subr.bf16.mxu1 %v7151_v32  ;;  %v5921_v59 = vld [vmem:[%s8178_s21 + $0x28] sm:$0xff]  }
 0x3cc   :  { %1427 = vmatpush1.bf16.msra.mxu0 %v5864_v60  ;;  %v5923_v60 = vld [vmem:[%s8178_s21 + $0x70] sm:$0xff]  }
 0x3cd   :  { %1428 = vmatprep.subr.bf16.mxu0 %v5869_v62  ;;  %5587 = vmatpush3.bf16.msra.mxu1 %v5897_v13  ;;  %v5925_v62 = vld [vmem:[%s8178_s21 + $0x30] sm:$0xff]   ;;  %v2047_v13 = vld [vmem:[%s8180_s2] sm:$0xff] }
 0x3ce   :  { %5588 = vmatprep.subr.bf16.mxu1 %v7151_v32 }
 0x3d0   :  { %1429 = vmatpush1.bf16.msra.mxu0 %v5867_v63  ;;  %v5927_v63 = vld [vmem:[%s8178_s21 + $0x78] sm:$0xff]  }
 0x3d1   :  { %1430 = vmatprep.subr.bf16.mxu0 %v5872_v1  ;;  %5589 = vmatpush3.bf16.msra.mxu1 %v5898_v14  ;;  %v5929_v1 = vld [vmem:[%s8178_s21 + $0x38] sm:$0xff]   ;;  %v2049_v14 = vpack.c.bf16 %v2047_v13, %v2047_v13 }
 0x3d2   :  { %5396 = vmatprep.subr.bf16.mxu1 %v5899_v15  ;;  %v5931_v15 = vld [vmem:[%s8181_s7] sm:$0xff]  }
 0x3d4   :  { %1431 = vmatpush1.bf16.msra.mxu0 %v5870_v3  ;;  %v1039_v3 = vld [vmem:[#allocation10] sm:$0x3] }
 0x3d5   :  { %1432 = vmatprep.subr.bf16.mxu0 %v5875_v4  ;;  %v1044_v4 = vrot.slane %v1039_v3, %v7669_v21 }
 0x3d8   :  { %1433 = vmatpush1.bf16.msra.mxu0 %v5873_v34  ;;  %v1048_v34 = vrot.slane %v1039_v3, %v7673_v24  ;;  %v5954_v3 = vld [vmem:[%s8182_s10 + $0x64] ss:$16 sps:$4 sm:$0xff]  }
 0x3d9   :  { %1434 = vmatprep.subr.bf16.mxu0 %v5878_v5 }
 0x3dc   :  { %1435 = vmatpush1.bf16.msra.mxu0 %v5876_v6 }
 0x3dd   :  { %1436 = vmatprep.subr.bf16.mxu0 %v5881_v61 }
 0x3e0   :  { %1437 = vmatpush1.bf16.msra.mxu0 %v5879_v7 }
 0x3e1   :  { %1438 = vmatprep.subr.bf16.mxu0 %v5884_v35 }
 0x3e4   :  { %1439 = vmatpush1.bf16.msra.mxu0 %v5882_v8 }
 0x3e5   :  { %1440 = vmatprep.subr.bf16.mxu0 %v5887_v9 }
 0x3e8   :  { %1441 = vmatpush1.bf16.msra.mxu0 %v5885_v2 }
 0x3e9   :  { %1442 = vmatprep.subr.bf16.mxu0 %v5890_v10  ;;  %v2048_v10 = vld [vmem:[#allocation17] sm:$0xf] }
 0x3ec   :  { %1443 = vmatpush1.bf16.msra.mxu0 %v5888_v37 }
 0x3ed   :  { %5429 = vmatprep.subr.bf16.mxu0 %v5900_v11  ;;  %v5932_v11 = vld [vmem:[%s8181_s7 + $0x8] sm:$0xff]  }
 0x3ef   :  { %1445 = vmatmul.mubr.bf16.vlgmr.msra.gmra.mrb[8].mxu0 %v1037_v38  ;;  %v2056_v38 = vsel %vm2054_vm3, %v2048_v10, 0 }
 0x3f0   :  { %5430 = vmatpush3.bf16.msra.mxu0 %v5902_v16  ;;  %v5933_v16 = vld [vmem:[%s8181_s7 + $0x10] sm:$0xff]  }
 0x3f1   :  { %5431 = vmatprep.subr.bf16.mxu0 %v5904_v17  ;;  %v5934_v17 = vld [vmem:[%s8181_s7 + $0x18] sm:$0xff]  }
 0x3f4   :  { %5432 = vmatpush3.bf16.msra.mxu0 %v5906_v18  ;;  %v5935_v18 = vld [vmem:[%s8181_s7 + $0x20] sm:$0xff]  }
 0x3f5   :  { %5433 = vmatprep.subr.bf16.mxu0 %v5908_v19  ;;  %v5936_v19 = vld [vmem:[%s8181_s7 + $0x28] sm:$0xff]  }
 0x3f8   :  { %5434 = vmatpush3.bf16.msra.mxu0 %v5910_v20  ;;  %v5937_v20 = vld [vmem:[%s8181_s7 + $0x30] sm:$0xff]  }
 0x3f9   :  { %5435 = vmatprep.subr.bf16.mxu0 %v5912_v23  ;;  %v5938_v23 = vld [vmem:[%s8181_s7 + $0x38] sm:$0xff]  }
 0x3fc   :  { %5436 = vmatpush3.bf16.msra.mxu0 %v5914_v26  ;;  %v5941_v26 = vld [vmem:[#allocation26 + $0x4] ss:$8 sps:$4 sm:$0xff]  }
 0x3fd   :  { %5437 = vmatprep.subr.bf16.mxu0 %v5916_v27  ;;  %v5939_v27 = vld [vmem:[#allocation26] ss:$8 sps:$4 sm:$0xff]  }
 0x400   :  { %5438 = vmatpush3.bf16.msra.mxu0 %v5918_v28  ;;  %v5942_v28 = vld [vmem:[#allocation22] sm:$0xff]  }
 0x401   :  { %5439 = vmatprep.subr.bf16.mxu0 %v5920_v54  ;;  %v5945_v54 = vld [vmem:[%s8182_s10 + $0x4] ss:$16 sps:$4 sm:$0xff]  }
 0x404   :  { %5440 = vmatpush3.bf16.msra.mxu0 %v5922_v29 }
 0x405   :  { %5441 = vmatprep.subr.bf16.mxu0 %v5924_v30 }
 0x408   :  { %5442 = vmatpush3.bf16.msra.mxu0 %v5926_v57 }
 0x409   :  { %5443 = vmatprep.subr.bf16.mxu0 %v5928_v31 }
 0x40c   :  { %5444 = vmatpush3.bf16.msra.mxu0 %v5930_v33 }
 0x40d   :  { %2598 = vmatprep.subr.bf16.mxu0 %v5941_v26  ;;  %v5978_v26 = vld [vmem:[%s8182_s10 + $0x164] ss:$16 sps:$4 sm:$0xff]  }
 0x487   :  { %v5381_v36 = vpop.f32.mrb[12].mxu1 }
 0x488   :  { %v5382_v40 = vpop.f32.mrb[13].mxu1 }
 0x489   :  { %v5383_v41 = vadd.f32 %v5382_v40, %v5381_v36  ;;  %v5384_v44 = vpop.f32.mrb[14].mxu1 }
 0x48a   :  { %v5385_v45 = vpop.f32.mrb[15].mxu1 }
 0x48b   :  { %v1766_v42 = vadd.f32 %v5383_v41, %v5047_v39 }
 0x48d   :  { %v1771_v43 = vmax.f32 %v1766_v42, 0.0 }
 0x48f   :  { %v7795_v46 = vpack.c.bf16 %v1771_v43, %v1771_v43 }
 0x491   :  { %5591 = vmatmul.mubr.bf16.vlgmr.msra.gmra.mrb[16].mxu1 %v7795_v46 }
 0x492   :  { %5397 = vmatpush3.bf16.msra.mxu1 %v5901_v48 }
 0x493   :  { %5398 = vmatprep.subr.bf16.mxu1 %v5903_v49 }
 0x496   :  { %5399 = vmatpush3.bf16.msra.mxu1 %v5905_v47  ;;  %v5089_v47 = vld [vmem:[#allocation19] ss:$0 sm:$0xff] }
 0x497   :  { %5400 = vmatprep.subr.bf16.mxu1 %v5907_v50 }
 0x49a   :  { %5401 = vmatpush3.bf16.msra.mxu1 %v5909_v51 }
 0x49b   :  { %5402 = vmatprep.subr.bf16.mxu1 %v5911_v52 }
 0x49e   :  { %5403 = vmatpush3.bf16.msra.mxu1 %v5913_v53 }
 0x49f   :  { %5404 = vmatprep.subr.bf16.mxu1 %v5915_v55 }
 0x4a2   :  { %5405 = vmatpush3.bf16.msra.mxu1 %v5917_v56 }
 0x4a3   :  { %5406 = vmatprep.subr.bf16.mxu1 %v5919_v58  ;;  %v5943_v58 = vld [vmem:[%s8182_s10] ss:$16 sps:$4 sm:$0xff]  }
 0x4a6   :  { %5407 = vmatpush3.bf16.msra.mxu1 %v5921_v59 }
 0x4a7   :  { %5408 = vmatprep.subr.bf16.mxu1 %v5923_v60  ;;  %v5948_v60 = vld [vmem:[%s8182_s10 + $0x24] ss:$16 sps:$4 sm:$0xff]  }
 0x4aa   :  { %5409 = vmatpush3.bf16.msra.mxu1 %v5925_v62  ;;  %v5946_v62 = vld [vmem:[%s8182_s10 + $0x20] ss:$16 sps:$4 sm:$0xff]  }
 0x4ab   :  { %5410 = vmatprep.subr.bf16.mxu1 %v5927_v63  ;;  %v5951_v63 = vld [vmem:[%s8182_s10 + $0x44] ss:$16 sps:$4 sm:$0xff]  }
 0x4ae   :  { %5411 = vmatpush3.bf16.msra.mxu1 %v5929_v1  ;;  %v5949_v1 = vld [vmem:[%s8182_s10 + $0x40] ss:$16 sps:$4 sm:$0xff]  }
 0x4af   :  { %5594 = vmatprep.subr.bf16.mxu1 %v7151_v32 }
 0x4c2   :  { %v1446_v5 = vpop.f32.mrb[8].mxu0 }
 0x4c3   :  { %v5652_v6 = vadd.f32 %v1446_v5, %v1044_v4  ;;  %v1448_v61 = vpop.f32.mrb[9].mxu0  ;;  %v5952_v4 = vld [vmem:[%s8182_s10 + $0x60] ss:$16 sps:$4 sm:$0xff]  }
 0x4c4   :  { %v5653_v7 = vadd.f32 %v1448_v61, %v1048_v34  ;;  %v1450_v35 = vpop.f32.mrb[10].mxu0  ;;  %v5957_v34 = vld [vmem:[%s8182_s10 + $0x84] ss:$16 sps:$4 sm:$0xff]   ;;  %v5955_v5 = vld [vmem:[%s8182_s10 + $0x80] ss:$16 sps:$4 sm:$0xff]  }
 0x4c5   :  { %v1453_v8 = vmax.f32 %v5652_v6, 0.0  ;;  %v1451_v9 = vpop.f32.mrb[11].mxu0  ;;  %v5960_v6 = vld [vmem:[%s8182_s10 + $0xa4] ss:$16 sps:$4 sm:$0xff]   ;;  %v5958_v61 = vld [vmem:[%s8182_s10 + $0xa0] ss:$16 sps:$4 sm:$0xff]  }
 0x4c6   :  { %v1454_v2 = vmax.f32 %v5653_v7, 0.0  ;;  %v5963_v7 = vld [vmem:[%s8182_s10 + $0xc4] ss:$16 sps:$4 sm:$0xff]   ;;  %v5961_v35 = vld [vmem:[%s8182_s10 + $0xc0] ss:$16 sps:$4 sm:$0xff]  }
 0x4c7   :  { %v1804_v12 = vpack.c.bf16 %v1453_v8, %v1453_v8  ;;  %v5966_v8 = vld [vmem:[%s8182_s10 + $0xe4] ss:$16 sps:$4 sm:$0xff]  }
 0x4c8   :  { %v1805_v37 = vpack.c.bf16 %v1454_v2, %v1454_v2  ;;  %v5114_v2 = vld [vmem:[#allocation20] ss:$0 sm:$0xff] }
 0x4ca   :  { %2039 = vmatprep.mubr.bf16.mxu1 %v1805_v37  ;;  %2372 = vmatprep.mubr.bf16.mxu0 %v1805_v37 }
 0x4cb   :  { %2040 = vmatmul.mubr.bf16.vlgmr.msra.gmra.mrb[20].mxu1 %v1804_v12  ;;  %2373 = vmatmul.mubr.bf16.vlgmr.msra.gmra.mrb[12].mxu0 %v1804_v12 }
 0x4cc   :  { %5595 = vmatpush3.bf16.msra.mxu1 %v2056_v38  ;;  %5596 = vmatprep.mubr.msk.bf16.mxu1 %vm7152_vm2, %v7151_v32  ;;  %v5964_v38 = vld [vmem:[%s8182_s10 + $0xe0] ss:$16 sps:$4 sm:$0xff]  }
 0x4cd   :  { %5600 = vmatprep.subr.bf16.mxu1 %v7151_v32  ;;  %2630 = vmatprep.mubr.bf16.mxu0 %v7150_v0 }
 0x4ce   :  { %2599 = vmatpush1.bf16.msra.mxu0 %v5939_v27  ;;  %v5976_v27 = vld [vmem:[%s8182_s10 + $0x160] ss:$16 sps:$4 sm:$0xff]  }
 0x4cf   :  { %3049 = vmatprep.subr.bf16.mxu0 %v5945_v54  ;;  %v5979_v54 = vld [vmem:[%s8182_s10 + $0x180] ss:$16 sps:$4 sm:$0xff]  }
 0x4d3   :  { %5597 = vmatmul.mubr.msk.bf16.vlgmr.msra.gmra.mrb[24].mxu1 %vm2050_vm4, %v2049_v14 }
 0x4d4   :  { %5601 = vmatpush3.bf16.msra.mxu1 %v5931_v15  ;;  %5616 = vmatprep.mubr.msk.bf16.mxu1 %vm7152_vm2, %v7151_v32  ;;  %v5969_v15 = vld [vmem:[%s8182_s10 + $0x104] ss:$16 sps:$4 sm:$0xff]  }
 0x4d5   :  { %5602 = vmatprep.subr.bf16.mxu1 %v7151_v32 }
 0x4d8   :  { %5603 = vmatpush3.bf16.msra.mxu1 %v5932_v11 }
 0x4d9   :  { %5604 = vmatprep.subr.bf16.mxu1 %v7151_v32 }
 0x4dc   :  { %5605 = vmatpush3.bf16.msra.mxu1 %v5933_v16  ;;  %v5967_v16 = vld [vmem:[%s8182_s10 + $0x100] ss:$16 sps:$4 sm:$0xff]  }
 0x4dd   :  { %5606 = vmatprep.subr.bf16.mxu1 %v7151_v32 }
 0x4e0   :  { %5607 = vmatpush3.bf16.msra.mxu1 %v5934_v17 }
 0x4e1   :  { %5608 = vmatprep.subr.bf16.mxu1 %v7151_v32 }
 0x4e4   :  { %5609 = vmatpush3.bf16.msra.mxu1 %v5935_v18  ;;  %v5972_v18 = vld [vmem:[%s8182_s10 + $0x124] ss:$16 sps:$4 sm:$0xff]  }
 0x4e5   :  { %5610 = vmatprep.subr.bf16.mxu1 %v7151_v32 }
 0x4e8   :  { %5611 = vmatpush3.bf16.msra.mxu1 %v5936_v19  ;;  %v5970_v19 = vld [vmem:[%s8182_s10 + $0x120] ss:$16 sps:$4 sm:$0xff]  }
 0x4e9   :  { %5612 = vmatprep.subr.bf16.mxu1 %v7151_v32 }
 0x4ec   :  { %5613 = vmatpush3.bf16.msra.mxu1 %v5937_v20  ;;  %v5975_v20 = vld [vmem:[%s8182_s10 + $0x144] ss:$16 sps:$4 sm:$0xff]  }
 0x4ed   :  { %5614 = vmatprep.subr.bf16.mxu1 %v7151_v32 }
 0x4f0   :  { %5615 = vmatpush3.bf16.msra.mxu1 %v5938_v23  ;;  %v5973_v23 = vld [vmem:[%s8182_s10 + $0x140] ss:$16 sps:$4 sm:$0xff]  }
 0x4f1   :  { %5620 = vmatprep.subr.bf16.mxu1 %v7151_v32 }
 0x4f3   :  { %5617 = vmatmul.mubr.bf16.vlgmr.msra.gmra.mrb[28].mxu1 %v7795_v46 }
 0x4f4   :  { %5622 = vmatprep.mubr.msk.bf16.mxu1 %vm7152_vm2, %v7151_v32  ;;  %5621 = vmatpush3.bf16.msra.mxu1 %v5942_v28  ;;  %v5981_v28 = vld [vmem:[%s8182_s10 + $0x184] ss:$16 sps:$4 sm:$0xff]  }
 0x4f5   :  { %5626 = vmatprep.subr.bf16.mxu1 %v7151_v32 }
 0x564   :  { %v1905_v29 = vpop.f32.mrb[16].mxu1 }
 0x565   :  { %v5592_v30 = vpop.f32.mrb[17].mxu1 }
 0x566   :  { %v1908_v57 = vpop.f32.mrb[18].mxu1  ;;  %v5982_v30 = vld [vmem:[%s8182_s10 + $0x1a0] ss:$16 sps:$4 sm:$0xff]  }
 0x567   :  { %v5593_v31 = vpop.f32.mrb[19].mxu1  ;;  %v5987_v57 = vld [vmem:[%s8182_s10 + $0x1c4] ss:$16 sps:$4 sm:$0xff]  }
 0x568   :  { %v5985_v31 = vld [vmem:[%s8182_s10 + $0x1c0] ss:$16 sps:$4 sm:$0xff]  }
 0x59e   :  { %v5412_v33 = vpop.f32.mrb[20].mxu1  ;;  %v5445_v36 = vpop.f32.mrb[12].mxu0 }
 0x59f   :  { %v5413_v39 = vpop.f32.mrb[21].mxu1  ;;  %v5446_v40 = vpop.f32.mrb[13].mxu0 }
 0x5a0   :  { %v5414_v41 = vadd.f32 %v5413_v39, %v5412_v33  ;;  %v5447_v44 = vadd.f32 %v5446_v40, %v5445_v36  ;;  %v5415_v45 = vpop.f32.mrb[22].mxu1  ;;  %v5448_v42 = vpop.f32.mrb[14].mxu0  ;;  %v5990_v33 = vld [vmem:[%s8182_s10 + $0x1e4] ss:$16 sps:$4 sm:$0xff]   ;;  %v5988_v36 = vld [vmem:[%s8182_s10 + $0x1e0] ss:$16 sps:$4 sm:$0xff]  }
 0x5a1   :  { %v5416_v43 = vpop.f32.mrb[23].mxu1  ;;  %v5449_v48 = vpop.f32.mrb[15].mxu0  ;;  %v5991_v39 = vld [vmem:[%s8183_s20] sm:$0xff]   ;;  %v5992_v40 = vld [vmem:[%s8183_s20 + $0x8] sm:$0xff]  }
 0x5a2   :  { %v2042_v46 = vadd.f32 %v5414_v41, %v1905_v29  ;;  %v5984_v29 = vld [vmem:[%s8182_s10 + $0x1a4] ss:$16 sps:$4 sm:$0xff]   ;;  %v5996_v42 = vld [vmem:[%s8183_s20 + $0x28] sm:$0xff]   ;;  %v5998_v48 = vld [vmem:[%s8183_s20 + $0x38] sm:$0xff]  }
 0x5a3   :  { %v5993_v41 = vld [vmem:[%s8183_s20 + $0x10] sm:$0xff]   ;;  %v5995_v45 = vld [vmem:[%s8183_s20 + $0x20] sm:$0xff]  }
 0x5a4   :  { %v5997_v43 = vld [vmem:[%s8183_s20 + $0x30] sm:$0xff]  }
 0x5a6   :  { %v2092_v49 = vpop.f32.mrb[24].mxu1 }
 0x5a7   :  { %v2098_v50 = vadd.f32 %v2092_v49, %v2042_v46  ;;  %v5598_v51 = vpop.f32.mrb[25].mxu1  ;;  %v6001_v46 = vld [vmem:[%s8182_s10 + $0xc] ss:$16 sps:$4 sm:$0xff]   ;;  %v6047_v49 = vld [vmem:[%s8184_s11 + $0x40] sm:$0xff]  }
 0x5a8   :  { %v2095_v52 = vpop.f32.mrb[26].mxu1 }
 0x5a9   :  { %v2106_v53 = vadd.f32 %v5089_v47, %v2098_v50  ;;  %v5599_v55 = vpop.f32.mrb[27].mxu1  ;;  %v2573_v47 = vld [vmem:[#allocation28] sm:$0x3] }
 0x5aa   :  { %v2578_v50 = vrot.slane %v2573_v47, %v7669_v21  ;;  %v2582_v51 = vrot.slane %v2573_v47, %v7673_v24  ;;  %v6040_v47 = vld [vmem:[%s8182_s10 + $0x1ac] ss:$16 sps:$4 sm:$0xff]  }
 0x5ab   :  { %v2107_v56 = vmax.f32 %v2106_v53, 0.0 }
 0x5ad   :  { %v7845_v59 = vpack.c.bf16 %v2107_v56, %v2107_v56  ;;  %2567 = vst.msk [vmem:[#allocation46] sm:$0xff] %vm1481_vm1, %v2107_v56 }
 0x5af   :  { %5130 = vmatmul.mubr.msk.bf16.vlgmr.msra.gmra.mrb[16].mxu0 %vm1481_vm1, %v7845_v59 }
 0x5b0   :  { %3050 = vmatpush1.bf16.msra.mxu0 %v5943_v58 }
 0x5b1   :  { %3051 = vmatprep.subr.bf16.mxu0 %v5948_v60 }
 0x5b4   :  { %3052 = vmatpush1.bf16.msra.mxu0 %v5946_v62 }
 0x5b5   :  { %3053 = vmatprep.subr.bf16.mxu0 %v5951_v63 }
 0x5b8   :  { %3054 = vmatpush1.bf16.msra.mxu0 %v5949_v1 }
 0x5b9   :  { %3055 = vmatprep.subr.bf16.mxu0 %v5954_v3  ;;  %v6048_v3 = vld [vmem:[%s8184_s11] sm:$0xff]  }
 0x5bc   :  { %3056 = vmatpush1.bf16.msra.mxu0 %v5952_v4 }
 0x5bd   :  { %3057 = vmatprep.subr.bf16.mxu0 %v5957_v34  ;;  %v6049_v34 = vld [vmem:[%s8184_s11 + $0x48] sm:$0xff]  }
 0x5c0   :  { %3058 = vmatpush1.bf16.msra.mxu0 %v5955_v5  ;;  %v6050_v5 = vld [vmem:[%s8184_s11 + $0x8] sm:$0xff]  }
 0x5c1   :  { %3059 = vmatprep.subr.bf16.mxu0 %v5960_v6  ;;  %v6051_v6 = vld [vmem:[%s8184_s11 + $0x50] sm:$0xff]  }
 0x5c4   :  { %3060 = vmatpush1.bf16.msra.mxu0 %v5958_v61  ;;  %v6052_v61 = vld [vmem:[%s8184_s11 + $0x10] sm:$0xff]  }
 0x5c5   :  { %3061 = vmatprep.subr.bf16.mxu0 %v5963_v7  ;;  %v6053_v7 = vld [vmem:[%s8184_s11 + $0x58] sm:$0xff]  }
 0x5c6   :  { %v2238_v9 = vpop.f32.mrb[28].mxu1 }
 0x5c7   :  { %v2375_v10 = vadd.f32 %v5447_v44, %v2238_v9  ;;  %v5618_v37 = vpop.f32.mrb[29].mxu1  ;;  %v5994_v44 = vld [vmem:[%s8183_s20 + $0x18] sm:$0xff]   ;;  %v6056_v9 = vld [vmem:[%s8184_s11 + $0x20] sm:$0xff]  }
 0x5c8   :  { %v2241_v12 = vpop.f32.mrb[30].mxu1  ;;  %3062 = vmatpush1.bf16.msra.mxu0 %v5961_v35  ;;  %v6054_v35 = vld [vmem:[%s8184_s11 + $0x18] sm:$0xff]   ;;  %v5115_v37 = vld [vmem:[#allocation23] ss:$0 sm:$0xff] }
 0x5c9   :  { %v2387_v13 = vadd.f32 %v5114_v2, %v2375_v10  ;;  %v5619_v14 = vpop.f32.mrb[31].mxu1  ;;  %3063 = vmatprep.subr.bf16.mxu0 %v5966_v8  ;;  %v6055_v8 = vld [vmem:[%s8184_s11 + $0x60] sm:$0xff]   ;;  %v6057_v2 = vld [vmem:[%s8184_s11 + $0x68] sm:$0xff]  }
 0x5ca   :  { %v6058_v10 = vld [vmem:[%s8184_s11 + $0x28] sm:$0xff]  }
 0x5cb   :  { %v2388_v11 = vmax.f32 %v2387_v13, 0.0 }
 0x5cc   :  { %3064 = vmatpush1.bf16.msra.mxu0 %v5964_v38 }
 0x5cd   :  { %v2391_v17 = vpack.c.bf16 %v2388_v11, %v2388_v11  ;;  %2568 = vst.msk [vmem:[#allocation47] sm:$0xff] %vm1481_vm1, %v2388_v11  ;;  %3065 = vmatprep.subr.bf16.mxu0 %v5969_v15 }
 0x5cf   :  { %5623 = vmatmul.mubr.msk.bf16.vlgmr.msra.gmra.mrb[32].mxu1 %vm1481_vm1, %v2391_v17 }
 0x5d0   :  { %3066 = vmatpush1.bf16.msra.mxu0 %v5967_v16  ;;  %5642 = vmatprep.mubr.msk.bf16.mxu1 %vm7152_vm2, %v7151_v32  ;;  %v5999_v16 = vld [vmem:[%s8182_s10 + $0x8] ss:$16 sps:$4 sm:$0xff]  }
 0x5d1   :  { %3067 = vmatprep.subr.bf16.mxu0 %v5972_v18  ;;  %5627 = vmatpush3.bf16.msra.mxu1 %v5991_v39  ;;  %v6004_v18 = vld [vmem:[%s8182_s10 + $0x2c] ss:$16 sps:$4 sm:$0xff]  }
 0x5d2   :  { %5628 = vmatprep.subr.bf16.mxu1 %v7151_v32  ;;  %v6025_v39 = vld [vmem:[%s8182_s10 + $0x10c] ss:$16 sps:$4 sm:$0xff]  }
 0x5d4   :  { %3068 = vmatpush1.bf16.msra.mxu0 %v5970_v19  ;;  %v6002_v19 = vld [vmem:[%s8182_s10 + $0x28] ss:$16 sps:$4 sm:$0xff]  }
 0x5d5   :  { %3069 = vmatprep.subr.bf16.mxu0 %v5975_v20  ;;  %5629 = vmatpush3.bf16.msra.mxu1 %v5992_v40  ;;  %v6007_v20 = vld [vmem:[%s8182_s10 + $0x4c] ss:$16 sps:$4 sm:$0xff]   ;;  %v6023_v40 = vld [vmem:[%s8182_s10 + $0x108] ss:$16 sps:$4 sm:$0xff]  }
 0x5d6   :  { %5630 = vmatprep.subr.bf16.mxu1 %v7151_v32 }
 0x5d8   :  { %3070 = vmatpush1.bf16.msra.mxu0 %v5973_v23  ;;  %v6005_v23 = vld [vmem:[%s8182_s10 + $0x48] ss:$16 sps:$4 sm:$0xff]  }
 0x5d9   :  { %3071 = vmatprep.subr.bf16.mxu0 %v5978_v26  ;;  %5631 = vmatpush3.bf16.msra.mxu1 %v5993_v41  ;;  %v6010_v26 = vld [vmem:[%s8182_s10 + $0x6c] ss:$16 sps:$4 sm:$0xff]  }
 0x5da   :  { %5632 = vmatprep.subr.bf16.mxu1 %v7151_v32  ;;  %v6028_v41 = vld [vmem:[%s8182_s10 + $0x12c] ss:$16 sps:$4 sm:$0xff]  }
 0x5dc   :  { %3072 = vmatpush1.bf16.msra.mxu0 %v5976_v27  ;;  %v6008_v27 = vld [vmem:[%s8182_s10 + $0x68] ss:$16 sps:$4 sm:$0xff]  }
 0x5dd   :  { %3073 = vmatprep.subr.bf16.mxu0 %v5981_v28  ;;  %5633 = vmatpush3.bf16.msra.mxu1 %v5994_v44  ;;  %v6013_v28 = vld [vmem:[%s8182_s10 + $0x8c] ss:$16 sps:$4 sm:$0xff]   ;;  %v6026_v44 = vld [vmem:[%s8182_s10 + $0x128] ss:$16 sps:$4 sm:$0xff]  }
 0x5de   :  { %5634 = vmatprep.subr.bf16.mxu1 %v7151_v32 }
 0x5e0   :  { %3074 = vmatpush1.bf16.msra.mxu0 %v5979_v54  ;;  %v6011_v54 = vld [vmem:[%s8182_s10 + $0x88] ss:$16 sps:$4 sm:$0xff]  }
 0x5e1   :  { %3075 = vmatprep.subr.bf16.mxu0 %v5984_v29  ;;  %5635 = vmatpush3.bf16.msra.mxu1 %v5995_v45  ;;  %v6016_v29 = vld [vmem:[%s8182_s10 + $0xac] ss:$16 sps:$4 sm:$0xff]  }
 0x5e2   :  { %5636 = vmatprep.subr.bf16.mxu1 %v7151_v32  ;;  %v6031_v45 = vld [vmem:[%s8182_s10 + $0x14c] ss:$16 sps:$4 sm:$0xff]  }
 0x5e4   :  { %3076 = vmatpush1.bf16.msra.mxu0 %v5982_v30  ;;  %v6014_v30 = vld [vmem:[%s8182_s10 + $0xa8] ss:$16 sps:$4 sm:$0xff]  }
 0x5e5   :  { %3077 = vmatprep.subr.bf16.mxu0 %v5987_v57  ;;  %5637 = vmatpush3.bf16.msra.mxu1 %v5996_v42  ;;  %v6019_v57 = vld [vmem:[%s8182_s10 + $0xcc] ss:$16 sps:$4 sm:$0xff]   ;;  %v6029_v42 = vld [vmem:[%s8182_s10 + $0x148] ss:$16 sps:$4 sm:$0xff]  }
 0x5e6   :  { %5638 = vmatprep.subr.bf16.mxu1 %v7151_v32 }
 0x5e8   :  { %3078 = vmatpush1.bf16.msra.mxu0 %v5985_v31  ;;  %v6017_v31 = vld [vmem:[%s8182_s10 + $0xc8] ss:$16 sps:$4 sm:$0xff]  }
 0x5e9   :  { %3079 = vmatprep.subr.bf16.mxu0 %v5990_v33  ;;  %5639 = vmatpush3.bf16.msra.mxu1 %v5997_v43  ;;  %v6022_v33 = vld [vmem:[%s8182_s10 + $0xec] ss:$16 sps:$4 sm:$0xff]  }
 0x5ea   :  { %5640 = vmatprep.subr.bf16.mxu1 %v7151_v32  ;;  %v6034_v43 = vld [vmem:[%s8182_s10 + $0x16c] ss:$16 sps:$4 sm:$0xff]  }
 0x5ec   :  { %3080 = vmatpush1.bf16.msra.mxu0 %v5988_v36  ;;  %v6020_v36 = vld [vmem:[%s8182_s10 + $0xe8] ss:$16 sps:$4 sm:$0xff]  }
 0x5ed   :  { %5641 = vmatpush3.bf16.msra.mxu1 %v5998_v48  ;;  %5462 = vmatprep.subr.bf16.mxu0 %v6047_v49  ;;  %v6032_v48 = vld [vmem:[%s8182_s10 + $0x168] ss:$16 sps:$4 sm:$0xff]  }
 0x5ee   :  { %3090 = vmatprep.subr.bf16.mxu1 %v6001_v46  ;;  %v6037_v46 = vld [vmem:[%s8182_s10 + $0x18c] ss:$16 sps:$4 sm:$0xff]   ;;  %v6035_v49 = vld [vmem:[%s8182_s10 + $0x188] ss:$16 sps:$4 sm:$0xff]  }
 0x682   :  { %v2632_v52 = vpop.f32.mrb[16].mxu0 }
 0x683   :  { %v2633_v53 = vadd.f32 %v2632_v52, %v2578_v50  ;;  %v2634_v55 = vpop.f32.mrb[17].mxu0  ;;  %v6038_v50 = vld [vmem:[%s8182_s10 + $0x1a8] ss:$16 sps:$4 sm:$0xff]  }
 0x684   :  { %v2635_v56 = vadd.f32 %v2634_v55, %v2582_v51  ;;  %v2636_v58 = vpop.f32.mrb[18].mxu0  ;;  %v6043_v51 = vld [vmem:[%s8182_s10 + $0x1cc] ss:$16 sps:$4 sm:$0xff]   ;;  %v6041_v52 = vld [vmem:[%s8182_s10 + $0x1c8] ss:$16 sps:$4 sm:$0xff]   ;;  %v6059_v55 = vld [vmem:[%s8184_s11 + $0x70] sm:$0xff]  }
 0x685   :  { %v2639_v60 = vmax.f32 %v2633_v53, 0.0  ;;  %v2637_v62 = vpop.f32.mrb[19].mxu0  ;;  %v6046_v53 = vld [vmem:[%s8182_s10 + $0x1ec] ss:$16 sps:$4 sm:$0xff]   ;;  %v6044_v58 = vld [vmem:[%s8182_s10 + $0x1e8] ss:$16 sps:$4 sm:$0xff]  }
 0x686   :  { %v2640_v63 = vmax.f32 %v2635_v56, 0.0  ;;  %v6060_v56 = vld [vmem:[%s8184_s11 + $0x30] sm:$0xff]   ;;  %v6062_v62 = vld [vmem:[%s8184_s11 + $0x38] sm:$0xff]  }
 0x687   :  { %v7904_v4 = vpack.c.bf16 %v2639_v60, %v2639_v60  ;;  %v6061_v60 = vld [vmem:[%s8184_s11 + $0x78] sm:$0xff]  }
 0x688   :  { %v2706_v1 = vpack.c.bf16 %v2640_v63, %v2640_v63  ;;  %v6065_v63 = vld [vmem:[#allocation32 + $0x4] ss:$8 sps:$4 sm:$0xff]  }
 0x68a   :  { %3081 = vmatprep.mubr.bf16.mxu0 %v2706_v1 }
 0x68b   :  { %3082 = vmatmul.mubr.bf16.vlgmr.msra.gmra.mrb[20].mxu0 %v7904_v4 }
 0x68c   :  { %5463 = vmatpush3.bf16.msra.mxu0 %v6048_v3  ;;  %v6067_v3 = vld [vmem:[%s8184_s11 + $0x80] sm:$0xff]  }
 0x68d   :  { %5464 = vmatprep.subr.bf16.mxu0 %v6049_v34  ;;  %v6068_v34 = vld [vmem:[%s8184_s11 + $0xc8] sm:$0xff]  }
 0x690   :  { %5465 = vmatpush3.bf16.msra.mxu0 %v6050_v5  ;;  %v6069_v5 = vld [vmem:[%s8184_s11 + $0x88] sm:$0xff]  }
 0x691   :  { %5466 = vmatprep.subr.bf16.mxu0 %v6051_v6  ;;  %v6070_v6 = vld [vmem:[%s8184_s11 + $0xd0] sm:$0xff]  }
 0x694   :  { %5467 = vmatpush3.bf16.msra.mxu0 %v6052_v61  ;;  %v6071_v61 = vld [vmem:[%s8184_s11 + $0x90] sm:$0xff]  }
 0x695   :  { %5468 = vmatprep.subr.bf16.mxu0 %v6053_v7  ;;  %v6072_v7 = vld [vmem:[%s8184_s11 + $0xd8] sm:$0xff]  }
 0x698   :  { %5469 = vmatpush3.bf16.msra.mxu0 %v6054_v35  ;;  %v6074_v35 = vld [vmem:[%s8184_s11 + $0xe0] sm:$0xff]  }
 0x699   :  { %5470 = vmatprep.subr.bf16.mxu0 %v6055_v8  ;;  %v6075_v8 = vld [vmem:[%s8184_s11 + $0xa0] sm:$0xff]  }
 0x69c   :  { %5471 = vmatpush3.bf16.msra.mxu0 %v6056_v9  ;;  %v6076_v9 = vld [vmem:[%s8184_s11 + $0xe8] sm:$0xff]  }
 0x69d   :  { %5472 = vmatprep.subr.bf16.mxu0 %v6057_v2  ;;  %v6077_v2 = vld [vmem:[%s8184_s11 + $0xa8] sm:$0xff]  }
 0x6a0   :  { %5473 = vmatpush3.bf16.msra.mxu0 %v6058_v10  ;;  %v6078_v10 = vld [vmem:[%s8184_s11 + $0xf0] sm:$0xff]  }
 0x6a1   :  { %5474 = vmatprep.subr.bf16.mxu0 %v6059_v55  ;;  %v6118_v55 = vld [vmem:[#allocation35 + $0xc0] ss:$16 sps:$4 sm:$0xff]  }
 0x6a2   :  { %v2442_v12 = vpop.f32.mrb[32].mxu1 }
 0x6a3   :  { %v2443_v38 = vadd.f32 %v5115_v37, %v2442_v12  ;;  %v5624_v13 = vpop.f32.mrb[33].mxu1  ;;  %v6079_v37 = vld [vmem:[%s8184_s11 + $0xb0] sm:$0xff]   ;;  %v6080_v12 = vld [vmem:[%s8184_s11 + $0xf8] sm:$0xff]  }
 0x6a4   :  { %v2445_v14 = vpop.f32.mrb[34].mxu1  ;;  %5475 = vmatpush3.bf16.msra.mxu0 %v6060_v56  ;;  %v6087_v13 = vld [vmem:[#allocation35 + $0xc] ss:$16 sps:$4 sm:$0xff]   ;;  %v6126_v56 = vld [vmem:[#allocation35 + $0xe4] ss:$16 sps:$4 sm:$0xff]  }
 0x6a5   :  { %v2448_v15 = vmax.f32 %v2443_v38, 0.0  ;;  %v5625_v11 = vpop.f32.mrb[35].mxu1  ;;  %5476 = vmatprep.subr.bf16.mxu0 %v6061_v60  ;;  %v6081_v38 = vld [vmem:[%s8184_s11 + $0xb8] sm:$0xff]  }
 0x6a6   :  { %v7969_v14 = vld [vmem:[#allocation29] sm:$0xf]  ;;  %v6132_v60 = vld [vmem:[#allocation35 + $0x104] ss:$16 sps:$4 sm:$0xff]  }
 0x6a7   :  { %v2465_v17 = vpack.c.bf16 %v2448_v15, %v2448_v15  ;;  %v2712_v15 = vrot.slane %v7969_v14, %v7669_v21  ;;  %v2716_v11 = vrot.slane %v7969_v14, %v7673_v24 }
 0x6a8   :  { %5477 = vmatpush3.bf16.msra.mxu0 %v6062_v62 }
 0x6a9   :  { %5643 = vmatmul.mubr.bf16.vlgmr.msra.gmra.mrb[36].mxu1 %v2465_v17  ;;  %3521 = vmatprep.subr.bf16.mxu0 %v6065_v63 }
 0x6aa   :  { %3091 = vmatpush1.bf16.msra.mxu1 %v5999_v16  ;;  %3122 = vmatprep.mubr.bf16.mxu1 %v2706_v1  ;;  %v6066_v1 = vld [vmem:[%s8184_s11 + $0xc0] sm:$0xff]  }
 0x6ab   :  { %3092 = vmatprep.subr.bf16.mxu1 %v6004_v18 }
 0x6ae   :  { %3093 = vmatpush1.bf16.msra.mxu1 %v6002_v19 }
 0x6af   :  { %3094 = vmatprep.subr.bf16.mxu1 %v6007_v20 }
 0x6b2   :  { %3095 = vmatpush1.bf16.msra.mxu1 %v6005_v23 }
 0x6b3   :  { %3096 = vmatprep.subr.bf16.mxu1 %v6010_v26 }
 0x6b6   :  { %3097 = vmatpush1.bf16.msra.mxu1 %v6008_v27 }
 0x6b7   :  { %3098 = vmatprep.subr.bf16.mxu1 %v6013_v28 }
 0x6ba   :  { %3099 = vmatpush1.bf16.msra.mxu1 %v6011_v54  ;;  %v6063_v54 = vld [vmem:[#allocation32] ss:$8 sps:$4 sm:$0xff]  }
 0x6bb   :  { %3100 = vmatprep.subr.bf16.mxu1 %v6016_v29 }
 0x6be   :  { %3101 = vmatpush1.bf16.msra.mxu1 %v6014_v30  ;;  %v6084_v30 = vld [vmem:[#allocation35 + $0x4] ss:$16 sps:$4 sm:$0xff]  }
 0x6bf   :  { %3102 = vmatprep.subr.bf16.mxu1 %v6019_v57  ;;  %v6082_v57 = vld [vmem:[#allocation35] ss:$16 sps:$4 sm:$0xff]  }
 0x6c2   :  { %3103 = vmatpush1.bf16.msra.mxu1 %v6017_v31  ;;  %v6090_v31 = vld [vmem:[#allocation35 + $0x24] ss:$16 sps:$4 sm:$0xff]  }
 0x6c3   :  { %3104 = vmatprep.subr.bf16.mxu1 %v6022_v33  ;;  %v6088_v33 = vld [vmem:[#allocation35 + $0x20] ss:$16 sps:$4 sm:$0xff]  }
 0x6c6   :  { %3105 = vmatpush1.bf16.msra.mxu1 %v6020_v36  ;;  %v6096_v36 = vld [vmem:[#allocation35 + $0x44] ss:$16 sps:$4 sm:$0xff]  }
 0x6c7   :  { %3106 = vmatprep.subr.bf16.mxu1 %v6025_v39  ;;  %v6094_v39 = vld [vmem:[#allocation35 + $0x40] ss:$16 sps:$4 sm:$0xff]  }
 0x6ca   :  { %3107 = vmatpush1.bf16.msra.mxu1 %v6023_v40  ;;  %v6102_v40 = vld [vmem:[#allocation35 + $0x64] ss:$16 sps:$4 sm:$0xff]  }
 0x6cb   :  { %3108 = vmatprep.subr.bf16.mxu1 %v6028_v41  ;;  %v6100_v41 = vld [vmem:[#allocation35 + $0x60] ss:$16 sps:$4 sm:$0xff]  }
 0x6ce   :  { %3109 = vmatpush1.bf16.msra.mxu1 %v6026_v44  ;;  %v6108_v44 = vld [vmem:[#allocation35 + $0x84] ss:$16 sps:$4 sm:$0xff]  }
 0x6cf   :  { %3110 = vmatprep.subr.bf16.mxu1 %v6031_v45  ;;  %v5118_v45 = vld [vmem:[#allocation25] ss:$0 sm:$0xff] }
 0x6d2   :  { %3111 = vmatpush1.bf16.msra.mxu1 %v6029_v42 }
 0x6d3   :  { %3112 = vmatprep.subr.bf16.mxu1 %v6034_v43  ;;  %v6106_v43 = vld [vmem:[#allocation35 + $0x80] ss:$16 sps:$4 sm:$0xff]  }
 0x6d6   :  { %3113 = vmatpush1.bf16.msra.mxu1 %v6032_v48 }
 0x6d7   :  { %3114 = vmatprep.subr.bf16.mxu1 %v6037_v46 }
 0x6da   :  { %3115 = vmatpush1.bf16.msra.mxu1 %v6035_v49  ;;  %v6114_v49 = vld [vmem:[#allocation35 + $0xa4] ss:$16 sps:$4 sm:$0xff]  }
 0x6db   :  { %3116 = vmatprep.subr.bf16.mxu1 %v6040_v47 }
 0x6de   :  { %3117 = vmatpush1.bf16.msra.mxu1 %v6038_v50 }
 0x6df   :  { %3118 = vmatprep.subr.bf16.mxu1 %v6043_v51 }
 0x6e2   :  { %3119 = vmatpush1.bf16.msra.mxu1 %v6041_v52  ;;  %v6112_v52 = vld [vmem:[#allocation35 + $0xa0] ss:$16 sps:$4 sm:$0xff]  }
 0x6e3   :  { %3120 = vmatprep.subr.bf16.mxu1 %v6046_v53  ;;  %v6120_v53 = vld [vmem:[#allocation35 + $0xc4] ss:$16 sps:$4 sm:$0xff]  }
 0x6e6   :  { %3121 = vmatpush1.bf16.msra.mxu1 %v6044_v58  ;;  %v6124_v58 = vld [vmem:[#allocation35 + $0xe0] ss:$16 sps:$4 sm:$0xff]  }
 0x6e7   :  { %5484 = vmatprep.subr.bf16.mxu1 %v6066_v1  ;;  %v6130_v1 = vld [vmem:[#allocation35 + $0x100] ss:$16 sps:$4 sm:$0xff]  }
 0x6e9   :  { %3123 = vmatmul.mubr.bf16.vlgmr.msra.gmra.mrb[40].mxu1 %v7904_v4  ;;  %v6073_v4 = vld [vmem:[%s8184_s11 + $0x98] sm:$0xff]  }
 0x6ea   :  { %5485 = vmatpush3.bf16.msra.mxu1 %v6067_v3  ;;  %v6138_v3 = vld [vmem:[#allocation35 + $0x124] ss:$16 sps:$4 sm:$0xff]  }
 0x6eb   :  { %5486 = vmatprep.subr.bf16.mxu1 %v6068_v34  ;;  %v6136_v34 = vld [vmem:[#allocation35 + $0x120] ss:$16 sps:$4 sm:$0xff]  }
 0x6ee   :  { %5487 = vmatpush3.bf16.msra.mxu1 %v6069_v5  ;;  %v6144_v5 = vld [vmem:[#allocation35 + $0x144] ss:$16 sps:$4 sm:$0xff]  }
 0x6ef   :  { %5488 = vmatprep.subr.bf16.mxu1 %v6070_v6  ;;  %v6142_v6 = vld [vmem:[#allocation35 + $0x140] ss:$16 sps:$4 sm:$0xff]  }
 0x6f2   :  { %5489 = vmatpush3.bf16.msra.mxu1 %v6071_v61  ;;  %v6150_v61 = vld [vmem:[#allocation35 + $0x164] ss:$16 sps:$4 sm:$0xff]  }
 0x6f3   :  { %5490 = vmatprep.subr.bf16.mxu1 %v6072_v7 }
 0x6f6   :  { %5491 = vmatpush3.bf16.msra.mxu1 %v6073_v4  ;;  %v6148_v4 = vld [vmem:[#allocation35 + $0x160] ss:$16 sps:$4 sm:$0xff]  }
 0x6f7   :  { %5492 = vmatprep.subr.bf16.mxu1 %v6074_v35  ;;  %v2720_v35 = vrot.slane %v7969_v14, %v7671_v22 }
 0x6fa   :  { %5493 = vmatpush3.bf16.msra.mxu1 %v6075_v8  ;;  %v2724_v8 = vrot.slane %v7969_v14, %v7675_v25  ;;  %v6093_v14 = vld [vmem:[#allocation35 + $0x2c] ss:$16 sps:$4 sm:$0xff]  }
 0x6fb   :  { %5494 = vmatprep.subr.bf16.mxu1 %v6076_v9  ;;  %v6156_v9 = vld [vmem:[#allocation35 + $0x184] ss:$16 sps:$4 sm:$0xff]  }
 0x6fe   :  { %5495 = vmatpush3.bf16.msra.mxu1 %v6077_v2 }
 0x6ff   :  { %5496 = vmatprep.subr.bf16.mxu1 %v6078_v10  ;;  %v6154_v10 = vld [vmem:[#allocation35 + $0x180] ss:$16 sps:$4 sm:$0xff]  }
 0x702   :  { %5497 = vmatpush3.bf16.msra.mxu1 %v6079_v37 }
 0x703   :  { %5498 = vmatprep.subr.bf16.mxu1 %v6080_v12 }
 0x706   :  { %5499 = vmatpush3.bf16.msra.mxu1 %v6081_v38 }
 0x707   :  { %4013 = vmatprep.subr.bf16.mxu1 %v6087_v13 }
 0x75e   :  { %v3083_v16 = vpop.f32.mrb[20].mxu0 }
 0x75f   :  { %v3084_v17 = vadd.f32 %v3083_v16, %v2712_v15  ;;  %v3085_v18 = vpop.f32.mrb[21].mxu0  ;;  %v6160_v15 = vld [vmem:[#allocation35 + $0x1a0] ss:$16 sps:$4 sm:$0xff]  }
 0x760   :  { %v3086_v19 = vadd.f32 %v3085_v18, %v2716_v11  ;;  %v3087_v20 = vpop.f32.mrb[22].mxu0  ;;  %v6162_v11 = vld [vmem:[#allocation35 + $0x1a4] ss:$16 sps:$4 sm:$0xff]  }
 0x761   :  { %v3131_v23 = vmax.f32 %v3084_v17, 0.0  ;;  %v3088_v26 = vpop.f32.mrb[23].mxu0  ;;  %v6085_v20 = vld [vmem:[#allocation35 + $0x8] ss:$16 sps:$4 sm:$0xff]  }
 0x762   :  { %v3132_v27 = vmax.f32 %v3086_v19, 0.0  ;;  %v6168_v26 = vld [vmem:[#allocation35 + $0x1c4] ss:$16 sps:$4 sm:$0xff]  }
 0x763   :  { %v3199_v29 = vpack.c.bf16 %v3131_v23, %v3131_v23 }
 0x764   :  { %v3200_v28 = vpack.c.bf16 %v3132_v27, %v3132_v27  ;;  %v6166_v27 = vld [vmem:[#allocation35 + $0x1c0] ss:$16 sps:$4 sm:$0xff]  }
 0x766   :  { %3434 = vmatprep.mubr.bf16.mxu0 %v3200_v28  ;;  %v6091_v28 = vld [vmem:[#allocation35 + $0x28] ss:$16 sps:$4 sm:$0xff]  }
 0x767   :  { %3435 = vmatmul.mubr.bf16.vlgmr.msra.gmra.mrb[24].mxu0 %v3199_v29  ;;  %v6174_v29 = vld [vmem:[#allocation35 + $0x1e4] ss:$16 sps:$4 sm:$0xff]  }
 0x768   :  { %3522 = vmatpush1.bf16.msra.mxu0 %v6063_v54  ;;  %3553 = vmatprep.mubr.bf16.mxu0 %v7150_v0  ;;  %v6099_v54 = vld [vmem:[#allocation35 + $0x4c] ss:$16 sps:$4 sm:$0xff]  }
 0x769   :  { %3972 = vmatprep.subr.bf16.mxu0 %v6084_v30  ;;  %v6172_v30 = vld [vmem:[#allocation35 + $0x1e0] ss:$16 sps:$4 sm:$0xff]  }
 0x76f   :  { %5230 = vmatmul.mubr.msk.bf16.vlgmr.msra.gmra.mrb[28].mxu0 %vm1481_vm1, %v7845_v59 }
 0x770   :  { %3973 = vmatpush1.bf16.msra.mxu0 %v6082_v57  ;;  %v6097_v57 = vld [vmem:[#allocation35 + $0x48] ss:$16 sps:$4 sm:$0xff]  }
 0x771   :  { %3974 = vmatprep.subr.bf16.mxu0 %v6090_v31  ;;  %v6105_v31 = vld [vmem:[#allocation35 + $0x6c] ss:$16 sps:$4 sm:$0xff]  }
 0x774   :  { %3975 = vmatpush1.bf16.msra.mxu0 %v6088_v33  ;;  %v6103_v33 = vld [vmem:[#allocation35 + $0x68] ss:$16 sps:$4 sm:$0xff]  }
 0x775   :  { %3976 = vmatprep.subr.bf16.mxu0 %v6096_v36  ;;  %v6111_v36 = vld [vmem:[#allocation35 + $0x8c] ss:$16 sps:$4 sm:$0xff]  }
 0x778   :  { %3977 = vmatpush1.bf16.msra.mxu0 %v6094_v39  ;;  %v6109_v39 = vld [vmem:[#allocation35 + $0x88] ss:$16 sps:$4 sm:$0xff]  }
 0x779   :  { %3978 = vmatprep.subr.bf16.mxu0 %v6102_v40  ;;  %v6117_v40 = vld [vmem:[#allocation35 + $0xac] ss:$16 sps:$4 sm:$0xff]  }
 0x77c   :  { %v2555_v42 = vpop.f32.mrb[36].mxu1  ;;  %3979 = vmatpush1.bf16.msra.mxu0 %v6100_v41  ;;  %v6115_v41 = vld [vmem:[#allocation35 + $0xa8] ss:$16 sps:$4 sm:$0xff]  }
 0x77d   :  { %v2556_v48 = vadd.f32 %v5118_v45, %v2555_v42  ;;  %v5644_v46 = vpop.f32.mrb[37].mxu1  ;;  %3980 = vmatprep.subr.bf16.mxu0 %v6108_v44  ;;  %v6123_v44 = vld [vmem:[#allocation35 + $0xcc] ss:$16 sps:$4 sm:$0xff]   ;;  %v6121_v45 = vld [vmem:[#allocation35 + $0xc8] ss:$16 sps:$4 sm:$0xff]  }
 0x77e   :  { %v2558_v47 = vpop.f32.mrb[38].mxu1  ;;  %v6129_v42 = vld [vmem:[#allocation35 + $0xec] ss:$16 sps:$4 sm:$0xff]   ;;  %v6133_v46 = vld [vmem:[#allocation35 + $0x108] ss:$16 sps:$4 sm:$0xff]  }
 0x77f   :  { %v5127_v50 = vmul.f32 -1.442695, %v2556_v48  ;;  %v5645_v51 = vpop.f32.mrb[39].mxu1  ;;  %v6135_v48 = vld [vmem:[#allocation35 + $0x10c] ss:$16 sps:$4 sm:$0xff]  }
 0x780   :  { %3981 = vmatpush1.bf16.msra.mxu0 %v6106_v43  ;;  %v6127_v43 = vld [vmem:[#allocation35 + $0xe8] ss:$16 sps:$4 sm:$0xff]  }
 0x781   :  { %6263 = vpow2.f32 %v5127_v50  ;;  %3982 = vmatprep.subr.bf16.mxu0 %v6114_v49  ;;  %v6141_v49 = vld [vmem:[#allocation35 + $0x12c] ss:$16 sps:$4 sm:$0xff]   ;;  %v6139_v47 = vld [vmem:[#allocation35 + $0x128] ss:$16 sps:$4 sm:$0xff]  }
 0x782   :  { %v6147_v50 = vld [vmem:[#allocation35 + $0x14c] ss:$16 sps:$4 sm:$0xff]   ;;  %v6145_v51 = vld [vmem:[#allocation35 + $0x148] ss:$16 sps:$4 sm:$0xff]  }
 0x784   :  { %3983 = vmatpush1.bf16.msra.mxu0 %v6112_v52  ;;  %v6153_v52 = vld [vmem:[#allocation35 + $0x16c] ss:$16 sps:$4 sm:$0xff]  }
 0x785   :  { %3984 = vmatprep.subr.bf16.mxu0 %v6120_v53  ;;  %v6151_v53 = vld [vmem:[#allocation35 + $0x168] ss:$16 sps:$4 sm:$0xff]  }
 0x788   :  { %3985 = vmatpush1.bf16.msra.mxu0 %v6118_v55  ;;  %v6159_v55 = vld [vmem:[#allocation35 + $0x18c] ss:$16 sps:$4 sm:$0xff]  }
 0x789   :  { %3986 = vmatprep.subr.bf16.mxu0 %v6126_v56  ;;  %v6157_v56 = vld [vmem:[#allocation35 + $0x188] ss:$16 sps:$4 sm:$0xff]  }
 0x78b   :  { %v6264_v62 = vpop.eup %6263 }
 0x78c   :  { %v2564_v63 = vadd.f32 1.0, %v6264_v62  ;;  %3987 = vmatpush1.bf16.msra.mxu0 %v6124_v58  ;;  %v6165_v58 = vld [vmem:[#allocation35 + $0x1ac] ss:$16 sps:$4 sm:$0xff]  }
 0x78d   :  { %3988 = vmatprep.subr.bf16.mxu0 %v6132_v60  ;;  %v6163_v60 = vld [vmem:[#allocation35 + $0x1a8] ss:$16 sps:$4 sm:$0xff]   ;;  %v6171_v62 = vld [vmem:[#allocation35 + $0x1cc] ss:$16 sps:$4 sm:$0xff]  }
 0x78e   :  { %6265 = vrcp.f32 %v2564_v63  ;;  %v6169_v63 = vld [vmem:[#allocation35 + $0x1c8] ss:$16 sps:$4 sm:$0xff]  }
 0x790   :  { %3989 = vmatpush1.bf16.msra.mxu0 %v6130_v1  ;;  %v6177_v1 = vld [vmem:[#allocation35 + $0x1ec] ss:$16 sps:$4 sm:$0xff]  }
 0x791   :  { %3990 = vmatprep.subr.bf16.mxu0 %v6138_v3  ;;  %v6175_v3 = vld [vmem:[#allocation35 + $0x1e8] ss:$16 sps:$4 sm:$0xff]  }
 0x794   :  { %3991 = vmatpush1.bf16.msra.mxu0 %v6136_v34  ;;  %v6178_v34 = vld [vmem:[%s8185_s17 + $0x40] sm:$0xff]  }
 0x795   :  { %3992 = vmatprep.subr.bf16.mxu0 %v6144_v5  ;;  %v6179_v5 = vld [vmem:[%s8185_s17 + $0xc0] sm:$0xff]  }
 0x798   :  { %v6266_v7 = vpop.eup %6265  ;;  %3993 = vmatpush1.bf16.msra.mxu0 %v6142_v6 }
 0x799   :  { %2569 = vst.msk [vmem:[#allocation49] sm:$0xff] %vm2050_vm4, %v6266_v7  ;;  %3994 = vmatprep.subr.bf16.mxu0 %v6150_v61 }
 0x79c   :  { %3995 = vmatpush1.bf16.msra.mxu0 %v6148_v4 }
 0x79d   :  { %3996 = vmatprep.subr.bf16.mxu0 %v6156_v9 }
 0x7a0   :  { %3997 = vmatpush1.bf16.msra.mxu0 %v6154_v10 }
 0x7a1   :  { %3998 = vmatprep.subr.bf16.mxu0 %v6162_v11 }
 0x7a4   :  { %3999 = vmatpush1.bf16.msra.mxu0 %v6160_v15 }
 0x7a5   :  { %4000 = vmatprep.subr.bf16.mxu0 %v6168_v26  ;;  %v6184_v26 = vld [vmem:[%s8185_s17 + $0x8] sm:$0xff]  }
 0x7a8   :  { %4001 = vmatpush1.bf16.msra.mxu0 %v6166_v27  ;;  %v6185_v27 = vld [vmem:[%s8185_s17 + $0x88] sm:$0xff]  }
 0x7a9   :  { %4002 = vmatprep.subr.bf16.mxu0 %v6174_v29  ;;  %v6188_v29 = vld [vmem:[%s8185_s17 + $0x10] sm:$0xff]  }
 0x7ac   :  { %4003 = vmatpush1.bf16.msra.mxu0 %v6172_v30  ;;  %v6189_v30 = vld [vmem:[%s8185_s17 + $0x90] sm:$0xff]  }
 0x7ad   :  { %5506 = vmatprep.subr.bf16.mxu0 %v6178_v34  ;;  %v6207_v34 = vld [vmem:[%s8185_s17 + $0xf8] sm:$0xff]  }
 0x7bc   :  { %v3124_v2 = vpop.f32.mrb[40].mxu1 }
 0x7bd   :  { %v3125_v37 = vadd.f32 %v3124_v2, %v2720_v35  ;;  %v3126_v12 = vpop.f32.mrb[41].mxu1  ;;  %v3499_v35 = vld [vmem:[#allocation34] sm:$0x3] }
 0x7be   :  { %v3127_v38 = vadd.f32 %v3126_v12, %v2724_v8  ;;  %v3128_v13 = vpop.f32.mrb[42].mxu1  ;;  %v3504_v9 = vrot.slane %v3499_v35, %v7669_v21  ;;  %v3508_v2 = vrot.slane %v3499_v35, %v7673_v24 }
 0x7bf   :  { %v3133_v16 = vmax.f32 %v3125_v37, 0.0  ;;  %v3129_v17 = vpop.f32.mrb[43].mxu1 }
 0x7c0   :  { %v3134_v18 = vmax.f32 %v3127_v38, 0.0 }
 0x7c1   :  { %v3201_v23 = vpack.c.bf16 %v3133_v16, %v3133_v16 }
 0x7c2   :  { %v3202_v19 = vpack.c.bf16 %v3134_v18, %v3134_v18  ;;  %v6180_v18 = vld [vmem:[%s8185_s17] sm:$0xff]  }
 0x7c4   :  { %3474 = vmatprep.mubr.bf16.mxu1 %v3202_v19  ;;  %v6181_v19 = vld [vmem:[%s8185_s17 + $0x80] sm:$0xff]  }
 0x7c5   :  { %3475 = vmatmul.mubr.bf16.vlgmr.msra.gmra.mrb[44].mxu1 %v3201_v23  ;;  %v6182_v23 = vld [vmem:[%s8185_s17 + $0x48] sm:$0xff]  }
 0x7c6   :  { %4014 = vmatpush1.bf16.msra.mxu1 %v6085_v20 }
 0x7c7   :  { %4015 = vmatprep.subr.bf16.mxu1 %v6093_v14  ;;  %v6183_v14 = vld [vmem:[%s8185_s17 + $0xc8] sm:$0xff]  }
 0x7ca   :  { %4016 = vmatpush1.bf16.msra.mxu1 %v6091_v28  ;;  %v6186_v28 = vld [vmem:[%s8185_s17 + $0x50] sm:$0xff]  }
 0x7cb   :  { %4017 = vmatprep.subr.bf16.mxu1 %v6099_v54  ;;  %v6187_v54 = vld [vmem:[%s8185_s17 + $0xd0] sm:$0xff]  }
 0x7ce   :  { %4018 = vmatpush1.bf16.msra.mxu1 %v6097_v57  ;;  %v6190_v57 = vld [vmem:[%s8185_s17 + $0x58] sm:$0xff]  }
 0x7cf   :  { %4019 = vmatprep.subr.bf16.mxu1 %v6105_v31  ;;  %v6191_v31 = vld [vmem:[%s8185_s17 + $0xd8] sm:$0xff]  }
 0x7d2   :  { %4020 = vmatpush1.bf16.msra.mxu1 %v6103_v33  ;;  %v6192_v33 = vld [vmem:[%s8185_s17 + $0x18] sm:$0xff]  }
 0x7d3   :  { %4021 = vmatprep.subr.bf16.mxu1 %v6111_v36  ;;  %v6193_v36 = vld [vmem:[%s8185_s17 + $0x98] sm:$0xff]  }
 0x7d6   :  { %4022 = vmatpush1.bf16.msra.mxu1 %v6109_v39  ;;  %v6194_v39 = vld [vmem:[%s8185_s17 + $0x60] sm:$0xff]  }
 0x7d7   :  { %4023 = vmatprep.subr.bf16.mxu1 %v6117_v40  ;;  %v6195_v40 = vld [vmem:[%s8185_s17 + $0xe0] sm:$0xff]  }
 0x7da   :  { %4024 = vmatpush1.bf16.msra.mxu1 %v6115_v41  ;;  %v6196_v41 = vld [vmem:[%s8185_s17 + $0x20] sm:$0xff]  }
 0x7db   :  { %4025 = vmatprep.subr.bf16.mxu1 %v6123_v44  ;;  %v6197_v44 = vld [vmem:[%s8185_s17 + $0xa0] sm:$0xff]  }
 0x7de   :  { %4026 = vmatpush1.bf16.msra.mxu1 %v6121_v45  ;;  %v6198_v45 = vld [vmem:[%s8185_s17 + $0x68] sm:$0xff]  }
 0x7df   :  { %4027 = vmatprep.subr.bf16.mxu1 %v6129_v42  ;;  %v6199_v42 = vld [vmem:[%s8185_s17 + $0xe8] sm:$0xff]  }
 0x7e2   :  { %4028 = vmatpush1.bf16.msra.mxu1 %v6127_v43  ;;  %v6200_v43 = vld [vmem:[%s8185_s17 + $0x28] sm:$0xff]  }
 0x7e3   :  { %4029 = vmatprep.subr.bf16.mxu1 %v6135_v48  ;;  %v6201_v48 = vld [vmem:[%s8185_s17 + $0xa8] sm:$0xff]  }
 0x7e6   :  { %4030 = vmatpush1.bf16.msra.mxu1 %v6133_v46  ;;  %v5195_v46 = vld [vmem:[#allocation31] ss:$0 sm:$0xff] }
 0x7e7   :  { %4031 = vmatprep.subr.bf16.mxu1 %v6141_v49 }
 0x7ea   :  { %4032 = vmatpush1.bf16.msra.mxu1 %v6139_v47 }
 0x7eb   :  { %4033 = vmatprep.subr.bf16.mxu1 %v6147_v50 }
 0x7ee   :  { %4034 = vmatpush1.bf16.msra.mxu1 %v6145_v51 }
 0x7ef   :  { %4035 = vmatprep.subr.bf16.mxu1 %v6153_v52 }
 0x7f2   :  { %4036 = vmatpush1.bf16.msra.mxu1 %v6151_v53 }
 0x7f3   :  { %4037 = vmatprep.subr.bf16.mxu1 %v6159_v55 }
 0x7f6   :  { %4038 = vmatpush1.bf16.msra.mxu1 %v6157_v56 }
 0x7f7   :  { %4039 = vmatprep.subr.bf16.mxu1 %v6165_v58  ;;  %v6202_v58 = vld [vmem:[%s8185_s17 + $0x70] sm:$0xff]  }
 0x7fa   :  { %4040 = vmatpush1.bf16.msra.mxu1 %v6163_v60  ;;  %v6203_v60 = vld [vmem:[%s8185_s17 + $0xf0] sm:$0xff]  }
 0x7fb   :  { %4041 = vmatprep.subr.bf16.mxu1 %v6171_v62 }
 0x7fe   :  { %4042 = vmatpush1.bf16.msra.mxu1 %v6169_v63  ;;  %v6204_v63 = vld [vmem:[%s8185_s17 + $0x30] sm:$0xff]  }
 0x7ff   :  { %4043 = vmatprep.subr.bf16.mxu1 %v6177_v1  ;;  %v6205_v1 = vld [vmem:[%s8185_s17 + $0xb0] sm:$0xff]  }
 0x802   :  { %4044 = vmatpush1.bf16.msra.mxu1 %v6175_v3  ;;  %v6206_v3 = vld [vmem:[%s8185_s17 + $0x78] sm:$0xff]  }
 0x803   :  { %5528 = vmatprep.subr.bf16.mxu1 %v6179_v5  ;;  %v6208_v5 = vld [vmem:[%s8185_s17 + $0x38] sm:$0xff]  }
 0x83a   :  { %v5478_v6 = vpop.f32.mrb[24].mxu0 }
 0x83b   :  { %v5479_v61 = vpop.f32.mrb[25].mxu0 }
 0x83c   :  { %v7985_v7 = vadd.f32 %v5479_v61, %v5478_v6  ;;  %v5481_v4 = vpop.f32.mrb[26].mxu0  ;;  %v6209_v6 = vld [vmem:[%s8185_s17 + $0xb8] sm:$0xff]  }
 0x83d   :  { %v5482_v8 = vpop.f32.mrb[27].mxu0 }
 0x83e   :  { %v3437_v50 = vadd.f32 %v7985_v7, %v5195_v46  ;;  %v6217_v46 = vld [vmem:[%s8186_s29 + $0x20] ss:$8 sps:$4 sm:$0xff]  }
 0x842   :  { %v3555_v10 = vpop.f32.mrb[28].mxu0 }
 0x843   :  { %v3556_v37 = vadd.f32 %v3555_v10, %v3504_v9  ;;  %v3557_v12 = vpop.f32.mrb[29].mxu0 }
 0x844   :  { %v3558_v38 = vadd.f32 %v3557_v12, %v3508_v2  ;;  %v3559_v13 = vpop.f32.mrb[30].mxu0 }
 0x845   :  { %v3562_v15 = vmax.f32 %v3556_v37, 0.0  ;;  %v3560_v11 = vpop.f32.mrb[31].mxu0 }
 0x846   :  { %v3563_v16 = vmax.f32 %v3558_v38, 0.0  ;;  %v3630_v38 = vld [vmem:[#allocation37] sm:$0xf] }
 0x847   :  { %v3628_v20 = vpack.c.bf16 %v3562_v15, %v3562_v15  ;;  %v3635_v13 = vrot.slane %v3630_v38, %v7669_v21  ;;  %v3643_v15 = vrot.slane %v3630_v38, %v7671_v22  ;;  %v3639_v11 = vrot.slane %v3630_v38, %v7673_v24 }
 0x848   :  { %v3629_v17 = vpack.c.bf16 %v3563_v16, %v3563_v16  ;;  %v3647_v16 = vrot.slane %v3630_v38, %v7675_v25 }
 0x84a   :  { %4004 = vmatprep.mubr.bf16.mxu0 %v3629_v17  ;;  %4045 = vmatprep.mubr.bf16.mxu1 %v3629_v17 }
 0x84b   :  { %4005 = vmatmul.mubr.bf16.vlgmr.msra.gmra.mrb[32].mxu0 %v3628_v20  ;;  %4046 = vmatmul.mubr.bf16.vlgmr.msra.gmra.mrb[48].mxu1 %v3628_v20 }
 0x84c   :  { %5507 = vmatpush3.bf16.msra.mxu0 %v6180_v18  ;;  %5529 = vmatpush3.bf16.msra.mxu1 %v6181_v19 }
 0x84d   :  { %5508 = vmatprep.subr.bf16.mxu0 %v6182_v23  ;;  %5530 = vmatprep.subr.bf16.mxu1 %v6183_v14 }
 0x850   :  { %5509 = vmatpush3.bf16.msra.mxu0 %v6184_v26  ;;  %5531 = vmatpush3.bf16.msra.mxu1 %v6185_v27 }
 0x851   :  { %5510 = vmatprep.subr.bf16.mxu0 %v6186_v28  ;;  %5532 = vmatprep.subr.bf16.mxu1 %v6187_v54 }
 0x854   :  { %5511 = vmatpush3.bf16.msra.mxu0 %v6188_v29  ;;  %5533 = vmatpush3.bf16.msra.mxu1 %v6189_v30 }
 0x855   :  { %5512 = vmatprep.subr.bf16.mxu0 %v6190_v57  ;;  %5534 = vmatprep.subr.bf16.mxu1 %v6191_v31 }
 0x858   :  { %5513 = vmatpush3.bf16.msra.mxu0 %v6192_v33  ;;  %5535 = vmatpush3.bf16.msra.mxu1 %v6193_v36 }
 0x859   :  { %5514 = vmatprep.subr.bf16.mxu0 %v6194_v39  ;;  %5536 = vmatprep.subr.bf16.mxu1 %v6195_v40  ;;  %v6210_v39 = vld [vmem:[#allocation40] sm:$0xff]  }
 0x85c   :  { %5515 = vmatpush3.bf16.msra.mxu0 %v6196_v41  ;;  %5537 = vmatpush3.bf16.msra.mxu1 %v6197_v44  ;;  %v6213_v44 = vld [vmem:[%s8186_s29 + $0x4] ss:$8 sps:$4 sm:$0xff]  }
 0x85d   :  { %5516 = vmatprep.subr.bf16.mxu0 %v6198_v45  ;;  %5538 = vmatprep.subr.bf16.mxu1 %v6199_v42  ;;  %v6211_v45 = vld [vmem:[%s8186_s29] ss:$8 sps:$4 sm:$0xff]   ;;  %v6216_v42 = vld [vmem:[%s8186_s29 + $0x14] ss:$8 sps:$4 sm:$0xff]  }
 0x860   :  { %5517 = vmatpush3.bf16.msra.mxu0 %v6200_v43  ;;  %5539 = vmatpush3.bf16.msra.mxu1 %v6201_v48  ;;  %v6214_v43 = vld [vmem:[%s8186_s29 + $0x10] ss:$8 sps:$4 sm:$0xff]   ;;  %v6219_v48 = vld [vmem:[%s8186_s29 + $0x24] ss:$8 sps:$4 sm:$0xff]  }
 0x861   :  { %5518 = vmatprep.subr.bf16.mxu0 %v6202_v58  ;;  %5540 = vmatprep.subr.bf16.mxu1 %v6203_v60  ;;  %v6236_v58 = vld [vmem:[%s8187_s15] sm:$0xff]   ;;  %v6237_v60 = vld [vmem:[%s8187_s15 + $0x48] sm:$0xff]  }
 0x864   :  { %5519 = vmatpush3.bf16.msra.mxu0 %v6204_v63  ;;  %5541 = vmatpush3.bf16.msra.mxu1 %v6205_v1  ;;  %v6239_v63 = vld [vmem:[%s8187_s15 + $0x50] sm:$0xff]  }
 0x865   :  { %5520 = vmatprep.subr.bf16.mxu0 %v6206_v3  ;;  %5542 = vmatprep.subr.bf16.mxu1 %v6207_v34  ;;  %v6240_v1 = vld [vmem:[%s8187_s15 + $0x10] sm:$0xff]   ;;  %v6241_v3 = vld [vmem:[%s8187_s15 + $0x58] sm:$0xff]  }
 0x866   :  { %v6242_v34 = vld [vmem:[%s8187_s15 + $0x18] sm:$0xff]  }
 0x868   :  { %5521 = vmatpush3.bf16.msra.mxu0 %v6208_v5  ;;  %5543 = vmatpush3.bf16.msra.mxu1 %v6209_v6  ;;  %v6243_v5 = vld [vmem:[%s8187_s15 + $0x60] sm:$0xff]  }
 0x869   :  { %5646 = vmatprep.subr.bf16.mxu0 %v7151_v32  ;;  %v6244_v6 = vld [vmem:[%s8187_s15 + $0x20] sm:$0xff]  }
 0x898   :  { %v5500_v49 = vpop.f32.mrb[44].mxu1 }
 0x899   :  { %v5501_v47 = vpop.f32.mrb[45].mxu1 }
 0x89a   :  { %v5502_v51 = vadd.f32 %v5501_v47, %v5500_v49  ;;  %v5503_v52 = vpop.f32.mrb[46].mxu1  ;;  %v6220_v49 = vld [vmem:[%s8186_s29 + $0x30] ss:$8 sps:$4 sm:$0xff]   ;;  %v6223_v47 = vld [vmem:[%s8186_s29 + $0x40] ss:$8 sps:$4 sm:$0xff]  }
 0x89b   :  { %v5504_v53 = vpop.f32.mrb[47].mxu1  ;;  %v6229_v52 = vld [vmem:[%s8186_s29 + $0x60] ss:$8 sps:$4 sm:$0xff]  }
 0x89c   :  { %v3477_v55 = vadd.f32 %v5502_v51, %v3437_v50  ;;  %v6226_v50 = vld [vmem:[%s8186_s29 + $0x50] ss:$8 sps:$4 sm:$0xff]   ;;  %v6231_v51 = vld [vmem:[%s8186_s29 + $0x64] ss:$8 sps:$4 sm:$0xff]   ;;  %v6234_v53 = vld [vmem:[%s8186_s29 + $0x74] ss:$8 sps:$4 sm:$0xff]  }
 0x89e   :  { %v3483_v56 = vmin.f32 %v3477_v55, 20.0  ;;  %vm3482_vm6 = vcmp.gt.f32.partialorder %v3477_v55, 20.0 }
 0x8a0   :  { %v3484_v62 = vmul.f32 1.442695, %v3483_v56  ;;  %v6235_v56 = vld [vmem:[%s8187_s15 + $0x40] sm:$0xff]  }
 0x8a1   :  { %5552 = vmatprep.subr.bf16.mxu1 %v6235_v56 }
 0x8a2   :  { %6267 = vpow2.f32 %v3484_v62  ;;  %v6238_v62 = vld [vmem:[%s8187_s15 + $0x8] sm:$0xff]  }
 0x8ac   :  { %v6268_v61 = vpop.eup %6267 }
 0x8ad   :  { %v3486_v7 = vadd.f32 1.0, %v6268_v61  ;;  %v3489_v4 = vmul.f32 -0.5, %v6268_v61  ;;  %v3492_v8 = vand.u32 2147483647, %v6268_v61 }
 0x8af   :  { %6269 = vlog2.f32 %v3486_v7  ;;  %v3490_v35 = vadd.f32 1.0, %v3489_v4  ;;  %vm3493_vm5 = vcmp.lt.f32.partialorder %v3492_v8, 0.0004427343  ;;  %v6246_v7 = vld [vmem:[%s8187_s15 + $0x28] sm:$0xff]   ;;  %v5295_v8 = vld [vmem:[#allocation38] ss:$0 sm:$0xff] }
 0x8b1   :  { %v3491_v10 = vmul.f32 %v6268_v61, %v3490_v35  ;;  %v6245_v61 = vld [vmem:[%s8187_s15 + $0x68] sm:$0xff]  }
 0x8b9   :  { %v6270_v9 = vpop.eup %6269 }
 0x8ba   :  { %v3488_v2 = vmul.f32 0.6931472, %v6270_v9 }
 0x8bc   :  { %v3494_v37 = vsel %vm3493_vm5, %v3491_v10, %v3488_v2 }
 0x8bd   :  { %v3495_v12 = vsel %vm3482_vm6, %v3477_v55, %v3494_v37  ;;  %v6232_v55 = vld [vmem:[%s8186_s29 + $0x70] ss:$8 sps:$4 sm:$0xff]  }
 0x8be   :  { %3496 = vst.msk [vmem:[#allocation50] sm:$0xff] %vm601_vm0, %v3495_v12 }
 0x91e   :  { %v4006_v17 = vpop.f32.mrb[32].mxu0  ;;  %v4047_v18 = vpop.f32.mrb[48].mxu1 }
 0x91f   :  { %v4007_v19 = vadd.f32 %v4006_v17, %v3635_v13  ;;  %v4048_v20 = vadd.f32 %v4047_v18, %v3643_v15  ;;  %v4008_v23 = vpop.f32.mrb[33].mxu0  ;;  %v4049_v14 = vpop.f32.mrb[49].mxu1  ;;  %v5328_v17 = vld [vmem:[#allocation41] ss:$0 sm:$0xff] }
 0x920   :  { %v4009_v26 = vadd.f32 %v4008_v23, %v3639_v11  ;;  %v4050_v27 = vadd.f32 %v4049_v14, %v3647_v16  ;;  %v4010_v28 = vpop.f32.mrb[34].mxu0  ;;  %v4051_v54 = vpop.f32.mrb[50].mxu1 }
 0x921   :  { %v4054_v29 = vmax.f32 %v4007_v19, 0.0  ;;  %v4056_v30 = vmax.f32 %v4048_v20, 0.0  ;;  %v4011_v57 = vpop.f32.mrb[35].mxu0  ;;  %v4052_v31 = vpop.f32.mrb[51].mxu1 }
 0x922   :  { %v4055_v22 = vmax.f32 %v4009_v26, 0.0  ;;  %v4057_v33 = vmax.f32 %v4050_v27, 0.0 }
 0x923   :  { %v4122_v40 = vpack.c.bf16 %v4054_v29, %v4054_v29  ;;  %v4124_v41 = vpack.c.bf16 %v4056_v30, %v4056_v30 }
 0x924   :  { %v4123_v25 = vpack.c.bf16 %v4055_v22, %v4055_v22  ;;  %v4125_v36 = vpack.c.bf16 %v4057_v33, %v4057_v33 }
 0x926   :  { %4357 = vmatprep.mubr.bf16.mxu0 %v4123_v25  ;;  %4397 = vmatprep.mubr.bf16.mxu1 %v4125_v36 }
 0x927   :  { %4358 = vmatmul.mubr.bf16.vlgmr.msra.gmra.mrb[36].mxu0 %v4122_v40  ;;  %4398 = vmatmul.mubr.bf16.vlgmr.msra.gmra.mrb[52].mxu1 %v4124_v41  ;;  %v6247_v41 = vld [vmem:[%s8187_s15 + $0x70] sm:$0xff]  }
 0x928   :  { %5647 = vmatpush3.bf16.msra.mxu0 %v6210_v39  ;;  %5648 = vmatprep.mubr.msk.bf16.mxu0 %vm7152_vm2, %v7151_v32  ;;  %v6222_v32 = vld [vmem:[%s8186_s29 + $0x34] ss:$8 sps:$4 sm:$0xff]  }
 0x929   :  { %4585 = vmatprep.subr.bf16.mxu0 %v6213_v44  ;;  %5553 = vmatpush3.bf16.msra.mxu1 %v6236_v58  ;;  %v6248_v44 = vld [vmem:[%s8187_s15 + $0x30] sm:$0xff]  }
 0x92a   :  { %5554 = vmatprep.subr.bf16.mxu1 %v6237_v60 }
 0x92d   :  { %5555 = vmatpush3.bf16.msra.mxu1 %v6238_v62 }
 0x92e   :  { %5556 = vmatprep.subr.bf16.mxu1 %v6239_v63 }
 0x92f   :  { %5649 = vmatmul.mubr.msk.bf16.vlgmr.msra.gmra.mrb[40].mxu0 %vm1481_vm1, %v7845_v59  ;;  %v6225_v59 = vld [vmem:[%s8186_s29 + $0x44] ss:$8 sps:$4 sm:$0xff]  }
 0x930   :  { %4586 = vmatpush1.bf16.msra.mxu0 %v6211_v45  ;;  %4617 = vmatprep.mubr.bf16.mxu0 %v7150_v0  ;;  %v6228_v0 = vld [vmem:[%s8186_s29 + $0x54] ss:$8 sps:$4 sm:$0xff]  }
 0x931   :  { %4587 = vmatprep.subr.bf16.mxu0 %v6216_v42  ;;  %5557 = vmatpush3.bf16.msra.mxu1 %v6240_v1  ;;  %v6249_v45 = vld [vmem:[%s8187_s15 + $0x78] sm:$0xff]  }
 0x932   :  { %5558 = vmatprep.subr.bf16.mxu1 %v6241_v3  ;;  %v6250_v42 = vld [vmem:[%s8187_s15 + $0x38] sm:$0xff]  }
 0x934   :  { %4588 = vmatpush1.bf16.msra.mxu0 %v6214_v43  ;;  %v4493_v43 = vld [vmem:[#allocation43] sm:$0x3] }
 0x935   :  { %4589 = vmatprep.subr.bf16.mxu0 %v6219_v48  ;;  %5559 = vmatpush3.bf16.msra.mxu1 %v6242_v34  ;;  %v4498_v48 = vrot.slane %v4493_v43, %v7669_v21 }
 0x936   :  { %5560 = vmatprep.subr.bf16.mxu1 %v6243_v5 }
 0x938   :  { %4590 = vmatpush1.bf16.msra.mxu0 %v6217_v46  ;;  %v4502_v46 = vrot.slane %v4493_v43, %v7673_v24 }
 0x939   :  { %4591 = vmatprep.subr.bf16.mxu0 %v6222_v32  ;;  %5561 = vmatpush3.bf16.msra.mxu1 %v6244_v6 }
 0x93a   :  { %5562 = vmatprep.subr.bf16.mxu1 %v6245_v61 }
 0x93c   :  { %4592 = vmatpush1.bf16.msra.mxu0 %v6220_v49 }
 0x93d   :  { %4593 = vmatprep.subr.bf16.mxu0 %v6225_v59  ;;  %5563 = vmatpush3.bf16.msra.mxu1 %v6246_v7 }
 0x93e   :  { %5564 = vmatprep.subr.bf16.mxu1 %v6247_v41 }
 0x940   :  { %4594 = vmatpush1.bf16.msra.mxu0 %v6223_v47 }
 0x941   :  { %4595 = vmatprep.subr.bf16.mxu0 %v6228_v0  ;;  %5565 = vmatpush3.bf16.msra.mxu1 %v6248_v44 }
 0x942   :  { %5566 = vmatprep.subr.bf16.mxu1 %v6249_v45 }
 0x944   :  { %4596 = vmatpush1.bf16.msra.mxu0 %v6226_v50 }
 0x945   :  { %4597 = vmatprep.subr.bf16.mxu0 %v6231_v51  ;;  %5567 = vmatpush3.bf16.msra.mxu1 %v6250_v42 }
 0x948   :  { %4598 = vmatpush1.bf16.msra.mxu0 %v6229_v52 }
 0x949   :  { %4599 = vmatprep.subr.bf16.mxu0 %v6234_v53 }
 0x94c   :  { %4600 = vmatpush1.bf16.msra.mxu0 %v6232_v55 }
 0x9fa   :  { %v5522_v4 = vpop.f32.mrb[36].mxu0  ;;  %v5544_v35 = vpop.f32.mrb[52].mxu1 }
 0x9fb   :  { %v5523_v9 = vpop.f32.mrb[37].mxu0  ;;  %v5545_v2 = vpop.f32.mrb[53].mxu1 }
 0x9fc   :  { %v5524_v10 = vadd.f32 %v5523_v9, %v5522_v4  ;;  %v5546_v37 = vadd.f32 %v5545_v2, %v5544_v35  ;;  %v5525_v12 = vpop.f32.mrb[38].mxu0  ;;  %v5547_v38 = vpop.f32.mrb[54].mxu1 }
 0x9fd   :  { %v5526_v13 = vpop.f32.mrb[39].mxu0  ;;  %v5548_v15 = vpop.f32.mrb[55].mxu1 }
 0x9fe   :  { %v4360_v11 = vadd.f32 %v5524_v10, %v5295_v8 }
 0xa00   :  { %v4400_v16 = vadd.f32 %v5546_v37, %v4360_v11 }
 0xa02   :  { %v4406_v18 = vmin.f32 %v4400_v16, 20.0  ;;  %v4469_v19 = vpop.f32.mrb[40].mxu0  ;;  %vm4405_vm8 = vcmp.gt.f32.partialorder %v4400_v16, 20.0 }
 0xa03   :  { %v4470_v20 = vadd.f32 %v5328_v17, %v4469_v19  ;;  %v5650_v23 = vpop.f32.mrb[41].mxu0 }
 0xa04   :  { %v4407_v14 = vmul.f32 1.442695, %v4406_v18  ;;  %v4472_v26 = vpop.f32.mrb[42].mxu0 }
 0xa05   :  { %v4475_v27 = vmax.f32 %v4470_v20, 0.0  ;;  %v5651_v28 = vpop.f32.mrb[43].mxu0 }
 0xa06   :  { %6271 = vpow2.f32 %v4407_v14 }
 0xa07   :  { %v4492_v54 = vpack.c.bf16 %v4475_v27, %v4475_v27 }
 0xa09   :  { %4618 = vmatmul.mubr.bf16.vlgmr.msra.gmra.mrb[44].mxu0 %v4492_v54 }
 0xa10   :  { %v6272_v29 = vpop.eup %6271 }
 0xa11   :  { %v4409_v30 = vadd.f32 1.0, %v6272_v29  ;;  %v4412_v57 = vmul.f32 -0.5, %v6272_v29  ;;  %v4415_v22 = vand.u32 2147483647, %v6272_v29 }
 0xa13   :  { %6273 = vlog2.f32 %v4409_v30  ;;  %v4413_v31 = vadd.f32 1.0, %v4412_v57  ;;  %vm4416_vm7 = vcmp.lt.f32.partialorder %v4415_v22, 0.0004427343 }
 0xa15   :  { %v4414_v36 = vmul.f32 %v6272_v29, %v4413_v31 }
 0xa1d   :  { %v6274_v33 = vpop.eup %6273 }
 0xa1e   :  { %v4411_v25 = vmul.f32 0.6931472, %v6274_v33 }
 0xa20   :  { %v4417_v39 = vsel %vm4416_vm7, %v4414_v36, %v4411_v25 }
 0xa21   :  { %v4418_v40 = vsel %vm4405_vm8, %v4400_v16, %v4417_v39 }
 0xa22   :  { %4419 = vst.msk [vmem:[#allocation52] sm:$0xff] %vm601_vm0, %v4418_v40 }
 0xadc   :  { %v4619_v32 = vpop.f32.mrb[44].mxu0 }
 0xadd   :  { %v4620_v49 = vadd.f32 %v4619_v32, %v4498_v48  ;;  %v4621_v59 = vpop.f32.mrb[45].mxu0 }
 0xade   :  { %v4622_v47 = vadd.f32 %v4621_v59, %v4502_v46  ;;  %v4623_v0 = vpop.f32.mrb[46].mxu0 }
 0xadf   :  { %v4626_v50 = vmax.f32 %v4620_v49, 0.0  ;;  %v4624_v51 = vpop.f32.mrb[47].mxu0 }
 0xae0   :  { %v4627_v52 = vmax.f32 %v4622_v47, 0.0 }
 0xae1   :  { %v4660_v55 = vpack.c.bf16 %v4626_v50, %v4626_v50 }
 0xae2   :  { %v4661_v53 = vpack.c.bf16 %v4627_v52, %v4627_v52 }
 0xae4   :  { %4797 = vmatprep.mubr.bf16.mxu1 %v4661_v53 }
 0xae5   :  { %4798 = vmatmul.mubr.bf16.vlgmr.msra.gmra.mrb[56].mxu1 %v4660_v55 }
 0xae6   :  { %6906 = shalt.err (!%p6903_p4)
}
 0xae7   :  { %s8188_s12 = sld [smem:[#allocation107_spill]] }
 0xaed   :  { %s6907_s25 = scalar_lea.hbm %s8188_s12, 128 }
 0xaee   :  { %p6908_p5 = scmp.ne.s32.totalorder %s8188_s12, %s6907_s25  ;;  %p6911_p6 = scmp.lt.u32.totalorder %s6907_s25, %s8188_s12 }
 0xaf0   :  { %p6913_p7 = pnand %p6911_p6, %p6908_p5 }
 0xaf2   :  { %6916 = shalt.err (!%p6913_p7)
}
 0xaf3   :  { %4831 = dma.vmem_to_hbm [thread:$0]  %s4829_s18, 128, %s8188_s12, [#allocation48]  }
 0xaf4   :  { %s6917_s0 = scalar_lea.vmem %s4849_s13, 128  ;;  %p6922_p9 = scmp.lt.s32.totalorder %s4849_s13, %s4849_s13 }
 0xaf5   :  { %p6918_p8 = scmp.ne.s32.totalorder %s4849_s13, %s6917_s0  ;;  %p6923_p10 = scmp.lt.s32.totalorder %s6917_s0, %s6917_s0 }
 0xaf7   :  { %p6924_p11 = por %p6923_p10, %p6922_p9 }
 0xaf9   :  { %p6925_p12 = pnand %p6924_p11, %p6918_p8 }
 0xafb   :  { %6928 = shalt.err (!%p6925_p12)
}
 0xafc   :  { %s6929_s4 = scalar_lea.hbm %s7412_s3, 128 }
 0xafd   :  { %p6930_p13 = scmp.ne.s32.totalorder %s7412_s3, %s6929_s4  ;;  %p6933_p0 = scmp.lt.u32.totalorder %s6929_s4, %s7412_s3 }
 0xaff   :  { %p6935_p1 = pnand %p6933_p0, %p6930_p13 }
 0xb01   :  { %6938 = shalt.err (!%p6935_p1)
}
 0xb02   :  { %4851 = dma.vmem_to_hbm [thread:$0]  %s4849_s13, 128, %s7412_s3, [#allocation51]  }
 0xb03   :  { %s7155_s22 = smov [#allocation46]   ;;  %s7156_s14 = smov [#allocation49]  }
 0xb04   :  { %s4818_s23 = sshll.u32 %s7155_s22, 4  ;;  %s4838_s30 = sshll.u32 %s7156_s14, 4  ;;  %s4819_s23 = int_to_ptr.vmem [resolvable:$true] %s4818_s23  ;;  %s4839_s30 = int_to_ptr.vmem [resolvable:$true] %s4838_s30 }
 0xb05   :  { %s6939_s9 = scalar_lea.vmem %s4819_s23, 128  ;;  %p6944_p3 = scmp.lt.s32.totalorder %s4819_s23, %s4819_s23 }
 0xb06   :  { %p6940_p2 = scmp.ne.s32.totalorder %s4819_s23, %s6939_s9  ;;  %p6945_p4 = scmp.lt.s32.totalorder %s6939_s9, %s6939_s9 }
 0xb08   :  { %p6946_p5 = por %p6945_p4, %p6944_p3 }
 0xb0a   :  { %p6947_p6 = pnand %p6946_p5, %p6940_p2 }
 0xb0c   :  { %6950 = shalt.err (!%p6947_p6)
}
 0xb0d   :  { %s8189_s26 = sld [smem:[#allocation106_spill]] }
 0xb13   :  { %s6951_s28 = scalar_lea.hbm %s8189_s26, 128 }
 0xb14   :  { %p6952_p7 = scmp.ne.s32.totalorder %s8189_s26, %s6951_s28  ;;  %p6955_p8 = scmp.lt.u32.totalorder %s6951_s28, %s8189_s26 }
 0xb16   :  { %p6957_p9 = pnand %p6955_p8, %p6952_p7 }
 0xb18   :  { %6960 = shalt.err (!%p6957_p9)
}
 0xb19   :  { %4821 = dma.vmem_to_hbm [thread:$0]  %s4819_s23, 128, %s8189_s26, [#allocation4]  }
 0xb1a   :  { %s6961_s3 = scalar_lea.vmem %s4839_s30, 128  ;;  %p6966_p11 = scmp.lt.s32.totalorder %s4839_s30, %s4839_s30 }
 0xb1b   :  { %p6962_p10 = scmp.ne.s32.totalorder %s4839_s30, %s6961_s3  ;;  %p6967_p12 = scmp.lt.s32.totalorder %s6961_s3, %s6961_s3 }
 0xb1d   :  { %p6968_p13 = por %p6967_p12, %p6966_p11 }
 0xb1f   :  { %p6969_p0 = pnand %p6968_p13, %p6962_p10 }
 0xb21   :  { %6972 = shalt.err (!%p6969_p0)
}
 0xb22   :  { %s6973_s1 = scalar_lea.hbm %s7407_s6, 128 }
 0xb23   :  { %p6974_p1 = scmp.ne.s32.totalorder %s7407_s6, %s6973_s1  ;;  %p6977_p2 = scmp.lt.u32.totalorder %s6973_s1, %s7407_s6 }
 0xb25   :  { %p6979_p3 = pnand %p6977_p2, %p6974_p1 }
 0xb27   :  { %6982 = shalt.err (!%p6979_p3)
}
 0xb28   :  { %4841 = dma.vmem_to_hbm [thread:$0]  %s4839_s30, 128, %s7407_s6, [#allocation48]  }
 0xb29   :  { %s7157_s21 = smov [#allocation52]  }
 0xb2a   :  { %s4858_s5 = sshll.u32 %s7157_s21, 4  ;;  %s4859_s5 = int_to_ptr.vmem [resolvable:$true] %s4858_s5 }
 0xb2b   :  { %s6983_s2 = scalar_lea.vmem %s4859_s5, 128  ;;  %p6988_p5 = scmp.lt.s32.totalorder %s4859_s5, %s4859_s5 }
 0xb2c   :  { %p6984_p4 = scmp.ne.s32.totalorder %s4859_s5, %s6983_s2  ;;  %p6989_p6 = scmp.lt.s32.totalorder %s6983_s2, %s6983_s2 }
 0xb2e   :  { %p6990_p7 = por %p6989_p6, %p6988_p5 }
 0xb30   :  { %p6991_p8 = pnand %p6990_p7, %p6984_p4 }
 0xb32   :  { %6994 = shalt.err (!%p6991_p8)
}
 0xb33   :  { %s6995_s7 = scalar_lea.hbm %s7417_s27, 128 }
 0xb34   :  { %p6996_p9 = scmp.ne.s32.totalorder %s7417_s27, %s6995_s7  ;;  %p6999_p10 = scmp.lt.u32.totalorder %s6995_s7, %s7417_s27 }
 0xb36   :  { %p7001_p11 = pnand %p6999_p10, %p6996_p9 }
 0xb38   :  { %7004 = shalt.err (!%p7001_p11)
}
 0xb39   :  { %4861 = dma.vmem_to_hbm [thread:$0]  %s4859_s5, 128, %s7417_s27, [#allocation51]   ;;  %v5347_v24 = vld [vmem:[#allocation44] ss:$0 sm:$0xff] }
 0xb3a   :  { %s7158_s6 = smov [#allocation53]  }
 0xb3b   :  { %s4868_s10 = sshll.u32 %s7158_s6, 4  ;;  %s4869_s10 = int_to_ptr.vmem [resolvable:$true] %s4868_s10 }
 0xb3c   :  { %s7005_s20 = scalar_lea.vmem %s4869_s10, 128  ;;  %p7010_p13 = scmp.lt.s32.totalorder %s4869_s10, %s4869_s10 }
 0xb3d   :  { %p7006_p12 = scmp.ne.s32.totalorder %s4869_s10, %s7005_s20  ;;  %p7011_p0 = scmp.lt.s32.totalorder %s7005_s20, %s7005_s20 }
 0xb3f   :  { %p7012_p1 = por %p7011_p0, %p7010_p13 }
 0xb41   :  { %p7013_p2 = pnand %p7012_p1, %p7006_p12 }
 0xbb8   :  { %v5568_v21 = vpop.f32.mrb[56].mxu1 }
 0xbb9   :  { %v5569_v56 = vpop.f32.mrb[57].mxu1 }
 0xbba   :  { %v5570_v58 = vadd.f32 %v5569_v56, %v5568_v21  ;;  %v5571_v60 = vpop.f32.mrb[58].mxu1 }
 0xbbb   :  { %v5572_v62 = vpop.f32.mrb[59].mxu1 }
 0xbbc   :  { %v4800_v63 = vadd.f32 %v5570_v58, %v5347_v24 }
 0xbbe   :  { %v5364_v1 = vmul.f32 -1.442695, %v4800_v63 }
 0xbc0   :  { %6275 = vpow2.f32 %v5364_v1 }
 0xbca   :  { %v6276_v3 = vpop.eup %6275 }
 0xbcb   :  { %v4808_v34 = vadd.f32 1.0, %v6276_v3 }
 0xbcd   :  { %6277 = vrcp.f32 %v4808_v34 }
 0xbd7   :  { %v6278_v5 = vpop.eup %6277 }
 0xbd8   :  { %4811 = vst.msk [vmem:[#allocation53] sm:$0xff] %vm1481_vm1, %v6278_v5 }
 0xbd9   :  { %7016 = shalt.err (!%p7013_p2)
}
 0xbda   :  { %s7017_s27 = scalar_lea.hbm %s7422_s19, 128 }
 0xbdb   :  { %p7018_p3 = scmp.ne.s32.totalorder %s7422_s19, %s7017_s27  ;;  %p7021_p4 = scmp.lt.u32.totalorder %s7017_s27, %s7422_s19 }
 0xbdd   :  { %p7023_p5 = pnand %p7021_p4, %p7018_p3 }
 0xbdf   :  { %7026 = shalt.err (!%p7023_p5)
}
 0xbe0   :  { %4871 = dma.vmem_to_hbm [thread:$0]  %s4869_s10, 128, %s7422_s19, [#allocation54]  }
 0xbe1   :  { %7057 = dma.done.wait [#allocation4], 128  }
 0xbe2   :  { %7058 = vsyncadd [#allocation4], 4294967168 }
 0xbe3   :  { %7059 = dma.done.wait [#allocation48], 256  }
 0xbe4   :  { %7060 = vsyncadd [#allocation48], 4294967040 }
 0xbe5   :  { %7061 = dma.done.wait [#allocation51], 256  }
 0xbe6   :  { %7062 = vsyncadd [#allocation51], 4294967040 }
 0xbe7   :  { %7063 = dma.done.wait [#allocation54], 128  }
 0xbe8   :  { %7064 = vsyncadd [#allocation54], 4294967168 }
 0xbe9   :  { %4890 = vsyncpa [#allocation3], 1 }
 0xbea   :  { %4891 = vsyncpa [#allocation6], 1 }
 0xbeb   :  { %4892 = vsyncpa [#allocation9], 1 }
 0xbec   :  { %4893 = vsyncpa [#allocation12], 1 }
 0xbed   :  { %4894 = vsyncpa [#allocation15], 1 }
 0xbee   :  { %4895 = vsyncpa [#allocation18], 1 }
 0xbef   :  { %4896 = vsyncpa [#allocation21], 1 }
 0xbf0   :  { %4897 = vsyncpa [#allocation24], 1 }
 0xbf1   :  { %4898 = vsyncpa [#allocation27], 1 }
 0xbf2   :  { %4899 = vsyncpa [#allocation30], 1 }
 0xbf3   :  { %4900 = vsyncpa [#allocation33], 1 }
 0xbf4   :  { %4901 = vsyncpa [#allocation36], 1 }
 0xbf5   :  { %4902 = vsyncpa [#allocation39], 1 }
 0xbf6   :  { %4903 = vsyncpa [#allocation42], 1 }
 0xbf7   :  { %4904 = vsyncpa [#allocation45], 1 }
 0xbf8   :  { %4905 = vsyncpa [#allocation4], 1 }
 0xbf9   :  { %4906 = vsyncpa [#allocation48], 1 }
 0xbfa   :  { %4907 = vsyncpa [#allocation51], 1 }
 0xbfb   :  { %4908 = vsyncpa [#allocation54], 1 }

</bundles_post_ra>
